<compile_context>
chip_gen: v7x
topology: tpu7x:2x2x1
jax: 0.10.0
libtpu: 0.0.40
codegen_flags: <defaults>
</compile_context>

<pallas_src>
import functools
import math

import jax
import jax.numpy as jnp
from jax.experimental import pallas as pl
from jax.experimental.pallas import tpu as pltpu


# -----------------------------------------------------------------------------
# Config (small shapes, consistent with the module)
# -----------------------------------------------------------------------------
N_QUESTION   = 20
N_PID        = 10
D_MODEL      = 32
N_BLOCKS     = 1
N_HEADS      = 4
D_K          = D_MODEL // N_HEADS
D_FF         = 64
FINAL_FC_DIM = 64
KQ_SAME      = True          # kq_same == 1
L2           = 1e-5
BATCH        = 2
SEQLEN       = 8

N_LAYERS     = 3 * N_BLOCKS          # blocks_1 (1) + blocks_2 (2)
LAYER_WIDTH  = max(2 * D_MODEL, D_FF)   # 64
HEAD_WIDTH   = 256


# -----------------------------------------------------------------------------
# Static weight-slab layouts (Python ints, shared by host packer and kernel)
# -----------------------------------------------------------------------------
def _make_layout(parts):
    layout, off = {}, 0
    for name, r, c in parts:
        layout[name] = (off, r, c)
        off += ((r + 7) // 8) * 8          # keep every part 8-sublane aligned
    return layout, off


_LAYER_PARTS = [
    ("kqw",   N_HEADS * D_MODEL, D_K),      # per-head K/Q weight slices
    ("kqb",   N_HEADS,           D_K),
    ("vwo",   N_HEADS * D_MODEL, D_MODEL),  # per-head V weight with out_proj folded
    ("vbo",   N_HEADS,           D_MODEL),  # per-head V bias  with out_proj folded
    ("gneg",  N_HEADS,           1),        # -softplus(gamma) per head
    ("out_b", 1, D_MODEL),
    ("ln1_g", 1, D_MODEL),
    ("ln1_b", 1, D_MODEL),
    ("l1_w",  D_MODEL, D_FF),
    ("l1_b",  1, D_FF),
    ("l2_w",  D_FF, D_MODEL),
    ("l2_b",  1, D_MODEL),
    ("ln2_g", 1, D_MODEL),
    ("ln2_b", 1, D_MODEL),
]
LAYER_LAYOUT, LAYER_ROWS = _make_layout(_LAYER_PARTS)

_HEAD_PARTS = [
    ("w1", 2 * D_MODEL, FINAL_FC_DIM),
    ("b1", 1, FINAL_FC_DIM),
    ("w2", FINAL_FC_DIM, 256),
    ("b2", 1, 256),
    ("w3", 1, 256),            # final 256->1 weight as a row vector
    ("b3", 1, 1),
]
HEAD_LAYOUT, HEAD_ROWS = _make_layout(_HEAD_PARTS)


# -----------------------------------------------------------------------------
# Fused forward kernel (one grid step == one batch element)
# -----------------------------------------------------------------------------
def _layernorm(x, g, b):
    mean = jnp.mean(x, axis=-1, keepdims=True)
    var = jnp.mean((x - mean) ** 2, axis=-1, keepdims=True)
    return (x - mean) * jax.lax.rsqrt(var + 1e-5) * g + b


def _lw(ref, layer, name):
    off, r, c = LAYER_LAYOUT[name]
    base = layer * LAYER_ROWS + off
    return ref[base:base + r, 0:c]


def _hw(ref, name):
    off, r, c = HEAD_LAYOUT[name]
    return ref[off:off + r, 0:c]


def _akt_fused_kernel(x_ref, y_ref, tgt_ref, lw_ref, hw_ref,
                      preds_ref, bce_ref, *, S, D, H, d_k, scale):
    f32 = jnp.float32
    x0 = x_ref[0]                        # (S, D) q_embed   (reused by head)
    y0 = y_ref[0]                        # (S, D) qa_embed

    # --- per-sequence constants, built once from iotas -----------------------
    ri = jax.lax.broadcasted_iota(jnp.int32, (S, S), 0)
    ci = jax.lax.broadcasted_iota(jnp.int32, (S, S), 1)
    pos_eff = jnp.abs(ci - ri).astype(f32)[None]                 # (1,S,S)
    # (scores_ @ sl)[i,j] = sum_{k>j} scores_[i,k]  == disttotal - distcum
    sl3 = jnp.broadcast_to((ri > ci).astype(f32)[None], (H, S, S))
    mask_cur = (ci <= ri).astype(f32)        # mask flag == 1 (current + past)
    mask_past = (ci < ri).astype(f32)        # mask flag == 0 (strictly past)
    bias_cur = (1.0 - mask_cur) * (-1e32)
    bias_past = (1.0 - mask_past) * (-1e32)
    zp3 = (jax.lax.broadcasted_iota(jnp.int32, (1, S, 1), 1) > 0).astype(f32)

    def attention_block(layer, q_in, v_in, maskf, biasf, zero_pad):
        # per-head weights, head split already done on the host
        kqw3 = _lw(lw_ref, layer, "kqw").reshape(H, D, d_k)
        kqb3 = _lw(lw_ref, layer, "kqb").reshape(H, 1, d_k)
        vwo3 = _lw(lw_ref, layer, "vwo").reshape(H, D, D)
        vbo3 = _lw(lw_ref, layer, "vbo").reshape(H, 1, D)
        gneg3 = _lw(lw_ref, layer, "gneg").reshape(H, 1, 1)

        qb = jnp.broadcast_to(q_in[None], (H, S, D))
        vb = jnp.broadcast_to(v_in[None], (H, S, D))
        # q == k (kq_same and query-input == key-input in AKT): projected once.
        q3 = jnp.einsum('hsd,hdk->hsk', qb, kqw3,
                        preferred_element_type=f32) + kqb3        # (H,S,d_k)
        # V projection with out_proj folded in -> (H,S,D) contributions.
        vout3 = jnp.einsum('hsd,hde->hse', vb, vwo3,
                           preferred_element_type=f32) + vbo3     # (H,S,D)

        scores = jnp.einsum('hid,hjd->hij', q3, q3,
                            preferred_element_type=f32) * scale   # (H,S,S)

        # --- first (masked) softmax: distance statistics only ----------------
        masked = scores + biasf[None]
        m1 = jnp.max(masked, axis=-1, keepdims=True)
        e1 = jnp.exp(masked - m1)
        # keep the * mask: required for the fully-masked first row (mask=0).
        sc_ = e1 * pl.reciprocal(jnp.sum(e1, axis=-1, keepdims=True),
                                 approx=True) * maskf[None]
        dist = jnp.einsum('hij,hjk->hik', sc_, sl3,
                          preferred_element_type=f32)    # disttotal - distcum
        dist_scores = jnp.sqrt(jnp.maximum(dist * pos_eff, 0.0))
        total_effect = jnp.clip(jnp.exp(dist_scores * gneg3), 1e-5, 1e5)

        scores2 = scores * total_effect
        # Reference: `scores.masked_fill(mask == 0, -1e23)` is a no-op (not
        # assigned), so the second softmax is intentionally unmasked.
        m2 = jnp.max(scores2, axis=-1, keepdims=True)
        e2 = jnp.exp(scores2 - m2)
        attn = e2 * pl.reciprocal(jnp.sum(e2, axis=-1, keepdims=True),
                                  approx=True)
        if zero_pad:
            attn = attn * zp3                            # zero first row

        contrib = jnp.einsum('hij,hje->hie', attn, vout3,
                             preferred_element_type=f32)          # (H,S,D)
        return jnp.sum(contrib, axis=0) + _lw(lw_ref, layer, "out_b")

    def transformer_layer(layer, q_in, v_in, maskf, biasf, zero_pad, apply_pos):
        att = attention_block(layer, q_in, v_in, maskf, biasf, zero_pad)
        h1 = _layernorm(q_in + att, _lw(lw_ref, layer, "ln1_g"),
                        _lw(lw_ref, layer, "ln1_b"))
        if not apply_pos:
            return h1
        ff = jnp.maximum(
            jnp.dot(h1, _lw(lw_ref, layer, "l1_w"),
                    preferred_element_type=f32) + _lw(lw_ref, layer, "l1_b"),
            0.0)
        ff2 = (jnp.dot(ff, _lw(lw_ref, layer, "l2_w"),
                       preferred_element_type=f32) + _lw(lw_ref, layer, "l2_b"))
        return _layernorm(h1 + ff2, _lw(lw_ref, layer, "ln2_g"),
                          _lw(lw_ref, layer, "ln2_b"))

    # --- AKT architecture (layers unrolled in Python, all resident in VMEM) --
    y = y0
    for i in range(N_BLOCKS):                               # blocks_1
        y = transformer_layer(i, y, y, mask_cur, bias_cur, False, True)
    x = x0
    li = N_BLOCKS
    flag_first = True
    for _ in range(2 * N_BLOCKS):                           # blocks_2
        if flag_first:
            x = transformer_layer(li, x, x, mask_cur, bias_cur, False, False)
            flag_first = False
        else:
            x = transformer_layer(li, x, y, mask_past, bias_past, True, True)
            flag_first = True
        li += 1

    # --- fused output head: concat([x, q_embed]) @ W1 as a split matmul ------
    w1 = _hw(hw_ref, "w1")
    h = (jnp.dot(x, w1[:D, :], preferred_element_type=f32)
         + jnp.dot(x0, w1[D:, :], preferred_element_type=f32)
         + _hw(hw_ref, "b1"))
    h = jnp.maximum(h, 0.0)
    h = jnp.dot(h, _hw(hw_ref, "w2"), preferred_element_type=f32) + _hw(hw_ref, "b2")
    h = jnp.maximum(h, 0.0)
    # final 256 -> 1 projection as a lane reduction (no width-1 MXU pass)
    logits = (jnp.sum(h * _hw(hw_ref, "w3"), axis=-1, keepdims=True)
              + _hw(hw_ref, "b3"))                         # (S, 1)

    preds_ref[0] = jax.nn.sigmoid(logits)

    # --- masked BCE-with-logits partial sum for this batch element -----------
    labels = tgt_ref[0]                                    # (S, 1)
    valid = (labels > -0.9).astype(f32)
    bce = (jnp.maximum(logits, 0.0) - logits * labels
           + jnp.log(1.0 + jnp.exp(-jnp.abs(logits))))
    bce_ref[0] = jnp.sum(bce * valid, axis=0, keepdims=True)   # (1, 1)


def akt_pallas_forward(packed, q_embed_data, qa_embed_data, target):
    """One fused pallas_call for the whole AKT stack + output head + BCE."""
    B, S, D = q_embed_data.shape
    kernel = functools.partial(_akt_fused_kernel, S=S, D=D, H=N_HEADS, d_k=D_K,
                               scale=1.0 / math.sqrt(D_K))

    def per_b(shape):
        return pl.BlockSpec(shape, lambda b: (b, 0, 0))

    def full2(shape):
        return pl.BlockSpec(shape, lambda b: (0, 0))

    preds, bce_parts = pl.pallas_call(
        kernel,
        grid=(B,),
        in_specs=[per_b((1, S, D)),                               # q_embed
                  per_b((1, S, D)),                               # qa_embed
                  per_b((1, S, 1)),                               # targets
                  full2((N_LAYERS * LAYER_ROWS, LAYER_WIDTH)),    # layer slab
                  full2((HEAD_ROWS, HEAD_WIDTH))],                # head slab
        out_specs=[per_b((1, S, 1)),                              # sigmoid preds
                   per_b((1, 1, 1))],                             # per-batch BCE sum
        out_shape=[jax.ShapeDtypeStruct((B, S, 1), jnp.float32),
                   jax.ShapeDtypeStruct((B, 1, 1), jnp.float32)],
        compiler_params=pltpu.CompilerParams(
            dimension_semantics=("parallel",)),
    )(q_embed_data.astype(jnp.float32),
      qa_embed_data.astype(jnp.float32),
      target.reshape(B, S, 1).astype(jnp.float32),
      packed["lslab"], packed["hslab"])
    return preds, bce_parts


# -----------------------------------------------------------------------------
# Host-side one-time weight packing (per-head splits + out_proj fold + slabs)
# -----------------------------------------------------------------------------
def _pack_slab(vals, layout, total_rows, width):
    slab = jnp.zeros((total_rows, width), jnp.float32)
    for name, (off, r, c) in layout.items():
        slab = slab.at[off:off + r, :c].set(
            jnp.asarray(vals[name], jnp.float32).reshape(r, c))
    return slab


def _layer_slab_vals(lp):
    mha = lp["mha"]
    kw, kb = mha["k_w"], mha["k_b"]
    vw, vb = mha["v_w"], mha["v_b"]
    ow, ob = mha["out_w"], mha["out_b"]
    dk = D_K
    kqw = jnp.concatenate([kw[:, h * dk:(h + 1) * dk] for h in range(N_HEADS)],
                          axis=0)                                  # (H*D, d_k)
    kqb = kb.reshape(N_HEADS, dk)
    vwo = jnp.concatenate(
        [vw[:, h * dk:(h + 1) * dk] @ ow[h * dk:(h + 1) * dk, :]
         for h in range(N_HEADS)], axis=0)                         # (H*D, D)
    vbo = jnp.stack(
        [vb[h * dk:(h + 1) * dk] @ ow[h * dk:(h + 1) * dk, :]
         for h in range(N_HEADS)], axis=0)                         # (H, D)
    gneg = (-jax.nn.softplus(mha["gammas"])).reshape(N_HEADS, 1)
    return {"kqw": kqw, "kqb": kqb, "vwo": vwo, "vbo": vbo, "gneg": gneg,
            "out_b": ob, "ln1_g": lp["ln1_g"], "ln1_b": lp["ln1_b"],
            "l1_w": lp["l1_w"], "l1_b": lp["l1_b"],
            "l2_w": lp["l2_w"], "l2_b": lp["l2_b"],
            "ln2_g": lp["ln2_g"], "ln2_b": lp["ln2_b"]}


def pack_model_params(params):
    layer_list = params["blocks_1"] + params["blocks_2"]
    slabs = [_pack_slab(_layer_slab_vals(lp), LAYER_LAYOUT, LAYER_ROWS, LAYER_WIDTH)
             for lp in layer_list]
    lslab = jnp.concatenate(slabs, axis=0)
    head_vals = {"w1": params["out1_w"], "b1": params["out1_b"],
                 "w2": params["out2_w"], "b2": params["out2_b"],
                 "w3": params["out3_w"].reshape(1, 256), "b3": params["out3_b"]}
    hslab = _pack_slab(head_vals, HEAD_LAYOUT, HEAD_ROWS, HEAD_WIDTH)
    return {"q_embed": params["q_embed"], "qa_embed": params["qa_embed"],
            "q_embed_diff": params["q_embed_diff"],
            "qa_embed_diff": params["qa_embed_diff"],
            "difficult_param": params["difficult_param"],
            "lslab": lslab, "hslab": hslab}


# -----------------------------------------------------------------------------
# Model glue (embedding gathers and final reductions in plain JAX)
# -----------------------------------------------------------------------------
def aktnet_forward(packed, q_data, qa_data, target, pid_data):
    # Embedding gathers / elementwise combine kept in plain JAX (tiny).
    q_embed_data = packed["q_embed"][q_data]                       # (B,S,D)
    qa_idx = (qa_data - q_data) // N_QUESTION                      # in {0,1}
    qa_embed_data = packed["qa_embed"][qa_idx] + q_embed_data      # separate_qa=False

    # n_pid > 0 branch (difficult_param is constant_ 0 after reset())
    q_embed_diff = packed["q_embed_diff"][q_data]
    pid_embed = packed["difficult_param"][pid_data]                # (B,S,1)
    q_embed_data = q_embed_data + pid_embed * q_embed_diff
    qa_embed_diff = packed["qa_embed_diff"][qa_idx]
    qa_embed_data = qa_embed_data + pid_embed * (qa_embed_diff + q_embed_diff)
    c_reg_loss = jnp.sum(pid_embed ** 2.0) * L2

    preds, bce_parts = akt_pallas_forward(packed, q_embed_data,
                                          qa_embed_data, target)

    loss_sum = jnp.sum(bce_parts) + c_reg_loss
    labels = target.reshape(-1)
    n_valid = jnp.sum(labels > -0.9)
    return loss_sum, preds.reshape(-1), n_valid


# -----------------------------------------------------------------------------
# Deterministic parameter init
# -----------------------------------------------------------------------------
def init_linear_params(key, fan_in, fan_out):
    k1, k2 = jax.random.split(key)
    bound = 1.0 / math.sqrt(fan_in)
    w = jax.random.uniform(k1, (fan_in, fan_out), jnp.float32, -bound, bound)
    b = jax.random.uniform(k2, (fan_out,), jnp.float32, -bound, bound)
    return w, b


def init_mha_params(key, d_model, n_heads, kq_same):
    keys = jax.random.split(key, 5)
    p = {}
    p["k_w"], p["k_b"] = init_linear_params(keys[0], d_model, d_model)
    p["v_w"], p["v_b"] = init_linear_params(keys[1], d_model, d_model)
    if not kq_same:
        p["q_w"], p["q_b"] = init_linear_params(keys[2], d_model, d_model)
    p["out_w"], p["out_b"] = init_linear_params(keys[3], d_model, d_model)
    p["gammas"] = 0.1 * jax.random.normal(keys[4], (n_heads,), jnp.float32)
    return p


def init_layer_params(key, d_model, d_ff, n_heads, kq_same):
    keys = jax.random.split(key, 3)
    p = {"mha": init_mha_params(keys[0], d_model, n_heads, kq_same)}
    p["ln1_g"] = jnp.ones((d_model,), jnp.float32)
    p["ln1_b"] = jnp.zeros((d_model,), jnp.float32)
    p["l1_w"], p["l1_b"] = init_linear_params(keys[1], d_model, d_ff)
    p["l2_w"], p["l2_b"] = init_linear_params(keys[2], d_ff, d_model)
    p["ln2_g"] = jnp.ones((d_model,), jnp.float32)
    p["ln2_b"] = jnp.zeros((d_model,), jnp.float32)
    return p


def init_params(key):
    keys = jax.random.split(key, 16)
    p = {}
    p["q_embed"] = 0.1 * jax.random.normal(keys[0], (N_QUESTION + 1, D_MODEL), jnp.float32)
    p["qa_embed"] = 0.1 * jax.random.normal(keys[1], (2, D_MODEL), jnp.float32)
    p["q_embed_diff"] = 0.1 * jax.random.normal(keys[2], (N_QUESTION + 1, D_MODEL), jnp.float32)
    p["qa_embed_diff"] = 0.1 * jax.random.normal(keys[3], (2 * N_QUESTION + 1, D_MODEL), jnp.float32)
    p["difficult_param"] = jnp.zeros((N_PID + 1, 1), jnp.float32)   # reset(): constant_(0.0)
    p["blocks_1"] = [init_layer_params(keys[4 + i], D_MODEL, D_FF, N_HEADS, KQ_SAME)
                     for i in range(N_BLOCKS)]
    p["blocks_2"] = [init_layer_params(keys[4 + N_BLOCKS + i], D_MODEL, D_FF, N_HEADS, KQ_SAME)
                     for i in range(2 * N_BLOCKS)]
    p["out1_w"], p["out1_b"] = init_linear_params(keys[10], 2 * D_MODEL, FINAL_FC_DIM)
    p["out2_w"], p["out2_b"] = init_linear_params(keys[11], FINAL_FC_DIM, 256)
    p["out3_w"], p["out3_b"] = init_linear_params(keys[12], 256, 1)
    return p


# -----------------------------------------------------------------------------
if __name__ == "__main__":
    root = jax.random.PRNGKey(0)
    k_param, k_q, k_a, k_pid, k_mask = jax.random.split(root, 5)

    raw_params = init_params(k_param)
    packed = pack_model_params(raw_params)      # one-time host-side packing

    q_data = jax.random.randint(k_q, (BATCH, SEQLEN), 1, N_QUESTION + 1, jnp.int32)
    answers = jax.random.randint(k_a, (BATCH, SEQLEN), 0, 2, jnp.int32)
    qa_data = q_data + answers * N_QUESTION
    pid_data = jax.random.randint(k_pid, (BATCH, SEQLEN), 1, N_PID + 1, jnp.int32)
    # a few padded targets (-1) to exercise the valid mask
    drop = jax.random.bernoulli(k_mask, 0.2, (BATCH, SEQLEN))
    target = jnp.where(drop, -1.0, answers.astype(jnp.float32))

    # TODO(synk): dropout layers are treated as identity (eval-mode semantics).
    fwd = jax.jit(aktnet_forward)
    loss, preds, n_valid = fwd(packed, q_data, qa_data, target, pid_data)
    jax.block_until_ready((loss, preds, n_valid))

    print("KERNEL_OK")
</pallas_src>

<mosaic_0001>
module attributes {stable_mosaic.version = 11 : i64} {
  func.func @_akt_fused_kernel(%arg0: i32, %arg1: memref<1x8x32xf32, #tpu.memory_space<vmem>>, %arg2: memref<1x8x32xf32, #tpu.memory_space<vmem>>, %arg3: memref<1x8x1xf32, #tpu.memory_space<vmem>>, %arg4: memref<1296x64xf32, #tpu.memory_space<vmem>>, %arg5: memref<160x256xf32, #tpu.memory_space<vmem>>, %arg6: memref<1x8x1xf32, #tpu.memory_space<vmem>>, %arg7: memref<1x1x1xf32, #tpu.memory_space<vmem>>) attributes {dimension_semantics = [#tpu.dimension_semantics<parallel>], iteration_bounds = array<i64: 2>, scalar_prefetch = 0 : i64, scratch_operands = 0 : i64, tpu.core_type = #tpu.core_type<tc>, window_params = [{transform_indices = @transform_0, window_bounds = array<i64: 1, 8, 32>}, {transform_indices = @transform_1, window_bounds = array<i64: 1, 8, 32>}, {transform_indices = @transform_2, window_bounds = array<i64: 1, 8, 1>}, {pipeline_mode = #tpu.pipeline_mode<synchronous>, transform_indices = @transform_3, window_bounds = array<i64: 1296, 64>}, {pipeline_mode = #tpu.pipeline_mode<synchronous>, transform_indices = @transform_4, window_bounds = array<i64: 160, 256>}, {transform_indices = @transform_5, window_bounds = array<i64: 1, 8, 1>}, {transform_indices = @transform_6, window_bounds = array<i64: 1, 1, 1>}]} {
    %c0 = arith.constant 0 : index
    %c0_0 = arith.constant 0 : index
    %c0_1 = arith.constant 0 : index
    %0 = vector.load %arg1[%c0, %c0_0, %c0_1] : memref<1x8x32xf32, #tpu.memory_space<vmem>>, vector<1x8x32xf32>
    %1 = vector.shape_cast %0 : vector<1x8x32xf32> to vector<8x32xf32>
    %c0_2 = arith.constant 0 : index
    %c0_3 = arith.constant 0 : index
    %c0_4 = arith.constant 0 : index
    %2 = vector.load %arg2[%c0_2, %c0_3, %c0_4] : memref<1x8x32xf32, #tpu.memory_space<vmem>>, vector<1x8x32xf32>
    %3 = vector.shape_cast %2 : vector<1x8x32xf32> to vector<8x32xf32>
    %4 = tpu.iota {dimensions = array<i32: 0>} : vector<8x8xi32>
    %5 = tpu.iota {dimensions = array<i32: 1>} : vector<8x8xi32>
    %6 = arith.subi %5, %4 : vector<8x8xi32>
    %7 = math.absi %6 : vector<8x8xi32>
    %8 = arith.sitofp %7 : vector<8x8xi32> to vector<8x8xf32>
    %9 = vector.shape_cast %8 : vector<8x8xf32> to vector<1x8x8xf32>
    %10 = arith.cmpi sgt, %4, %5 : vector<8x8xi32>
    %11 = arith.extui %10 : vector<8x8xi1> to vector<8x8xi32>
    %12 = arith.sitofp %11 : vector<8x8xi32> to vector<8x8xf32>
    %13 = vector.shape_cast %12 : vector<8x8xf32> to vector<1x8x8xf32>
    %14 = vector.shape_cast %13 : vector<1x8x8xf32> to vector<1x8x8xf32>
    %15 = vector.broadcast %14 : vector<1x8x8xf32> to vector<4x8x8xf32>
    %16 = arith.cmpi sle, %5, %4 : vector<8x8xi32>
    %17 = arith.extui %16 : vector<8x8xi1> to vector<8x8xi32>
    %18 = arith.sitofp %17 : vector<8x8xi32> to vector<8x8xf32>
    %19 = arith.cmpi slt, %5, %4 : vector<8x8xi32>
    %20 = arith.extui %19 : vector<8x8xi1> to vector<8x8xi32>
    %21 = arith.sitofp %20 : vector<8x8xi32> to vector<8x8xf32>
    %cst = arith.constant 1.000000e+00 : f32
    %22 = vector.broadcast %cst : f32 to vector<8x8xf32>
    %23 = arith.subf %22, %18 : vector<8x8xf32>
    %cst_5 = arith.constant -1.000000e+32 : f32
    %24 = vector.broadcast %cst_5 : f32 to vector<8x8xf32>
    %25 = arith.mulf %23, %24 : vector<8x8xf32>
    %cst_6 = arith.constant 1.000000e+00 : f32
    %26 = vector.broadcast %cst_6 : f32 to vector<8x8xf32>
    %27 = arith.subf %26, %21 : vector<8x8xf32>
    %cst_7 = arith.constant -1.000000e+32 : f32
    %28 = vector.broadcast %cst_7 : f32 to vector<8x8xf32>
    %29 = arith.mulf %27, %28 : vector<8x8xf32>
    %30 = tpu.iota {dimensions = array<i32: 1>} : vector<1x8x1xi32>
    %c0_i32 = arith.constant 0 : i32
    %31 = vector.broadcast %c0_i32 : i32 to vector<1x8x1xi32>
    %32 = arith.cmpi sgt, %30, %31 : vector<1x8x1xi32>
    %33 = arith.extui %32 : vector<1x8x1xi1> to vector<1x8x1xi32>
    %34 = arith.sitofp %33 : vector<1x8x1xi32> to vector<1x8x1xf32>
    %c0_8 = arith.constant 0 : index
    %c0_9 = arith.constant 0 : index
    %35 = vector.load %arg4[%c0_8, %c0_9] : memref<1296x64xf32, #tpu.memory_space<vmem>>, vector<128x8xf32>
    %36 = vector.shape_cast %35 : vector<128x8xf32> to vector<4x32x8xf32>
    %c128 = arith.constant 128 : index
    %c0_10 = arith.constant 0 : index
    %37 = vector.load %arg4[%c128, %c0_10] : memref<1296x64xf32, #tpu.memory_space<vmem>>, vector<4x8xf32>
    %38 = vector.shape_cast %37 : vector<4x8xf32> to vector<4x1x8xf32>
    %c136 = arith.constant 136 : index
    %c0_11 = arith.constant 0 : index
    %39 = vector.load %arg4[%c136, %c0_11] : memref<1296x64xf32, #tpu.memory_space<vmem>>, vector<128x32xf32>
    %40 = vector.shape_cast %39 : vector<128x32xf32> to vector<4x32x32xf32>
    %c264 = arith.constant 264 : index
    %c0_12 = arith.constant 0 : index
    %41 = vector.load %arg4[%c264, %c0_12] : memref<1296x64xf32, #tpu.memory_space<vmem>>, vector<4x32xf32>
    %42 = vector.shape_cast %41 : vector<4x32xf32> to vector<4x1x32xf32>
    %c272 = arith.constant 272 : index
    %c0_13 = arith.constant 0 : index
    %43 = vector.load %arg4[%c272, %c0_13] : memref<1296x64xf32, #tpu.memory_space<vmem>>, vector<4x1xf32>
    %44 = vector.shape_cast %43 : vector<4x1xf32> to vector<4x1x1xf32>
    %45 = vector.shape_cast %3 : vector<8x32xf32> to vector<1x8x32xf32>
    %46 = vector.shape_cast %45 : vector<1x8x32xf32> to vector<1x8x32xf32>
    %47 = vector.broadcast %46 : vector<1x8x32xf32> to vector<4x8x32xf32>
    %48 = vector.shape_cast %3 : vector<8x32xf32> to vector<1x8x32xf32>
    %49 = vector.shape_cast %48 : vector<1x8x32xf32> to vector<1x8x32xf32>
    %50 = vector.broadcast %49 : vector<1x8x32xf32> to vector<4x8x32xf32>
    "tpu.trace_start"() <{level = 10 : i32, message = "hsd,hdk->hsk"}> : () -> ()
    %cst_14 = arith.constant dense<0.000000e+00> : vector<4x8x8xf32>
    %51 = tpu.matmul %47, %36, %cst_14 {dimension_numbers = #tpu.dot_dimension_numbers<[2], [1], [1], [2], [0, 0, 0, 1, 1, 2], [0], [0]>} : vector<4x8x32xf32>, vector<4x32x8xf32>, vector<4x8x8xf32> -> vector<4x8x8xf32>
    "tpu.trace_stop"() : () -> ()
    %52 = vector.broadcast %38 : vector<4x1x8xf32> to vector<4x8x8xf32>
    %53 = arith.addf %51, %52 : vector<4x8x8xf32>
    "tpu.trace_start"() <{level = 10 : i32, message = "hsd,hde->hse"}> : () -> ()
    %cst_15 = arith.constant dense<0.000000e+00> : vector<4x8x32xf32>
    %54 = tpu.matmul %50, %40, %cst_15 {dimension_numbers = #tpu.dot_dimension_numbers<[2], [1], [1], [2], [0, 0, 0, 1, 1, 2], [0], [0]>} : vector<4x8x32xf32>, vector<4x32x32xf32>, vector<4x8x32xf32> -> vector<4x8x32xf32>
    "tpu.trace_stop"() : () -> ()
    %55 = vector.broadcast %42 : vector<4x1x32xf32> to vector<4x8x32xf32>
    %56 = arith.addf %54, %55 : vector<4x8x32xf32>
    "tpu.trace_start"() <{level = 10 : i32, message = "hid,hjd->hij"}> : () -> ()
    %cst_16 = arith.constant dense<0.000000e+00> : vector<4x8x8xf32>
    %57 = tpu.matmul %53, %53, %cst_16 {dimension_numbers = #tpu.dot_dimension_numbers<[2], [2], [1], [1], [0, 0, 0, 1, 1, 1], [0], [0]>} : vector<4x8x8xf32>, vector<4x8x8xf32>, vector<4x8x8xf32> -> vector<4x8x8xf32>
    "tpu.trace_stop"() : () -> ()
    %cst_17 = arith.constant 0.353553385 : f32
    %58 = vector.broadcast %cst_17 : f32 to vector<4x8x8xf32>
    %59 = arith.mulf %57, %58 : vector<4x8x8xf32>
    %60 = vector.shape_cast %25 : vector<8x8xf32> to vector<1x8x8xf32>
    %61 = vector.broadcast %60 : vector<1x8x8xf32> to vector<4x8x8xf32>
    %62 = arith.addf %59, %61 : vector<4x8x8xf32>
    %cst_18 = arith.constant dense<0xFF800000> : vector<4x8xf32>
    %63 = vector.multi_reduction <maximumf>, %62, %cst_18 [2] : vector<4x8x8xf32> to vector<4x8xf32>
    %64 = vector.shape_cast %63 : vector<4x8xf32> to vector<4x8x1xf32>
    %65 = vector.broadcast %64 : vector<4x8x1xf32> to vector<4x8x8xf32>
    %66 = arith.subf %62, %65 : vector<4x8x8xf32>
    %67 = math.exp %66 : vector<4x8x8xf32>
    %cst_19 = arith.constant dense<0.000000e+00> : vector<4x8xf32>
    %68 = vector.multi_reduction <add>, %67, %cst_19 [2] : vector<4x8x8xf32> to vector<4x8xf32>
    %69 = vector.shape_cast %68 : vector<4x8xf32> to vector<4x8x1xf32>
    %70 = tpu.reciprocal %69 {approx = true} : vector<4x8x1xf32> -> vector<4x8x1xf32>
    %71 = vector.broadcast %70 : vector<4x8x1xf32> to vector<4x8x8xf32>
    %72 = arith.mulf %67, %71 : vector<4x8x8xf32>
    %73 = vector.shape_cast %18 : vector<8x8xf32> to vector<1x8x8xf32>
    %74 = vector.broadcast %73 : vector<1x8x8xf32> to vector<4x8x8xf32>
    %75 = arith.mulf %72, %74 : vector<4x8x8xf32>
    "tpu.trace_start"() <{level = 10 : i32, message = "hij,hjk->hik"}> : () -> ()
    %cst_20 = arith.constant dense<0.000000e+00> : vector<4x8x8xf32>
    %76 = tpu.matmul %75, %15, %cst_20 {dimension_numbers = #tpu.dot_dimension_numbers<[2], [1], [1], [2], [0, 0, 0, 1, 1, 2], [0], [0]>} : vector<4x8x8xf32>, vector<4x8x8xf32>, vector<4x8x8xf32> -> vector<4x8x8xf32>
    "tpu.trace_stop"() : () -> ()
    %77 = vector.broadcast %9 : vector<1x8x8xf32> to vector<4x8x8xf32>
    %78 = arith.mulf %76, %77 : vector<4x8x8xf32>
    %cst_21 = arith.constant 0.000000e+00 : f32
    %79 = vector.broadcast %cst_21 : f32 to vector<4x8x8xf32>
    %80 = arith.maximumf %78, %79 : vector<4x8x8xf32>
    %81 = math.sqrt %80 : vector<4x8x8xf32>
    %82 = vector.broadcast %44 : vector<4x1x1xf32> to vector<4x8x8xf32>
    %83 = arith.mulf %81, %82 : vector<4x8x8xf32>
    %84 = math.exp %83 : vector<4x8x8xf32>
    %cst_22 = arith.constant 9.99999974E-6 : f32
    %cst_23 = arith.constant 1.000000e+05 : f32
    %85 = vector.broadcast %cst_22 : f32 to vector<4x8x8xf32>
    %86 = arith.maximumf %85, %84 : vector<4x8x8xf32>
    %87 = vector.broadcast %cst_23 : f32 to vector<4x8x8xf32>
    %88 = arith.minimumf %87, %86 : vector<4x8x8xf32>
    %89 = arith.mulf %59, %88 : vector<4x8x8xf32>
    %cst_24 = arith.constant dense<0xFF800000> : vector<4x8xf32>
    %90 = vector.multi_reduction <maximumf>, %89, %cst_24 [2] : vector<4x8x8xf32> to vector<4x8xf32>
    %91 = vector.shape_cast %90 : vector<4x8xf32> to vector<4x8x1xf32>
    %92 = vector.broadcast %91 : vector<4x8x1xf32> to vector<4x8x8xf32>
    %93 = arith.subf %89, %92 : vector<4x8x8xf32>
    %94 = math.exp %93 : vector<4x8x8xf32>
    %cst_25 = arith.constant dense<0.000000e+00> : vector<4x8xf32>
    %95 = vector.multi_reduction <add>, %94, %cst_25 [2] : vector<4x8x8xf32> to vector<4x8xf32>
    %96 = vector.shape_cast %95 : vector<4x8xf32> to vector<4x8x1xf32>
    %97 = tpu.reciprocal %96 {approx = true} : vector<4x8x1xf32> -> vector<4x8x1xf32>
    %98 = vector.broadcast %97 : vector<4x8x1xf32> to vector<4x8x8xf32>
    %99 = arith.mulf %94, %98 : vector<4x8x8xf32>
    "tpu.trace_start"() <{level = 10 : i32, message = "hij,hje->hie"}> : () -> ()
    %cst_26 = arith.constant dense<0.000000e+00> : vector<4x8x32xf32>
    %100 = tpu.matmul %99, %56, %cst_26 {dimension_numbers = #tpu.dot_dimension_numbers<[2], [1], [1], [2], [0, 0, 0, 1, 1, 2], [0], [0]>} : vector<4x8x8xf32>, vector<4x8x32xf32>, vector<4x8x32xf32> -> vector<4x8x32xf32>
    "tpu.trace_stop"() : () -> ()
    %cst_27 = arith.constant dense<0.000000e+00> : vector<8x32xf32>
    %101 = vector.multi_reduction <add>, %100, %cst_27 [0] : vector<4x8x32xf32> to vector<8x32xf32>
    %c280 = arith.constant 280 : index
    %c0_28 = arith.constant 0 : index
    %102 = vector.load %arg4[%c280, %c0_28] : memref<1296x64xf32, #tpu.memory_space<vmem>>, vector<1x32xf32>
    %103 = vector.broadcast %102 : vector<1x32xf32> to vector<8x32xf32>
    %104 = arith.addf %101, %103 : vector<8x32xf32>
    %105 = arith.addf %3, %104 : vector<8x32xf32>
    %c288 = arith.constant 288 : index
    %c0_29 = arith.constant 0 : index
    %106 = vector.load %arg4[%c288, %c0_29] : memref<1296x64xf32, #tpu.memory_space<vmem>>, vector<1x32xf32>
    %c296 = arith.constant 296 : index
    %c0_30 = arith.constant 0 : index
    %107 = vector.load %arg4[%c296, %c0_30] : memref<1296x64xf32, #tpu.memory_space<vmem>>, vector<1x32xf32>
    %cst_31 = arith.constant dense<0.000000e+00> : vector<8xf32>
    %108 = vector.multi_reduction <add>, %105, %cst_31 [1] : vector<8x32xf32> to vector<8xf32>
    %109 = vector.shape_cast %108 : vector<8xf32> to vector<8x1xf32>
    %cst_32 = arith.constant 3.200000e+01 : f32
    %110 = vector.broadcast %cst_32 : f32 to vector<8x1xf32>
    %111 = arith.divf %109, %110 : vector<8x1xf32>
    %112 = vector.broadcast %111 : vector<8x1xf32> to vector<8x32xf32>
    %113 = arith.subf %105, %112 : vector<8x32xf32>
    %114 = arith.mulf %113, %113 : vector<8x32xf32>
    %cst_33 = arith.constant dense<0.000000e+00> : vector<8xf32>
    %115 = vector.multi_reduction <add>, %114, %cst_33 [1] : vector<8x32xf32> to vector<8xf32>
    %116 = vector.shape_cast %115 : vector<8xf32> to vector<8x1xf32>
    %cst_34 = arith.constant 3.200000e+01 : f32
    %117 = vector.broadcast %cst_34 : f32 to vector<8x1xf32>
    %118 = arith.divf %116, %117 : vector<8x1xf32>
    %119 = vector.broadcast %111 : vector<8x1xf32> to vector<8x32xf32>
    %120 = arith.subf %105, %119 : vector<8x32xf32>
    %cst_35 = arith.constant 9.99999974E-6 : f32
    %121 = vector.broadcast %cst_35 : f32 to vector<8x1xf32>
    %122 = arith.addf %118, %121 : vector<8x1xf32>
    %123 = math.rsqrt %122 : vector<8x1xf32>
    %124 = vector.broadcast %123 : vector<8x1xf32> to vector<8x32xf32>
    %125 = arith.mulf %120, %124 : vector<8x32xf32>
    %126 = vector.broadcast %106 : vector<1x32xf32> to vector<8x32xf32>
    %127 = arith.mulf %125, %126 : vector<8x32xf32>
    %128 = vector.broadcast %107 : vector<1x32xf32> to vector<8x32xf32>
    %129 = arith.addf %127, %128 : vector<8x32xf32>
    %c304 = arith.constant 304 : index
    %c0_36 = arith.constant 0 : index
    %130 = vector.load %arg4[%c304, %c0_36] : memref<1296x64xf32, #tpu.memory_space<vmem>>, vector<32x64xf32>
    %cst_37 = arith.constant dense<0.000000e+00> : vector<8x64xf32>
    %131 = tpu.matmul %129, %130, %cst_37 {dimension_numbers = #tpu.dot_dimension_numbers<[1], [0], [0], [1], [0, 0, 1, 1], [], []>} : vector<8x32xf32>, vector<32x64xf32>, vector<8x64xf32> -> vector<8x64xf32>
    %c336 = arith.constant 336 : index
    %c0_38 = arith.constant 0 : index
    %132 = vector.load %arg4[%c336, %c0_38] : memref<1296x64xf32, #tpu.memory_space<vmem>>, vector<1x64xf32>
    %133 = vector.broadcast %132 : vector<1x64xf32> to vector<8x64xf32>
    %134 = arith.addf %131, %133 : vector<8x64xf32>
    %cst_39 = arith.constant 0.000000e+00 : f32
    %135 = vector.broadcast %cst_39 : f32 to vector<8x64xf32>
    %136 = arith.maximumf %134, %135 : vector<8x64xf32>
    %c344 = arith.constant 344 : index
    %c0_40 = arith.constant 0 : index
    %137 = vector.load %arg4[%c344, %c0_40] : memref<1296x64xf32, #tpu.memory_space<vmem>>, vector<64x32xf32>
    %cst_41 = arith.constant dense<0.000000e+00> : vector<8x32xf32>
    %138 = tpu.matmul %136, %137, %cst_41 {dimension_numbers = #tpu.dot_dimension_numbers<[1], [0], [0], [1], [0, 0, 1, 1], [], []>} : vector<8x64xf32>, vector<64x32xf32>, vector<8x32xf32> -> vector<8x32xf32>
    %c408 = arith.constant 408 : index
    %c0_42 = arith.constant 0 : index
    %139 = vector.load %arg4[%c408, %c0_42] : memref<1296x64xf32, #tpu.memory_space<vmem>>, vector<1x32xf32>
    %140 = vector.broadcast %139 : vector<1x32xf32> to vector<8x32xf32>
    %141 = arith.addf %138, %140 : vector<8x32xf32>
    %142 = arith.addf %129, %141 : vector<8x32xf32>
    %c416 = arith.constant 416 : index
    %c0_43 = arith.constant 0 : index
    %143 = vector.load %arg4[%c416, %c0_43] : memref<1296x64xf32, #tpu.memory_space<vmem>>, vector<1x32xf32>
    %c424 = arith.constant 424 : index
    %c0_44 = arith.constant 0 : index
    %144 = vector.load %arg4[%c424, %c0_44] : memref<1296x64xf32, #tpu.memory_space<vmem>>, vector<1x32xf32>
    %cst_45 = arith.constant dense<0.000000e+00> : vector<8xf32>
    %145 = vector.multi_reduction <add>, %142, %cst_45 [1] : vector<8x32xf32> to vector<8xf32>
    %146 = vector.shape_cast %145 : vector<8xf32> to vector<8x1xf32>
    %cst_46 = arith.constant 3.200000e+01 : f32
    %147 = vector.broadcast %cst_46 : f32 to vector<8x1xf32>
    %148 = arith.divf %146, %147 : vector<8x1xf32>
    %149 = vector.broadcast %148 : vector<8x1xf32> to vector<8x32xf32>
    %150 = arith.subf %142, %149 : vector<8x32xf32>
    %151 = arith.mulf %150, %150 : vector<8x32xf32>
    %cst_47 = arith.constant dense<0.000000e+00> : vector<8xf32>
    %152 = vector.multi_reduction <add>, %151, %cst_47 [1] : vector<8x32xf32> to vector<8xf32>
    %153 = vector.shape_cast %152 : vector<8xf32> to vector<8x1xf32>
    %cst_48 = arith.constant 3.200000e+01 : f32
    %154 = vector.broadcast %cst_48 : f32 to vector<8x1xf32>
    %155 = arith.divf %153, %154 : vector<8x1xf32>
    %156 = vector.broadcast %148 : vector<8x1xf32> to vector<8x32xf32>
    %157 = arith.subf %142, %156 : vector<8x32xf32>
    %cst_49 = arith.constant 9.99999974E-6 : f32
    %158 = vector.broadcast %cst_49 : f32 to vector<8x1xf32>
    %159 = arith.addf %155, %158 : vector<8x1xf32>
    %160 = math.rsqrt %159 : vector<8x1xf32>
    %161 = vector.broadcast %160 : vector<8x1xf32> to vector<8x32xf32>
    %162 = arith.mulf %157, %161 : vector<8x32xf32>
    %163 = vector.broadcast %143 : vector<1x32xf32> to vector<8x32xf32>
    %164 = arith.mulf %162, %163 : vector<8x32xf32>
    %165 = vector.broadcast %144 : vector<1x32xf32> to vector<8x32xf32>
    %166 = arith.addf %164, %165 : vector<8x32xf32>
    %c432 = arith.constant 432 : index
    %c0_50 = arith.constant 0 : index
    %167 = vector.load %arg4[%c432, %c0_50] : memref<1296x64xf32, #tpu.memory_space<vmem>>, vector<128x8xf32>
    %168 = vector.shape_cast %167 : vector<128x8xf32> to vector<4x32x8xf32>
    %c560 = arith.constant 560 : index
    %c0_51 = arith.constant 0 : index
    %169 = vector.load %arg4[%c560, %c0_51] : memref<1296x64xf32, #tpu.memory_space<vmem>>, vector<4x8xf32>
    %170 = vector.shape_cast %169 : vector<4x8xf32> to vector<4x1x8xf32>
    %c568 = arith.constant 568 : index
    %c0_52 = arith.constant 0 : index
    %171 = vector.load %arg4[%c568, %c0_52] : memref<1296x64xf32, #tpu.memory_space<vmem>>, vector<128x32xf32>
    %172 = vector.shape_cast %171 : vector<128x32xf32> to vector<4x32x32xf32>
    %c696 = arith.constant 696 : index
    %c0_53 = arith.constant 0 : index
    %173 = vector.load %arg4[%c696, %c0_53] : memref<1296x64xf32, #tpu.memory_space<vmem>>, vector<4x32xf32>
    %174 = vector.shape_cast %173 : vector<4x32xf32> to vector<4x1x32xf32>
    %c704 = arith.constant 704 : index
    %c0_54 = arith.constant 0 : index
    %175 = vector.load %arg4[%c704, %c0_54] : memref<1296x64xf32, #tpu.memory_space<vmem>>, vector<4x1xf32>
    %176 = vector.shape_cast %175 : vector<4x1xf32> to vector<4x1x1xf32>
    %177 = vector.shape_cast %1 : vector<8x32xf32> to vector<1x8x32xf32>
    %178 = vector.shape_cast %177 : vector<1x8x32xf32> to vector<1x8x32xf32>
    %179 = vector.broadcast %178 : vector<1x8x32xf32> to vector<4x8x32xf32>
    %180 = vector.shape_cast %1 : vector<8x32xf32> to vector<1x8x32xf32>
    %181 = vector.shape_cast %180 : vector<1x8x32xf32> to vector<1x8x32xf32>
    %182 = vector.broadcast %181 : vector<1x8x32xf32> to vector<4x8x32xf32>
    "tpu.trace_start"() <{level = 10 : i32, message = "hsd,hdk->hsk"}> : () -> ()
    %cst_55 = arith.constant dense<0.000000e+00> : vector<4x8x8xf32>
    %183 = tpu.matmul %179, %168, %cst_55 {dimension_numbers = #tpu.dot_dimension_numbers<[2], [1], [1], [2], [0, 0, 0, 1, 1, 2], [0], [0]>} : vector<4x8x32xf32>, vector<4x32x8xf32>, vector<4x8x8xf32> -> vector<4x8x8xf32>
    "tpu.trace_stop"() : () -> ()
    %184 = vector.broadcast %170 : vector<4x1x8xf32> to vector<4x8x8xf32>
    %185 = arith.addf %183, %184 : vector<4x8x8xf32>
    "tpu.trace_start"() <{level = 10 : i32, message = "hsd,hde->hse"}> : () -> ()
    %cst_56 = arith.constant dense<0.000000e+00> : vector<4x8x32xf32>
    %186 = tpu.matmul %182, %172, %cst_56 {dimension_numbers = #tpu.dot_dimension_numbers<[2], [1], [1], [2], [0, 0, 0, 1, 1, 2], [0], [0]>} : vector<4x8x32xf32>, vector<4x32x32xf32>, vector<4x8x32xf32> -> vector<4x8x32xf32>
    "tpu.trace_stop"() : () -> ()
    %187 = vector.broadcast %174 : vector<4x1x32xf32> to vector<4x8x32xf32>
    %188 = arith.addf %186, %187 : vector<4x8x32xf32>
    "tpu.trace_start"() <{level = 10 : i32, message = "hid,hjd->hij"}> : () -> ()
    %cst_57 = arith.constant dense<0.000000e+00> : vector<4x8x8xf32>
    %189 = tpu.matmul %185, %185, %cst_57 {dimension_numbers = #tpu.dot_dimension_numbers<[2], [2], [1], [1], [0, 0, 0, 1, 1, 1], [0], [0]>} : vector<4x8x8xf32>, vector<4x8x8xf32>, vector<4x8x8xf32> -> vector<4x8x8xf32>
    "tpu.trace_stop"() : () -> ()
    %cst_58 = arith.constant 0.353553385 : f32
    %190 = vector.broadcast %cst_58 : f32 to vector<4x8x8xf32>
    %191 = arith.mulf %189, %190 : vector<4x8x8xf32>
    %192 = vector.shape_cast %25 : vector<8x8xf32> to vector<1x8x8xf32>
    %193 = vector.broadcast %192 : vector<1x8x8xf32> to vector<4x8x8xf32>
    %194 = arith.addf %191, %193 : vector<4x8x8xf32>
    %cst_59 = arith.constant dense<0xFF800000> : vector<4x8xf32>
    %195 = vector.multi_reduction <maximumf>, %194, %cst_59 [2] : vector<4x8x8xf32> to vector<4x8xf32>
    %196 = vector.shape_cast %195 : vector<4x8xf32> to vector<4x8x1xf32>
    %197 = vector.broadcast %196 : vector<4x8x1xf32> to vector<4x8x8xf32>
    %198 = arith.subf %194, %197 : vector<4x8x8xf32>
    %199 = math.exp %198 : vector<4x8x8xf32>
    %cst_60 = arith.constant dense<0.000000e+00> : vector<4x8xf32>
    %200 = vector.multi_reduction <add>, %199, %cst_60 [2] : vector<4x8x8xf32> to vector<4x8xf32>
    %201 = vector.shape_cast %200 : vector<4x8xf32> to vector<4x8x1xf32>
    %202 = tpu.reciprocal %201 {approx = true} : vector<4x8x1xf32> -> vector<4x8x1xf32>
    %203 = vector.broadcast %202 : vector<4x8x1xf32> to vector<4x8x8xf32>
    %204 = arith.mulf %199, %203 : vector<4x8x8xf32>
    %205 = vector.shape_cast %18 : vector<8x8xf32> to vector<1x8x8xf32>
    %206 = vector.broadcast %205 : vector<1x8x8xf32> to vector<4x8x8xf32>
    %207 = arith.mulf %204, %206 : vector<4x8x8xf32>
    "tpu.trace_start"() <{level = 10 : i32, message = "hij,hjk->hik"}> : () -> ()
    %cst_61 = arith.constant dense<0.000000e+00> : vector<4x8x8xf32>
    %208 = tpu.matmul %207, %15, %cst_61 {dimension_numbers = #tpu.dot_dimension_numbers<[2], [1], [1], [2], [0, 0, 0, 1, 1, 2], [0], [0]>} : vector<4x8x8xf32>, vector<4x8x8xf32>, vector<4x8x8xf32> -> vector<4x8x8xf32>
    "tpu.trace_stop"() : () -> ()
    %209 = vector.broadcast %9 : vector<1x8x8xf32> to vector<4x8x8xf32>
    %210 = arith.mulf %208, %209 : vector<4x8x8xf32>
    %cst_62 = arith.constant 0.000000e+00 : f32
    %211 = vector.broadcast %cst_62 : f32 to vector<4x8x8xf32>
    %212 = arith.maximumf %210, %211 : vector<4x8x8xf32>
    %213 = math.sqrt %212 : vector<4x8x8xf32>
    %214 = vector.broadcast %176 : vector<4x1x1xf32> to vector<4x8x8xf32>
    %215 = arith.mulf %213, %214 : vector<4x8x8xf32>
    %216 = math.exp %215 : vector<4x8x8xf32>
    %cst_63 = arith.constant 9.99999974E-6 : f32
    %cst_64 = arith.constant 1.000000e+05 : f32
    %217 = vector.broadcast %cst_63 : f32 to vector<4x8x8xf32>
    %218 = arith.maximumf %217, %216 : vector<4x8x8xf32>
    %219 = vector.broadcast %cst_64 : f32 to vector<4x8x8xf32>
    %220 = arith.minimumf %219, %218 : vector<4x8x8xf32>
    %221 = arith.mulf %191, %220 : vector<4x8x8xf32>
    %cst_65 = arith.constant dense<0xFF800000> : vector<4x8xf32>
    %222 = vector.multi_reduction <maximumf>, %221, %cst_65 [2] : vector<4x8x8xf32> to vector<4x8xf32>
    %223 = vector.shape_cast %222 : vector<4x8xf32> to vector<4x8x1xf32>
    %224 = vector.broadcast %223 : vector<4x8x1xf32> to vector<4x8x8xf32>
    %225 = arith.subf %221, %224 : vector<4x8x8xf32>
    %226 = math.exp %225 : vector<4x8x8xf32>
    %cst_66 = arith.constant dense<0.000000e+00> : vector<4x8xf32>
    %227 = vector.multi_reduction <add>, %226, %cst_66 [2] : vector<4x8x8xf32> to vector<4x8xf32>
    %228 = vector.shape_cast %227 : vector<4x8xf32> to vector<4x8x1xf32>
    %229 = tpu.reciprocal %228 {approx = true} : vector<4x8x1xf32> -> vector<4x8x1xf32>
    %230 = vector.broadcast %229 : vector<4x8x1xf32> to vector<4x8x8xf32>
    %231 = arith.mulf %226, %230 : vector<4x8x8xf32>
    "tpu.trace_start"() <{level = 10 : i32, message = "hij,hje->hie"}> : () -> ()
    %cst_67 = arith.constant dense<0.000000e+00> : vector<4x8x32xf32>
    %232 = tpu.matmul %231, %188, %cst_67 {dimension_numbers = #tpu.dot_dimension_numbers<[2], [1], [1], [2], [0, 0, 0, 1, 1, 2], [0], [0]>} : vector<4x8x8xf32>, vector<4x8x32xf32>, vector<4x8x32xf32> -> vector<4x8x32xf32>
    "tpu.trace_stop"() : () -> ()
    %cst_68 = arith.constant dense<0.000000e+00> : vector<8x32xf32>
    %233 = vector.multi_reduction <add>, %232, %cst_68 [0] : vector<4x8x32xf32> to vector<8x32xf32>
    %c712 = arith.constant 712 : index
    %c0_69 = arith.constant 0 : index
    %234 = vector.load %arg4[%c712, %c0_69] : memref<1296x64xf32, #tpu.memory_space<vmem>>, vector<1x32xf32>
    %235 = vector.broadcast %234 : vector<1x32xf32> to vector<8x32xf32>
    %236 = arith.addf %233, %235 : vector<8x32xf32>
    %237 = arith.addf %1, %236 : vector<8x32xf32>
    %c720 = arith.constant 720 : index
    %c0_70 = arith.constant 0 : index
    %238 = vector.load %arg4[%c720, %c0_70] : memref<1296x64xf32, #tpu.memory_space<vmem>>, vector<1x32xf32>
    %c728 = arith.constant 728 : index
    %c0_71 = arith.constant 0 : index
    %239 = vector.load %arg4[%c728, %c0_71] : memref<1296x64xf32, #tpu.memory_space<vmem>>, vector<1x32xf32>
    %cst_72 = arith.constant dense<0.000000e+00> : vector<8xf32>
    %240 = vector.multi_reduction <add>, %237, %cst_72 [1] : vector<8x32xf32> to vector<8xf32>
    %241 = vector.shape_cast %240 : vector<8xf32> to vector<8x1xf32>
    %cst_73 = arith.constant 3.200000e+01 : f32
    %242 = vector.broadcast %cst_73 : f32 to vector<8x1xf32>
    %243 = arith.divf %241, %242 : vector<8x1xf32>
    %244 = vector.broadcast %243 : vector<8x1xf32> to vector<8x32xf32>
    %245 = arith.subf %237, %244 : vector<8x32xf32>
    %246 = arith.mulf %245, %245 : vector<8x32xf32>
    %cst_74 = arith.constant dense<0.000000e+00> : vector<8xf32>
    %247 = vector.multi_reduction <add>, %246, %cst_74 [1] : vector<8x32xf32> to vector<8xf32>
    %248 = vector.shape_cast %247 : vector<8xf32> to vector<8x1xf32>
    %cst_75 = arith.constant 3.200000e+01 : f32
    %249 = vector.broadcast %cst_75 : f32 to vector<8x1xf32>
    %250 = arith.divf %248, %249 : vector<8x1xf32>
    %251 = vector.broadcast %243 : vector<8x1xf32> to vector<8x32xf32>
    %252 = arith.subf %237, %251 : vector<8x32xf32>
    %cst_76 = arith.constant 9.99999974E-6 : f32
    %253 = vector.broadcast %cst_76 : f32 to vector<8x1xf32>
    %254 = arith.addf %250, %253 : vector<8x1xf32>
    %255 = math.rsqrt %254 : vector<8x1xf32>
    %256 = vector.broadcast %255 : vector<8x1xf32> to vector<8x32xf32>
    %257 = arith.mulf %252, %256 : vector<8x32xf32>
    %258 = vector.broadcast %238 : vector<1x32xf32> to vector<8x32xf32>
    %259 = arith.mulf %257, %258 : vector<8x32xf32>
    %260 = vector.broadcast %239 : vector<1x32xf32> to vector<8x32xf32>
    %261 = arith.addf %259, %260 : vector<8x32xf32>
    %c864 = arith.constant 864 : index
    %c0_77 = arith.constant 0 : index
    %262 = vector.load %arg4[%c864, %c0_77] : memref<1296x64xf32, #tpu.memory_space<vmem>>, vector<128x8xf32>
    %263 = vector.shape_cast %262 : vector<128x8xf32> to vector<4x32x8xf32>
    %c992 = arith.constant 992 : index
    %c0_78 = arith.constant 0 : index
    %264 = vector.load %arg4[%c992, %c0_78] : memref<1296x64xf32, #tpu.memory_space<vmem>>, vector<4x8xf32>
    %265 = vector.shape_cast %264 : vector<4x8xf32> to vector<4x1x8xf32>
    %c1000 = arith.constant 1000 : index
    %c0_79 = arith.constant 0 : index
    %266 = vector.load %arg4[%c1000, %c0_79] : memref<1296x64xf32, #tpu.memory_space<vmem>>, vector<128x32xf32>
    %267 = vector.shape_cast %266 : vector<128x32xf32> to vector<4x32x32xf32>
    %c1128 = arith.constant 1128 : index
    %c0_80 = arith.constant 0 : index
    %268 = vector.load %arg4[%c1128, %c0_80] : memref<1296x64xf32, #tpu.memory_space<vmem>>, vector<4x32xf32>
    %269 = vector.shape_cast %268 : vector<4x32xf32> to vector<4x1x32xf32>
    %c1136 = arith.constant 1136 : index
    %c0_81 = arith.constant 0 : index
    %270 = vector.load %arg4[%c1136, %c0_81] : memref<1296x64xf32, #tpu.memory_space<vmem>>, vector<4x1xf32>
    %271 = vector.shape_cast %270 : vector<4x1xf32> to vector<4x1x1xf32>
    %272 = vector.shape_cast %261 : vector<8x32xf32> to vector<1x8x32xf32>
    %273 = vector.shape_cast %272 : vector<1x8x32xf32> to vector<1x8x32xf32>
    %274 = vector.broadcast %273 : vector<1x8x32xf32> to vector<4x8x32xf32>
    %275 = vector.shape_cast %166 : vector<8x32xf32> to vector<1x8x32xf32>
    %276 = vector.shape_cast %275 : vector<1x8x32xf32> to vector<1x8x32xf32>
    %277 = vector.broadcast %276 : vector<1x8x32xf32> to vector<4x8x32xf32>
    "tpu.trace_start"() <{level = 10 : i32, message = "hsd,hdk->hsk"}> : () -> ()
    %cst_82 = arith.constant dense<0.000000e+00> : vector<4x8x8xf32>
    %278 = tpu.matmul %274, %263, %cst_82 {dimension_numbers = #tpu.dot_dimension_numbers<[2], [1], [1], [2], [0, 0, 0, 1, 1, 2], [0], [0]>} : vector<4x8x32xf32>, vector<4x32x8xf32>, vector<4x8x8xf32> -> vector<4x8x8xf32>
    "tpu.trace_stop"() : () -> ()
    %279 = vector.broadcast %265 : vector<4x1x8xf32> to vector<4x8x8xf32>
    %280 = arith.addf %278, %279 : vector<4x8x8xf32>
    "tpu.trace_start"() <{level = 10 : i32, message = "hsd,hde->hse"}> : () -> ()
    %cst_83 = arith.constant dense<0.000000e+00> : vector<4x8x32xf32>
    %281 = tpu.matmul %277, %267, %cst_83 {dimension_numbers = #tpu.dot_dimension_numbers<[2], [1], [1], [2], [0, 0, 0, 1, 1, 2], [0], [0]>} : vector<4x8x32xf32>, vector<4x32x32xf32>, vector<4x8x32xf32> -> vector<4x8x32xf32>
    "tpu.trace_stop"() : () -> ()
    %282 = vector.broadcast %269 : vector<4x1x32xf32> to vector<4x8x32xf32>
    %283 = arith.addf %281, %282 : vector<4x8x32xf32>
    "tpu.trace_start"() <{level = 10 : i32, message = "hid,hjd->hij"}> : () -> ()
    %cst_84 = arith.constant dense<0.000000e+00> : vector<4x8x8xf32>
    %284 = tpu.matmul %280, %280, %cst_84 {dimension_numbers = #tpu.dot_dimension_numbers<[2], [2], [1], [1], [0, 0, 0, 1, 1, 1], [0], [0]>} : vector<4x8x8xf32>, vector<4x8x8xf32>, vector<4x8x8xf32> -> vector<4x8x8xf32>
    "tpu.trace_stop"() : () -> ()
    %cst_85 = arith.constant 0.353553385 : f32
    %285 = vector.broadcast %cst_85 : f32 to vector<4x8x8xf32>
    %286 = arith.mulf %284, %285 : vector<4x8x8xf32>
    %287 = vector.shape_cast %29 : vector<8x8xf32> to vector<1x8x8xf32>
    %288 = vector.broadcast %287 : vector<1x8x8xf32> to vector<4x8x8xf32>
    %289 = arith.addf %286, %288 : vector<4x8x8xf32>
    %cst_86 = arith.constant dense<0xFF800000> : vector<4x8xf32>
    %290 = vector.multi_reduction <maximumf>, %289, %cst_86 [2] : vector<4x8x8xf32> to vector<4x8xf32>
    %291 = vector.shape_cast %290 : vector<4x8xf32> to vector<4x8x1xf32>
    %292 = vector.broadcast %291 : vector<4x8x1xf32> to vector<4x8x8xf32>
    %293 = arith.subf %289, %292 : vector<4x8x8xf32>
    %294 = math.exp %293 : vector<4x8x8xf32>
    %cst_87 = arith.constant dense<0.000000e+00> : vector<4x8xf32>
    %295 = vector.multi_reduction <add>, %294, %cst_87 [2] : vector<4x8x8xf32> to vector<4x8xf32>
    %296 = vector.shape_cast %295 : vector<4x8xf32> to vector<4x8x1xf32>
    %297 = tpu.reciprocal %296 {approx = true} : vector<4x8x1xf32> -> vector<4x8x1xf32>
    %298 = vector.broadcast %297 : vector<4x8x1xf32> to vector<4x8x8xf32>
    %299 = arith.mulf %294, %298 : vector<4x8x8xf32>
    %300 = vector.shape_cast %21 : vector<8x8xf32> to vector<1x8x8xf32>
    %301 = vector.broadcast %300 : vector<1x8x8xf32> to vector<4x8x8xf32>
    %302 = arith.mulf %299, %301 : vector<4x8x8xf32>
    "tpu.trace_start"() <{level = 10 : i32, message = "hij,hjk->hik"}> : () -> ()
    %cst_88 = arith.constant dense<0.000000e+00> : vector<4x8x8xf32>
    %303 = tpu.matmul %302, %15, %cst_88 {dimension_numbers = #tpu.dot_dimension_numbers<[2], [1], [1], [2], [0, 0, 0, 1, 1, 2], [0], [0]>} : vector<4x8x8xf32>, vector<4x8x8xf32>, vector<4x8x8xf32> -> vector<4x8x8xf32>
    "tpu.trace_stop"() : () -> ()
    %304 = vector.broadcast %9 : vector<1x8x8xf32> to vector<4x8x8xf32>
    %305 = arith.mulf %303, %304 : vector<4x8x8xf32>
    %cst_89 = arith.constant 0.000000e+00 : f32
    %306 = vector.broadcast %cst_89 : f32 to vector<4x8x8xf32>
    %307 = arith.maximumf %305, %306 : vector<4x8x8xf32>
    %308 = math.sqrt %307 : vector<4x8x8xf32>
    %309 = vector.broadcast %271 : vector<4x1x1xf32> to vector<4x8x8xf32>
    %310 = arith.mulf %308, %309 : vector<4x8x8xf32>
    %311 = math.exp %310 : vector<4x8x8xf32>
    %cst_90 = arith.constant 9.99999974E-6 : f32
    %cst_91 = arith.constant 1.000000e+05 : f32
    %312 = vector.broadcast %cst_90 : f32 to vector<4x8x8xf32>
    %313 = arith.maximumf %312, %311 : vector<4x8x8xf32>
    %314 = vector.broadcast %cst_91 : f32 to vector<4x8x8xf32>
    %315 = arith.minimumf %314, %313 : vector<4x8x8xf32>
    %316 = arith.mulf %286, %315 : vector<4x8x8xf32>
    %cst_92 = arith.constant dense<0xFF800000> : vector<4x8xf32>
    %317 = vector.multi_reduction <maximumf>, %316, %cst_92 [2] : vector<4x8x8xf32> to vector<4x8xf32>
    %318 = vector.shape_cast %317 : vector<4x8xf32> to vector<4x8x1xf32>
    %319 = vector.broadcast %318 : vector<4x8x1xf32> to vector<4x8x8xf32>
    %320 = arith.subf %316, %319 : vector<4x8x8xf32>
    %321 = math.exp %320 : vector<4x8x8xf32>
    %cst_93 = arith.constant dense<0.000000e+00> : vector<4x8xf32>
    %322 = vector.multi_reduction <add>, %321, %cst_93 [2] : vector<4x8x8xf32> to vector<4x8xf32>
    %323 = vector.shape_cast %322 : vector<4x8xf32> to vector<4x8x1xf32>
    %324 = tpu.reciprocal %323 {approx = true} : vector<4x8x1xf32> -> vector<4x8x1xf32>
    %325 = vector.broadcast %324 : vector<4x8x1xf32> to vector<4x8x8xf32>
    %326 = arith.mulf %321, %325 : vector<4x8x8xf32>
    %327 = vector.broadcast %34 : vector<1x8x1xf32> to vector<4x8x8xf32>
    %328 = arith.mulf %326, %327 : vector<4x8x8xf32>
    "tpu.trace_start"() <{level = 10 : i32, message = "hij,hje->hie"}> : () -> ()
    %cst_94 = arith.constant dense<0.000000e+00> : vector<4x8x32xf32>
    %329 = tpu.matmul %328, %283, %cst_94 {dimension_numbers = #tpu.dot_dimension_numbers<[2], [1], [1], [2], [0, 0, 0, 1, 1, 2], [0], [0]>} : vector<4x8x8xf32>, vector<4x8x32xf32>, vector<4x8x32xf32> -> vector<4x8x32xf32>
    "tpu.trace_stop"() : () -> ()
    %cst_95 = arith.constant dense<0.000000e+00> : vector<8x32xf32>
    %330 = vector.multi_reduction <add>, %329, %cst_95 [0] : vector<4x8x32xf32> to vector<8x32xf32>
    %c1144 = arith.constant 1144 : index
    %c0_96 = arith.constant 0 : index
    %331 = vector.load %arg4[%c1144, %c0_96] : memref<1296x64xf32, #tpu.memory_space<vmem>>, vector<1x32xf32>
    %332 = vector.broadcast %331 : vector<1x32xf32> to vector<8x32xf32>
    %333 = arith.addf %330, %332 : vector<8x32xf32>
    %334 = arith.addf %261, %333 : vector<8x32xf32>
    %c1152 = arith.constant 1152 : index
    %c0_97 = arith.constant 0 : index
    %335 = vector.load %arg4[%c1152, %c0_97] : memref<1296x64xf32, #tpu.memory_space<vmem>>, vector<1x32xf32>
    %c1160 = arith.constant 1160 : index
    %c0_98 = arith.constant 0 : index
    %336 = vector.load %arg4[%c1160, %c0_98] : memref<1296x64xf32, #tpu.memory_space<vmem>>, vector<1x32xf32>
    %cst_99 = arith.constant dense<0.000000e+00> : vector<8xf32>
    %337 = vector.multi_reduction <add>, %334, %cst_99 [1] : vector<8x32xf32> to vector<8xf32>
    %338 = vector.shape_cast %337 : vector<8xf32> to vector<8x1xf32>
    %cst_100 = arith.constant 3.200000e+01 : f32
    %339 = vector.broadcast %cst_100 : f32 to vector<8x1xf32>
    %340 = arith.divf %338, %339 : vector<8x1xf32>
    %341 = vector.broadcast %340 : vector<8x1xf32> to vector<8x32xf32>
    %342 = arith.subf %334, %341 : vector<8x32xf32>
    %343 = arith.mulf %342, %342 : vector<8x32xf32>
    %cst_101 = arith.constant dense<0.000000e+00> : vector<8xf32>
    %344 = vector.multi_reduction <add>, %343, %cst_101 [1] : vector<8x32xf32> to vector<8xf32>
    %345 = vector.shape_cast %344 : vector<8xf32> to vector<8x1xf32>
    %cst_102 = arith.constant 3.200000e+01 : f32
    %346 = vector.broadcast %cst_102 : f32 to vector<8x1xf32>
    %347 = arith.divf %345, %346 : vector<8x1xf32>
    %348 = vector.broadcast %340 : vector<8x1xf32> to vector<8x32xf32>
    %349 = arith.subf %334, %348 : vector<8x32xf32>
    %cst_103 = arith.constant 9.99999974E-6 : f32
    %350 = vector.broadcast %cst_103 : f32 to vector<8x1xf32>
    %351 = arith.addf %347, %350 : vector<8x1xf32>
    %352 = math.rsqrt %351 : vector<8x1xf32>
    %353 = vector.broadcast %352 : vector<8x1xf32> to vector<8x32xf32>
    %354 = arith.mulf %349, %353 : vector<8x32xf32>
    %355 = vector.broadcast %335 : vector<1x32xf32> to vector<8x32xf32>
    %356 = arith.mulf %354, %355 : vector<8x32xf32>
    %357 = vector.broadcast %336 : vector<1x32xf32> to vector<8x32xf32>
    %358 = arith.addf %356, %357 : vector<8x32xf32>
    %c1168 = arith.constant 1168 : index
    %c0_104 = arith.constant 0 : index
    %359 = vector.load %arg4[%c1168, %c0_104] : memref<1296x64xf32, #tpu.memory_space<vmem>>, vector<32x64xf32>
    %cst_105 = arith.constant dense<0.000000e+00> : vector<8x64xf32>
    %360 = tpu.matmul %358, %359, %cst_105 {dimension_numbers = #tpu.dot_dimension_numbers<[1], [0], [0], [1], [0, 0, 1, 1], [], []>} : vector<8x32xf32>, vector<32x64xf32>, vector<8x64xf32> -> vector<8x64xf32>
    %c1200 = arith.constant 1200 : index
    %c0_106 = arith.constant 0 : index
    %361 = vector.load %arg4[%c1200, %c0_106] : memref<1296x64xf32, #tpu.memory_space<vmem>>, vector<1x64xf32>
    %362 = vector.broadcast %361 : vector<1x64xf32> to vector<8x64xf32>
    %363 = arith.addf %360, %362 : vector<8x64xf32>
    %cst_107 = arith.constant 0.000000e+00 : f32
    %364 = vector.broadcast %cst_107 : f32 to vector<8x64xf32>
    %365 = arith.maximumf %363, %364 : vector<8x64xf32>
    %c1208 = arith.constant 1208 : index
    %c0_108 = arith.constant 0 : index
    %366 = vector.load %arg4[%c1208, %c0_108] : memref<1296x64xf32, #tpu.memory_space<vmem>>, vector<64x32xf32>
    %cst_109 = arith.constant dense<0.000000e+00> : vector<8x32xf32>
    %367 = tpu.matmul %365, %366, %cst_109 {dimension_numbers = #tpu.dot_dimension_numbers<[1], [0], [0], [1], [0, 0, 1, 1], [], []>} : vector<8x64xf32>, vector<64x32xf32>, vector<8x32xf32> -> vector<8x32xf32>
    %c1272 = arith.constant 1272 : index
    %c0_110 = arith.constant 0 : index
    %368 = vector.load %arg4[%c1272, %c0_110] : memref<1296x64xf32, #tpu.memory_space<vmem>>, vector<1x32xf32>
    %369 = vector.broadcast %368 : vector<1x32xf32> to vector<8x32xf32>
    %370 = arith.addf %367, %369 : vector<8x32xf32>
    %371 = arith.addf %358, %370 : vector<8x32xf32>
    %c1280 = arith.constant 1280 : index
    %c0_111 = arith.constant 0 : index
    %372 = vector.load %arg4[%c1280, %c0_111] : memref<1296x64xf32, #tpu.memory_space<vmem>>, vector<1x32xf32>
    %c1288 = arith.constant 1288 : index
    %c0_112 = arith.constant 0 : index
    %373 = vector.load %arg4[%c1288, %c0_112] : memref<1296x64xf32, #tpu.memory_space<vmem>>, vector<1x32xf32>
    %cst_113 = arith.constant dense<0.000000e+00> : vector<8xf32>
    %374 = vector.multi_reduction <add>, %371, %cst_113 [1] : vector<8x32xf32> to vector<8xf32>
    %375 = vector.shape_cast %374 : vector<8xf32> to vector<8x1xf32>
    %cst_114 = arith.constant 3.200000e+01 : f32
    %376 = vector.broadcast %cst_114 : f32 to vector<8x1xf32>
    %377 = arith.divf %375, %376 : vector<8x1xf32>
    %378 = vector.broadcast %377 : vector<8x1xf32> to vector<8x32xf32>
    %379 = arith.subf %371, %378 : vector<8x32xf32>
    %380 = arith.mulf %379, %379 : vector<8x32xf32>
    %cst_115 = arith.constant dense<0.000000e+00> : vector<8xf32>
    %381 = vector.multi_reduction <add>, %380, %cst_115 [1] : vector<8x32xf32> to vector<8xf32>
    %382 = vector.shape_cast %381 : vector<8xf32> to vector<8x1xf32>
    %cst_116 = arith.constant 3.200000e+01 : f32
    %383 = vector.broadcast %cst_116 : f32 to vector<8x1xf32>
    %384 = arith.divf %382, %383 : vector<8x1xf32>
    %385 = vector.broadcast %377 : vector<8x1xf32> to vector<8x32xf32>
    %386 = arith.subf %371, %385 : vector<8x32xf32>
    %cst_117 = arith.constant 9.99999974E-6 : f32
    %387 = vector.broadcast %cst_117 : f32 to vector<8x1xf32>
    %388 = arith.addf %384, %387 : vector<8x1xf32>
    %389 = math.rsqrt %388 : vector<8x1xf32>
    %390 = vector.broadcast %389 : vector<8x1xf32> to vector<8x32xf32>
    %391 = arith.mulf %386, %390 : vector<8x32xf32>
    %392 = vector.broadcast %372 : vector<1x32xf32> to vector<8x32xf32>
    %393 = arith.mulf %391, %392 : vector<8x32xf32>
    %394 = vector.broadcast %373 : vector<1x32xf32> to vector<8x32xf32>
    %395 = arith.addf %393, %394 : vector<8x32xf32>
    %c0_118 = arith.constant 0 : index
    %c0_119 = arith.constant 0 : index
    %396 = vector.load %arg5[%c0_118, %c0_119] : memref<160x256xf32, #tpu.memory_space<vmem>>, vector<64x64xf32>
    %397 = vector.extract_strided_slice %396 {offsets = [0, 0], sizes = [32, 64], strides = [1, 1]} : vector<64x64xf32> to vector<32x64xf32>
    %cst_120 = arith.constant dense<0.000000e+00> : vector<8x64xf32>
    %398 = tpu.matmul %395, %397, %cst_120 {dimension_numbers = #tpu.dot_dimension_numbers<[1], [0], [0], [1], [0, 0, 1, 1], [], []>} : vector<8x32xf32>, vector<32x64xf32>, vector<8x64xf32> -> vector<8x64xf32>
    %399 = vector.extract_strided_slice %396 {offsets = [32, 0], sizes = [32, 64], strides = [1, 1]} : vector<64x64xf32> to vector<32x64xf32>
    %cst_121 = arith.constant dense<0.000000e+00> : vector<8x64xf32>
    %400 = tpu.matmul %1, %399, %cst_121 {dimension_numbers = #tpu.dot_dimension_numbers<[1], [0], [0], [1], [0, 0, 1, 1], [], []>} : vector<8x32xf32>, vector<32x64xf32>, vector<8x64xf32> -> vector<8x64xf32>
    %401 = arith.addf %398, %400 : vector<8x64xf32>
    %c64 = arith.constant 64 : index
    %c0_122 = arith.constant 0 : index
    %402 = vector.load %arg5[%c64, %c0_122] : memref<160x256xf32, #tpu.memory_space<vmem>>, vector<1x64xf32>
    %403 = vector.broadcast %402 : vector<1x64xf32> to vector<8x64xf32>
    %404 = arith.addf %401, %403 : vector<8x64xf32>
    %cst_123 = arith.constant 0.000000e+00 : f32
    %405 = vector.broadcast %cst_123 : f32 to vector<8x64xf32>
    %406 = arith.maximumf %404, %405 : vector<8x64xf32>
    %c72 = arith.constant 72 : index
    %c0_124 = arith.constant 0 : index
    %407 = vector.load %arg5[%c72, %c0_124] : memref<160x256xf32, #tpu.memory_space<vmem>>, vector<64x256xf32>
    %cst_125 = arith.constant dense<0.000000e+00> : vector<8x256xf32>
    %408 = tpu.matmul %406, %407, %cst_125 {dimension_numbers = #tpu.dot_dimension_numbers<[1], [0], [0], [1], [0, 0, 1, 1], [], []>} : vector<8x64xf32>, vector<64x256xf32>, vector<8x256xf32> -> vector<8x256xf32>
    %c136_126 = arith.constant 136 : index
    %c0_127 = arith.constant 0 : index
    %409 = vector.load %arg5[%c136_126, %c0_127] : memref<160x256xf32, #tpu.memory_space<vmem>>, vector<1x256xf32>
    %410 = vector.broadcast %409 : vector<1x256xf32> to vector<8x256xf32>
    %411 = arith.addf %408, %410 : vector<8x256xf32>
    %cst_128 = arith.constant 0.000000e+00 : f32
    %412 = vector.broadcast %cst_128 : f32 to vector<8x256xf32>
    %413 = arith.maximumf %411, %412 : vector<8x256xf32>
    %c144 = arith.constant 144 : index
    %c0_129 = arith.constant 0 : index
    %414 = vector.load %arg5[%c144, %c0_129] : memref<160x256xf32, #tpu.memory_space<vmem>>, vector<1x256xf32>
    %415 = vector.broadcast %414 : vector<1x256xf32> to vector<8x256xf32>
    %416 = arith.mulf %413, %415 : vector<8x256xf32>
    %cst_130 = arith.constant dense<0.000000e+00> : vector<8xf32>
    %417 = vector.multi_reduction <add>, %416, %cst_130 [1] : vector<8x256xf32> to vector<8xf32>
    %418 = vector.shape_cast %417 : vector<8xf32> to vector<8x1xf32>
    %c152 = arith.constant 152 : index
    %c0_131 = arith.constant 0 : index
    %419 = vector.load %arg5[%c152, %c0_131] : memref<160x256xf32, #tpu.memory_space<vmem>>, vector<1x1xf32>
    %420 = vector.broadcast %419 : vector<1x1xf32> to vector<8x1xf32>
    %421 = arith.addf %418, %420 : vector<8x1xf32>
    %422 = arith.negf %421 : vector<8x1xf32>
    %423 = math.exp %422 : vector<8x1xf32>
    %cst_132 = arith.constant 1.000000e+00 : f32
    %424 = vector.broadcast %cst_132 : f32 to vector<8x1xf32>
    %425 = arith.addf %424, %423 : vector<8x1xf32>
    %426 = arith.divf %424, %425 : vector<8x1xf32>
    %c0_133 = arith.constant 0 : index
    %c0_134 = arith.constant 0 : index
    %c0_135 = arith.constant 0 : index
    %427 = vector.load %arg6[%c0_133, %c0_134, %c0_135] : memref<1x8x1xf32, #tpu.memory_space<vmem>>, vector<1x8x1xf32>
    %428 = vector.shape_cast %427 : vector<1x8x1xf32> to vector<8x1xf32>
    %429 = vector.shape_cast %426 : vector<8x1xf32> to vector<1x8x1xf32>
    tpu.vector_store %arg6[%c0_133, %c0_134, %c0_135], %429 {strides = array<i32>} : memref<1x8x1xf32, #tpu.memory_space<vmem>>, vector<1x8x1xf32>,
    %c0_136 = arith.constant 0 : index
    %c0_137 = arith.constant 0 : index
    %c0_138 = arith.constant 0 : index
    %430 = vector.load %arg3[%c0_136, %c0_137, %c0_138] : memref<1x8x1xf32, #tpu.memory_space<vmem>>, vector<1x8x1xf32>
    %431 = vector.shape_cast %430 : vector<1x8x1xf32> to vector<8x1xf32>
    %cst_139 = arith.constant -0.899999976 : f32
    %432 = vector.broadcast %cst_139 : f32 to vector<8x1xf32>
    %433 = arith.cmpf ogt, %431, %432 : vector<8x1xf32>
    %434 = arith.extui %433 : vector<8x1xi1> to vector<8x1xi32>
    %435 = arith.sitofp %434 : vector<8x1xi32> to vector<8x1xf32>
    %cst_140 = arith.constant 0.000000e+00 : f32
    %436 = vector.broadcast %cst_140 : f32 to vector<8x1xf32>
    %437 = arith.maximumf %421, %436 : vector<8x1xf32>
    %438 = arith.mulf %421, %431 : vector<8x1xf32>
    %439 = arith.subf %437, %438 : vector<8x1xf32>
    %440 = math.absf %421 : vector<8x1xf32>
    %cst_141 = arith.constant 0.000000e+00 : f32
    %441 = vector.broadcast %cst_141 : f32 to vector<8x1xf32>
    %442 = arith.subf %441, %440 : vector<8x1xf32>
    %443 = math.exp %442 : vector<8x1xf32>
    %cst_142 = arith.constant 1.000000e+00 : f32
    %444 = vector.broadcast %cst_142 : f32 to vector<8x1xf32>
    %445 = arith.addf %444, %443 : vector<8x1xf32>
    %446 = math.log %445 : vector<8x1xf32>
    %447 = arith.addf %439, %446 : vector<8x1xf32>
    %448 = arith.mulf %447, %435 : vector<8x1xf32>
    %cst_143 = arith.constant dense<0.000000e+00> : vector<1xf32>
    %449 = vector.multi_reduction <add>, %448, %cst_143 [0] : vector<8x1xf32> to vector<1xf32>
    %450 = vector.shape_cast %449 : vector<1xf32> to vector<1x1xf32>
    %c0_144 = arith.constant 0 : index
    %c0_145 = arith.constant 0 : index
    %c0_146 = arith.constant 0 : index
    %451 = vector.load %arg7[%c0_144, %c0_145, %c0_146] : memref<1x1x1xf32, #tpu.memory_space<vmem>>, vector<1x1x1xf32>
    %452 = vector.shape_cast %451 : vector<1x1x1xf32> to vector<1x1xf32>
    %453 = vector.shape_cast %450 : vector<1x1xf32> to vector<1x1x1xf32>
    tpu.vector_store %arg7[%c0_144, %c0_145, %c0_146], %453 {strides = array<i32>} : memref<1x1x1xf32, #tpu.memory_space<vmem>>, vector<1x1x1xf32>,
    return
  }
  func.func @transform_0(%arg0: i32) -> (i32, i32, i32) {
    %c0_i32 = arith.constant 0 : i32
    %c0_i32_0 = arith.constant 0 : i32
    %c0_i32_1 = arith.constant 0 : i32
    return %arg0, %c0_i32, %c0_i32_0 : i32, i32, i32
  }
  func.func @transform_1(%arg0: i32) -> (i32, i32, i32) {
    %c0_i32 = arith.constant 0 : i32
    %c0_i32_0 = arith.constant 0 : i32
    %c0_i32_1 = arith.constant 0 : i32
    return %arg0, %c0_i32, %c0_i32_0 : i32, i32, i32
  }
  func.func @transform_2(%arg0: i32) -> (i32, i32, i32) {
    %c0_i32 = arith.constant 0 : i32
    %c0_i32_0 = arith.constant 0 : i32
    %c0_i32_1 = arith.constant 0 : i32
    return %arg0, %c0_i32, %c0_i32_0 : i32, i32, i32
  }
  func.func @transform_3(%arg0: i32) -> (i32, i32) {
    %c0_i32 = arith.constant 0 : i32
    %c0_i32_0 = arith.constant 0 : i32
    %c0_i32_1 = arith.constant 0 : i32
    return %c0_i32, %c0_i32_0 : i32, i32
  }
  func.func @transform_4(%arg0: i32) -> (i32, i32) {
    %c0_i32 = arith.constant 0 : i32
    %c0_i32_0 = arith.constant 0 : i32
    %c0_i32_1 = arith.constant 0 : i32
    return %c0_i32, %c0_i32_0 : i32, i32
  }
  func.func @transform_5(%arg0: i32) -> (i32, i32, i32) {
    %c0_i32 = arith.constant 0 : i32
    %c0_i32_0 = arith.constant 0 : i32
    %c0_i32_1 = arith.constant 0 : i32
    return %arg0, %c0_i32, %c0_i32_0 : i32, i32, i32
  }
  func.func @transform_6(%arg0: i32) -> (i32, i32, i32) {
    %c0_i32 = arith.constant 0 : i32
    %c0_i32_0 = arith.constant 0 : i32
    %c0_i32_1 = arith.constant 0 : i32
    return %arg0, %c0_i32, %c0_i32_0 : i32, i32, i32
  }
}

</mosaic_0001>

<bundles_post_ra>
// kernel: mul.10
= control target key start
LH: loop header
LB: loop body
LE: loop exit
PB: predicated region body
PF: predicated region fallthrough
CT: control target
= control target key end

     0   :  { %vm7_vm0 = vcmask 64512   ;;  %s39_s0 = inlined_call_operand.vmem [shape: f32[16], index: 0, kind: input, shape index: {}]   ;;  %s40_s1 = inlined_call_operand.vmem [shape: f32[2,8], index: 1, kind: output, shape index: {}]  }
   0x1   :  { %v4_v0 = vld [vmem:[%s39_s0] sm:$0x1]  ;;  %s22_s0 = smov 120  }
   0x2   :  { %5 = vst [vmem:[#allocation1] sm:$0x1] %v4_v0 }
   0x9   :  { %v9_v1 = vld [vmem:[#allocation1] sm:$0x1]  }
   0xa   :  { %v6_v2 = vld [vmem:[#allocation1] sm:$0x1]   ;;  %10 = vrot.lane.b32.xlu0 %v9_v1, %s22_s0 }
   0xb   :  { %8 = vst.msk [vmem:[#allocation0] sm:$0x1] %vm7_vm0, %v6_v2  }
  0x7c   :  { %v11_v3 = vpop.permute.xlu0 %10  }
  0x7d   :  { %14 = vst.msk [vmem:[#allocation0 + $0x1] sm:$0x1] %vm7_vm0, %v11_v3  }
  0x84   :  { %v18_v4 = vld [vmem:[#allocation0] sm:$0x3] }
  0x85   :  { %20 = vst [vmem:[%s40_s1] sm:$0x3] %v18_v4 }

// kernel: aktnet_forward.1
= control target key start
LH: loop header
LB: loop body
LE: loop exit
PB: predicated region body
PF: predicated region fallthrough
CT: control target
= control target key end

     0   :  { %s7921_s21 = smov 0   ;;  %s9179_s0 = inlined_call_operand.vmem [shape: f32[2,8,32], index: 0, kind: input, shape index: {}]   ;;  %s9180_s1 = inlined_call_operand.vmem [shape: f32[2,8,32], index: 1, kind: input, shape index: {}]   ;;  %s9181_s2 = inlined_call_operand.vmem [shape: f32[2,8,1], index: 2, kind: input, shape index: {}]   ;;  %s9182_s3 = inlined_call_operand.vmem [shape: f32[1296,64], index: 3, kind: input, shape index: {}]   ;;  %s9183_s4 = inlined_call_operand.vmem [shape: f32[160,256], index: 4, kind: input, shape index: {}]   ;;  %s9184_s5 = inlined_call_operand.vmem [shape: f32[2,8,1], index: 5, kind: output, shape index: {0}]   ;;  %s9185_s6 = inlined_call_operand.vmem [shape: f32[2,1,1], index: 6, kind: output, shape index: {1}]  }
   0x1 LB: > { %s6592_s22 = sadd.s32 4294967295, %s7878_s21   ;;  %p6596_p0 = scmp.ge.s32.totalorder %s7878_s21, 1  ;;  %s7878_s21 = sphi %s7921_s21, %s17_s21  }
   0x2   : > { %p232_p1 = scmp.lt.s32.totalorder %s7878_s21, 3 }
   0x4   : > { %p233_p2 = pnand %p6596_p0, %p232_p1 }
   0x5   : > { %v317_v0 = vld [vmem:[%s9182_s3] sm:$0xff] (!%p233_p2)  ;;  %v318_v1 = vld [vmem:[%s9182_s3 + $0x8] sm:$0xff] (!%p233_p2)  ;;  %v7880_v3 = vmov (!%p233_p2), 0.0|0.0   ;;  %v319_v6 = vld [vmem:[%s9182_s3 + $0x10] sm:$0xff] (!%p233_p2)  ;;  %p271_p3 = scmp.lt.s32.totalorder (!%p233_p2), %s6592_s22, 1  ;;  %vm7881_vm0 = vmmov (!%p233_p2), 0   ;;  %v292_v51 = vlaneseq (!%p233_p2) }
   0x6   : > { %236 = sbr.rel (%p233_p2) target bundleno = 7187 (0x1c13), region = 40  ;;  %v321_v2 = vld [vmem:[%s9182_s3 + $0x20] sm:$0xff] (!%p233_p2)  ;;  %7485 = vmatprep.subr.bf16.mxu0 (!%p233_p2), %v7880_v3  ;;  %7491 = vmatprep.subr.bf16.mxu1 (!%p233_p2), %v7880_v3  ;;  %v7486_v4 = vpack.c.bf16 (!%p233_p2), %v318_v1, %v317_v0  ;;  %v322_v5 = vld [vmem:[%s9182_s3 + $0x28] sm:$0xff] (!%p233_p2)  ;;  %v320_v7 = vld [vmem:[%s9182_s3 + $0x18] sm:$0xff] (!%p233_p2)  ;;  %v7882_v11 = vmov (!%p233_p2), 0.0   ;;  %vm447_vm1 = vcmask (!%p233_p2), 261120  }
   0x7   : > { %v7492_v8 = vpack.c.bf16 (!%p233_p2), %v322_v5, %v321_v2  ;;  %v323_v9 = vld [vmem:[%s9182_s3 + $0x30] sm:$0xff] (!%p233_p2)  ;;  %v324_v10 = vld [vmem:[%s9182_s3 + $0x38] sm:$0xff] (!%p233_p2)  ;;  %6967 = vmatprep.mubr.msk.f32.mxu0 (!%p233_p2), %vm7881_vm0, %v7882_v11  ;;  %6978 = vmatprep.mubr.msk.f32.mxu1 (!%p233_p2), %vm7881_vm0, %v7882_v11  ;;  %v7489_v12 = vpack.c.bf16 (!%p233_p2), %v320_v7, %v319_v6  ;;  %v325_v14 = vld [vmem:[%s9182_s3 + $0x40] sm:$0xff] (!%p233_p2)  ;;  %v7883_v52 = vmov (!%p233_p2), 1966171168   ;;  %v8090_v54 = vshrl.u32 (!%p233_p2), %v292_v51, 7 }
   0x8   : > { %7487 = vmatpush3.bf16.msra.mxu0 (!%p233_p2), %v7486_v4  ;;  %v7495_v13 = vpack.c.bf16 (!%p233_p2), %v324_v10, %v323_v9  ;;  %v326_v15 = vld [vmem:[%s9182_s3 + $0x48] sm:$0xff] (!%p233_p2)  ;;  %v329_v16 = vld [vmem:[%s9182_s3 + $0x60] sm:$0xff] (!%p233_p2)  ;;  %v327_v21 = vld [vmem:[%s9182_s3 + $0x50] sm:$0xff] (!%p233_p2)  ;;  %v344_v53 = vunpack.c.l.s4 (!%p233_p2), %v7883_v52  ;;  %vm1031_vm2 = vcmask (!%p233_p2), 64512   ;;  %vm2236_vm13 = vcmask (!%p233_p2), 523264  }
   0x9   : > { %7493 = vmatpush3.bf16.msra.mxu1 (!%p233_p2), %v7492_v8  ;;  %7488 = vmatprep.subr.bf16.mxu0 (!%p233_p2), %v7880_v3  ;;  %v330_v17 = vld [vmem:[%s9182_s3 + $0x68] sm:$0xff] (!%p233_p2)  ;;  %v7498_v19 = vpack.c.bf16 (!%p233_p2), %v326_v15, %v325_v14  ;;  %v328_v22 = vld [vmem:[%s9182_s3 + $0x58] sm:$0xff] (!%p233_p2)  ;;  %v331_v23 = vld [vmem:[%s9182_s3 + $0x70] sm:$0xff] (!%p233_p2)  ;;  %v8100_v60 = vsub.s32 (!%p233_p2), 0, %v8090_v54 }
   0xa   : > { %7494 = vmatprep.subr.bf16.mxu1 (!%p233_p2), %v7880_v3  ;;  %v7504_v20 = vpack.c.bf16 (!%p233_p2), %v330_v17, %v329_v16  ;;  %v332_v24 = vld [vmem:[%s9182_s3 + $0x78] sm:$0xff] (!%p233_p2)  ;;  %v7501_v25 = vpack.c.bf16 (!%p233_p2), %v328_v22, %v327_v21  ;;  %v359_v27 = vld [vmem:[%s9182_s3 + $0x88] sm:$0xff] (!%p233_p2)  ;;  %v360_v28 = vld [vmem:[%s9182_s3 + $0x90] sm:$0xff] (!%p233_p2)  ;;  %v345_v55 = vunpack.c.0.s8 (!%p233_p2), %v344_v53 }
   0xb   : > { %v7507_v26 = vpack.c.bf16 (!%p233_p2), %v332_v24, %v331_v23  ;;  %v363_v29 = vld [vmem:[%s9182_s3 + $0xa8] sm:$0xff] (!%p233_p2)  ;;  %v364_v30 = vld [vmem:[%s9182_s3 + $0xb0] sm:$0xff] (!%p233_p2)  ;;  %v7510_v31 = vpack.c.bf16 (!%p233_p2), %v360_v28, %v359_v27  ;;  %v361_v32 = vld [vmem:[%s9182_s3 + $0x98] sm:$0xff] (!%p233_p2) }
   0xc   : > { %7490 = vmatpush3.bf16.msra.mxu0 (!%p233_p2), %v7489_v12  ;;  %v362_v33 = vld [vmem:[%s9182_s3 + $0xa0] sm:$0xff] (!%p233_p2)  ;;  %v7516_v34 = vpack.c.bf16 (!%p233_p2), %v364_v30, %v363_v29  ;;  %v365_v35 = vld [vmem:[%s9182_s3 + $0xb8] sm:$0xff] (!%p233_p2)  ;;  %v367_v38 = vld [vmem:[%s9182_s3 + $0xc8] sm:$0xff] (!%p233_p2)  ;;  %v8093_v56 = vsub.s32 (!%p233_p2), %v345_v55, %v8090_v54 }
   0xd   : > { %s9189_s22 = smov (!%p271_p3, %s6592_s22), 1  ;;  %7496 = vmatpush3.bf16.msra.mxu1 %v7495_v13  ;;  %7497 = vmatprep.subr.bf16.mxu0 %v7880_v3  ;;  %v366_v36 = vld [vmem:[%s9182_s3 + $0xc0] sm:$0xff]  ;;  %v7513_v37 = vpack.c.bf16 %v362_v33, %v361_v32  ;;  %v368_v39 = vld [vmem:[%s9182_s3 + $0xd0] sm:$0xff]  ;;  %v371_v41 = vld [vmem:[%s9182_s3 + $0xe8] sm:$0xff]  ;;  %v8147_v32 = vand.u32 127, %v292_v51 }
   0xe   : > { %s7970_s19 = sshll.u32 %s9189_s22, 3  ;;  %7503 = vmatprep.subr.bf16.mxu1 %v7880_v3  ;;  %v7519_v40 = vpack.c.bf16 %v366_v36, %v365_v35  ;;  %v372_v42 = vld [vmem:[%s9182_s3 + $0xf0] sm:$0xff]  ;;  %v7522_v43 = vpack.c.bf16 %v368_v39, %v367_v38  ;;  %v369_v44 = vld [vmem:[%s9182_s3 + $0xd8] sm:$0xff]  ;;  %v370_v45 = vld [vmem:[%s9182_s3 + $0xe0] sm:$0xff]  ;;  %s289_s12 = scalar_lea.vmem %s9185_s6, %s9189_s22 }
   0xf   : > { %s278_s28 = scalar_lea.vmem %s9180_s1, %s7970_s19  ;;  %v7528_v46 = vpack.c.bf16 %v372_v42, %v371_v41  ;;  %v7525_v47 = vpack.c.bf16 %v370_v45, %v369_v44  ;;  %v373_v48 = vld [vmem:[%s9182_s3 + $0xf8] sm:$0xff]  ;;  %v374_v49 = vld [vmem:[%s9182_s3 + $0x100] sm:$0xff]  ;;  %vm304_vm3 = vcmp.le.s32.totalorder %v8147_v32, %v8090_v54  ;;  %vm8183_vm4 = vcmp.gt.s32.totalorder %v8090_v54, %v8147_v32  ;;  %s8354_s27 = scalar_lea.vmem %s9179_s0, %s7970_s19 }
  0x10   : > { %v7982_v18 = vld [vmem:[%s278_s28] sm:$0xff]  ;;  %v7531_v50 = vpack.c.bf16 %v374_v49, %v373_v48  ;;  %v8152_v33 = vsel %vm304_vm3, 1.0, %v7882_v11  ;;  %s282_s7 = scalar_lea.vmem %s9181_s2, %s7970_s19  ;;  %s286_s10 = scalar_lea.vmem %s9184_s5, %s7970_s19 }
  0x11   : > { %6968 = vmatmul.mubr.msk.f32.vlgmr.msra.gmra.mrb[0].mxu0 %vm447_vm1, %v7982_v18  ;;  %6979 = vmatmul.mubr.msk.f32.vlgmr.msra.gmra.mrb[0].mxu1 %vm447_vm1, %v7982_v18  ;;  %v6606_v57 = vld.sshfl [vmem:[%s9182_s3 + $0x80] sm:$0x33 pattern:$0x75316420] }
  0x12   : > { %7499 = vmatpush3.bf16.msra.mxu0 %v7498_v19  ;;  %7505 = vmatpush3.bf16.msra.mxu1 %v7504_v20  ;;  %v342_v58 = vcombine.high %v6606_v57, %v6606_v57  ;;  %v349_v59 = vrot.slane %v6606_v57, %v8093_v56  ;;  %v8122_v19 = vld.sshfl [vmem:[%s9182_s3 + $0x108] sm:$0x33 pattern:$0x75316420] }
  0x13   : > { %7500 = vmatprep.subr.bf16.mxu0 %v7880_v3  ;;  %7506 = vmatprep.subr.bf16.mxu1 %v7880_v3  ;;  %v8130_v20 = vrot.slane %v8122_v19, %v8093_v56 }
  0x14   : > { %6989 = vmatprep.mubr.msk.f32.mxu0 %vm7881_vm0, %v7882_v11  ;;  %7000 = vmatprep.mubr.msk.f32.mxu1 %vm7881_vm0, %v7882_v11  ;;  %v356_v61 = vrot.slane %v342_v58, %v8093_v56  ;;  %v430_v62 = vrot.slane %v349_v59, %v8100_v60  ;;  %v357_v5 = vcombine.high %v349_v59, %v349_v59 }
  0x15   : > { %v399_v23 = vcombine.high %v8130_v20, %v8130_v20 }
  0x16   : > { %7502 = vmatpush3.bf16.msra.mxu0 %v7501_v25  ;;  %7508 = vmatpush3.bf16.msra.mxu1 %v7507_v26  ;;  %v434_v63 = vrot.slane %v356_v61, %v8100_v60  ;;  %v358_v7 = vcombine.high %v356_v61, %v356_v61  ;;  %v438_v9 = vrot.slane %v357_v5, %v8100_v60 }
  0x17   : > { %7509 = vmatprep.subr.bf16.mxu0 %v7880_v3  ;;  %7515 = vmatprep.subr.bf16.mxu1 %v7880_v3  ;;  %v742_v26 = vrot.slane %v399_v23, %v8100_v60  ;;  %v6608_v23 = vld.sshfl [vmem:[%s9182_s3 + $0x110] sm:$0x33 pattern:$0x75316420] }
  0x18   : > { %v442_v10 = vrot.slane %v358_v7, %v8100_v60 }
  0x19   : > { %6990 = vmatmul.mubr.msk.f32.vlgmr.msra.gmra.mrb[2].mxu0 %vm447_vm1, %v7982_v18  ;;  %7001 = vmatmul.mubr.msk.f32.vlgmr.msra.gmra.mrb[2].mxu1 %vm447_vm1, %v7982_v18 }
  0x1a   : > { %7511 = vmatpush3.bf16.msra.mxu0 %v7510_v31  ;;  %7011 = vmatprep.mubr.msk.f32.mxu0 %vm7881_vm0, %v7882_v11 }
  0x1b   : > { %7512 = vmatprep.subr.bf16.mxu0 %v7880_v3  ;;  %7517 = vmatpush3.bf16.msra.mxu1 %v7516_v34  ;;  %v310_v34 = vsub.f32 1.0, %v8152_v33 }
  0x1c   : > { %7022 = vmatprep.mubr.msk.f32.mxu1 %vm7881_vm0, %v7882_v11  ;;  %7518 = vmatprep.subr.bf16.mxu1 %v7880_v3 }
  0x1d   : > { %v8155_v35 = vmul.f32 -1e+32, %v310_v34 }
  0x1e   : > { %7514 = vmatpush3.bf16.msra.mxu0 %v7513_v37 }
  0x1f   : > { %7521 = vmatprep.subr.bf16.mxu0 %v7880_v3  ;;  %7520 = vmatpush3.bf16.msra.mxu1 %v7519_v40 }
  0x20   : > { %7527 = vmatprep.subr.bf16.mxu1 %v7880_v3 }
  0x21   : > { %7012 = vmatmul.mubr.msk.f32.vlgmr.msra.gmra.mrb[4].mxu0 %vm447_vm1, %v7982_v18 }
  0x22   : > { %7523 = vmatpush3.bf16.msra.mxu0 %v7522_v43  ;;  %7033 = vmatprep.mubr.msk.f32.mxu0 %vm7881_vm0, %v7882_v11 }
  0x23   : > { %7524 = vmatprep.subr.bf16.mxu0 %v7880_v3  ;;  %7023 = vmatmul.mubr.msk.f32.vlgmr.msra.gmra.mrb[4].mxu1 %vm447_vm1, %v7982_v18 }
  0x24   : > { %7529 = vmatpush3.bf16.msra.mxu1 %v7528_v46  ;;  %7044 = vmatprep.mubr.msk.f32.mxu1 %vm7881_vm0, %v7882_v11 }
  0x25   : > { %7530 = vmatprep.subr.bf16.mxu1 %v7880_v3 }
  0x26   : > { %7526 = vmatpush3.bf16.msra.mxu0 %v7525_v47 }
  0x27   : > { %7047 = vmatprep.subr.mxu0 %v7882_v11 }
  0x28   : > { %7532 = vmatpush3.bf16.msra.mxu1 %v7531_v50 }
  0x29   : > { %7034 = vmatmul.mubr.msk.f32.vlgmr.msra.gmra.mrb[6].mxu0 %vm447_vm1, %v7982_v18  ;;  %7062 = vmatprep.subr.mxu1 %v7882_v11 }
  0x2a   : > { %7049 = vmatprep.mubr.msk.f32.mxu0 %vm7881_vm0, %v7882_v11 }
  0x2b   : > { %7045 = vmatmul.mubr.msk.f32.vlgmr.msra.gmra.mrb[6].mxu1 %vm447_vm1, %v7982_v18 }
  0x2c   : > { %7064 = vmatprep.mubr.msk.f32.mxu1 %vm7881_vm0, %v7882_v11 }
  0xe4   : > { %v517_v0 = vpop.f32.mrb[0].mxu0  ;;  %v587_v4 = vpop.f32.mrb[0].mxu1 }
  0xe5   : > { %v518_v1 = vadd.f32 %v517_v0, %v430_v62  ;;  %v6969_v2 = vpop.f32.mrb[1].mxu0  ;;  %v6980_v6 = vpop.f32.mrb[1].mxu1  ;;  %v588_v8 = vadd.f32 %v587_v4, %v434_v63 }
  0xe7   : > { %7048 = vmatpush3.xpose.msk.msra.mxu0 %vm1031_vm2, %v518_v1 }
  0xe8   : > { %7052 = vmatprep.subr.mxu0 %v7882_v11 }
  0xea   : > { %7050 = vmatmul.mubr.msk.f32.vlgmr.msra.gmra.mrb[8].mxu0 %vm1031_vm2, %v518_v1 }
  0xeb   : > { %7053 = vmatpush3.xpose.msk.msra.mxu0 %vm1031_vm2, %v588_v8  ;;  %7054 = vmatprep.mubr.msk.f32.mxu0 %vm7881_vm0, %v7882_v11 }
  0xec   : > { %v657_v12 = vpop.f32.mrb[2].mxu0  ;;  %7057 = vmatprep.subr.mxu0 %v7882_v11  ;;  %v727_v14 = vpop.f32.mrb[2].mxu1 }
  0xed   : > { %v658_v13 = vadd.f32 %v657_v12, %v438_v9  ;;  %v6991_v15 = vpop.f32.mrb[3].mxu0  ;;  %v728_v16 = vadd.f32 %v727_v14, %v442_v10  ;;  %v7002_v17 = vpop.f32.mrb[3].mxu1 }
  0xee   : > { %7055 = vmatmul.mubr.msk.f32.vlgmr.msra.gmra.mrb[10].mxu0 %vm1031_vm2, %v588_v8 }
  0xef   : > { %7058 = vmatpush3.xpose.msk.msra.mxu0 %vm1031_vm2, %v658_v13  ;;  %7059 = vmatprep.mubr.msk.f32.mxu0 %vm7881_vm0, %v7882_v11 }
  0xf0   : > { %7063 = vmatpush3.xpose.msk.msra.mxu1 %vm1031_vm2, %v728_v16  ;;  %7067 = vmatprep.subr.mxu0 %v7882_v11 }
  0xf1   : > { %7072 = vmatprep.subr.mxu1 %v7882_v11 }
  0xf2   : > { %7060 = vmatmul.mubr.msk.f32.vlgmr.msra.gmra.mrb[12].mxu0 %vm1031_vm2, %v658_v13 }
  0xf3   : > { %7065 = vmatmul.mubr.msk.f32.vlgmr.msra.gmra.mrb[8].mxu1 %vm1031_vm2, %v728_v16  ;;  %7069 = vmatprep.mubr.msk.f32.mxu0 %vm7881_vm0, %v7882_v11 }
  0xf4   : > { %v8134_v21 = vpop.f32.mrb[4].mxu0  ;;  %7074 = vmatprep.mubr.msk.f32.mxu1 %vm7881_vm0, %v7882_v11 }
  0xf5   : > { %v7013_v22 = vpop.f32.mrb[5].mxu0 }
  0xf6   : > { %v8140_v24 = vpop.f32.mrb[4].mxu1  ;;  %v7884_v22 = vmov 1.0  }
  0xf7   : > { %v7024_v25 = vpop.f32.mrb[5].mxu1  ;;  %7068 = vmatpush3.msk.msra.mxu0 %vm8183_vm4, %v7884_v22  ;;  %7073 = vmatpush3.msk.msra.mxu1 %vm8183_vm4, %v7884_v22 }
  0xf8   : > { %7077 = vmatprep.subr.mxu0 %v7882_v11  ;;  %7082 = vmatprep.subr.mxu1 %v7882_v11  ;;  %v7885_v25 = vmov 0  }
  0xf9   : > { %7708 = vset.pattern.permute.xlu1 %v7885_v25  ;;  %7707 = vset.pattern.permute.xlu0 %v7885_v25 }
  0xfc   : > { %v957_v27 = vpop.f32.mrb[6].mxu0 }
  0xfd   : > { %v8143_v28 = vadd.f32 %v957_v27, %v742_v26  ;;  %v7035_v29 = vpop.f32.mrb[7].mxu0  ;;  %v410_v26 = vcombine.high %v6608_v23, %v6608_v23  ;;  %v417_v27 = vrot.slane %v6608_v23, %v8093_v56 }
  0xfe   : > { %v8145_v30 = vpop.f32.mrb[6].mxu1 }
  0xff   : > { %v7046_v31 = vpop.f32.mrb[7].mxu1  ;;  %v424_v29 = vrot.slane %v410_v26, %v8093_v56  ;;  %v425_v34 = vcombine.high %v417_v27, %v417_v27 }
 0x100   : > { %v1711_v31 = vrot.slane %v417_v27, %v8100_v60 }
 0x1bd   : > { %v1101_v36 = vpop.f32.mrb[8].mxu0 }
 0x1be   : > { %v8157_v37 = vmul.f32 0.35355338, %v1101_v36  ;;  %v7051_v38 = vpop.f32.mrb[9].mxu0  ;;  %v1715_v36 = vrot.slane %v424_v29, %v8100_v60 }
 0x1bf   : > { %v1719_v38 = vrot.slane %v425_v34, %v8100_v60 }
 0x1c0   : > { %v1328_v39 = vadd.f32 %v8157_v37, %v8155_v35 }
 0x1c1   : > { %v1174_v40 = vpop.f32.mrb[10].mxu0 }
 0x1c2   : > { %v8161_v41 = vmul.f32 0.35355338, %v1174_v40  ;;  %v7056_v42 = vpop.f32.mrb[11].mxu0  ;;  %v1332_v43 = vsel %vm1031_vm2, %v1328_v39, -inf }
 0x1c3   : > { %1333 = vmax.xlane.f32.xlu0 %v1332_v43 }
 0x1c4   : > { %v1329_v44 = vadd.f32 %v8161_v41, %v8155_v35 }
 0x1c5   : > { %v1247_v45 = vpop.f32.mrb[12].mxu0 }
 0x1c6   : > { %v8166_v46 = vmul.f32 0.35355338, %v1247_v45  ;;  %v1320_v47 = vpop.f32.mrb[8].mxu1  ;;  %v7061_v48 = vpop.f32.mrb[13].mxu0  ;;  %v1335_v49 = vsel %vm1031_vm2, %v1329_v44, -inf }
 0x1c7   : > { %v8169_v50 = vmul.f32 0.35355338, %v1320_v47  ;;  %v7066_v51 = vpop.f32.mrb[9].mxu1  ;;  %1336 = vmax.xlane.f32.xlu0 %v1335_v49 }
 0x1c8   : > { %v1330_v52 = vadd.f32 %v8166_v46, %v8155_v35 }
 0x1c9   : > { %v1331_v55 = vadd.f32 %v8169_v50, %v8155_v35 }
 0x1ca   : > { %v1338_v53 = vsel %vm1031_vm2, %v1330_v52, -inf }
 0x1cb   : > { %1339 = vmax.xlane.f32.xlu1 %v1338_v53  ;;  %v1341_v57 = vsel %vm1031_vm2, %v1331_v55, -inf }
 0x1cf   : > { %1342 = vmax.xlane.f32.xlu1 %v1341_v57 }
 0x250   : > { %v1334_v58 = vpop.xlane.xlu0 %1333 }
 0x251   : > { %v1344_v59 = vsub.f32 %v1328_v39, %v1334_v58  ;;  %v426_v39 = vcombine.high %v424_v29, %v424_v29  ;;  %v734_v58 = vrot.slane %v8130_v20, %v8100_v60 }
 0x253   : > { %v1348_v61 = vmul.f32 1.442695, %v1344_v59  ;;  %v1723_v40 = vrot.slane %v426_v39, %v8100_v60  ;;  %v818_v20 = vadd.f32 %v8134_v21, %v734_v58  ;;  %v296_v21 = vsub.s32 %v8147_v32, %v8090_v54 }
 0x254   : > { %v1337_v62 = vpop.xlane.xlu0 %1336 }
 0x255   : > { %7709 = vpow2.f32 %v1348_v61  ;;  %v1345_v63 = vsub.f32 %v1329_v44, %v1337_v62 }
 0x257   : > { %v1350_v0 = vmul.f32 1.442695, %v1345_v63 }
 0x258   : > { %v1340_v1 = vpop.xlane.xlu1 %1339 }
 0x259   : > { %7711 = vpow2.f32 %v1350_v0  ;;  %v1346_v2 = vsub.f32 %v1330_v52, %v1340_v1  ;;  %v384_v52 = vcombine.high %v8122_v19, %v8122_v19 }
 0x25b   : > { %v1352_v4 = vmul.f32 1.442695, %v1346_v2  ;;  %v8218_v19 = vrot.slane %v384_v52, %v8093_v56 }
 0x25c   : > { %v1343_v5 = vpop.xlane.xlu1 %1342 }
 0x25d   : > { %7713 = vpow2.f32 %v1352_v4  ;;  %v1347_v6 = vsub.f32 %v1331_v55, %v1343_v5  ;;  %v738_v63 = vrot.slane %v8218_v19, %v8100_v60  ;;  %v298_v4 = vsub.s32 0, %v296_v21 }
 0x25f   : > { %v7710_v7 = vpop.eup %7709  ;;  %v1354_v8 = vmul.f32 1.442695, %v1347_v6  ;;  %v888_v2 = vadd.f32 %v8140_v24, %v738_v63  ;;  %v6601_v5 = vmin.u32 %v298_v4, %v296_v21 }
 0x260   : > { %v1356_v9 = vsel %vm1031_vm2, %v7710_v7, 0.0 }
 0x261   : > { %7715 = vpow2.f32 %v1354_v8  ;;  %1357 = vadd.xlane.f32.xlu0 %v1356_v9  ;;  %v8243_v6 = vcvt.s32.f32 %v6601_v5 }
 0x263   : > { %v7712_v10 = vpop.eup %7711 }
 0x264   : > { %v1359_v12 = vsel %vm1031_vm2, %v7712_v10, 0.0 }
 0x265   : > { %1360 = vadd.xlane.f32.xlu1 %v1359_v12 }
 0x267   : > { %v7714_v13 = vpop.eup %7713 }
 0x268   : > { %v1362_v14 = vsel %vm1031_vm2, %v7714_v13, 0.0 }
 0x269   : > { %1363 = vadd.xlane.f32.xlu0 %v1362_v14 }
 0x26b   : > { %v7716_v15 = vpop.eup %7715 }
 0x26c   : > { %v1365_v16 = vsel %vm1031_vm2, %v7716_v15, 0.0 }
 0x26d   : > { %1366 = vadd.xlane.f32.xlu1 %v1365_v16 }
 0x27e   : > { %1729 = vperm.xlu1 %7708, %v1715_v36  }
 0x27f   : > { %1725 = vperm.xlu0 %7707, %v1711_v31  }
 0x282   : > { %1733 = vperm.xlu1 %7708, %v1719_v38  }
 0x286   : > { %1737 = vperm.xlu1 %7708, %v1723_v40  }
 0x2ee   : > { %v1358_v42 = vpop.xlane.xlu0 %1357 }
 0x2ef   : > { %7717 = vrcp.f32 %v1358_v42 }
 0x2f2   : > { %v1361_v43 = vpop.xlane.xlu1 %1360 }
 0x2f3   : > { %7719 = vrcp.f32 %v1361_v43 }
 0x2f6   : > { %v1364_v44 = vpop.xlane.xlu0 %1363 }
 0x2f7   : > { %7721 = vrcp.f32 %v1364_v44 }
 0x2f9   : > { %v7718_v45 = vpop.eup %7717 }
 0x2fa   : > { %v1372_v47 = vmul.f32 %v7718_v45, %v7710_v7  ;;  %v1367_v48 = vpop.xlane.xlu1 %1366 }
 0x2fb   : > { %7723 = vrcp.f32 %v1367_v48 }
 0x2fc   : > { %v1376_v49 = vmul.f32 %v8152_v33, %v1372_v47 }
 0x2fd   : > { %v7720_v51 = vpop.eup %7719 }
 0x2fe   : > { %v1373_v53 = vmul.f32 %v7720_v51, %v7712_v10  ;;  %7070 = vmatmul.mubr.msk.f32.vlgmr.msra.gmra.mrb[14].mxu0 %vm1031_vm2, %v1376_v49  ;;  %v1726_v38 = vpop.permute.xlu0 %1725  ;;  %v1730_v43 = vpop.permute.xlu1 %1729 }
 0x2ff   : > { %7078 = vmatpush3.msk.msra.mxu0 %vm8183_vm4, %v7884_v22  ;;  %7079 = vmatprep.mubr.msk.f32.mxu0 %vm7881_vm0, %v7882_v11 }
 0x300   : > { %v1377_v55 = vmul.f32 %v8152_v33, %v1373_v53  ;;  %7087 = vmatprep.subr.mxu0 %v7882_v11 }
 0x301   : > { %v7722_v57 = vpop.eup %7721 }
 0x302   : > { %v1374_v59 = vmul.f32 %v7722_v57, %v7714_v13  ;;  %7075 = vmatmul.mubr.msk.f32.vlgmr.msra.gmra.mrb[10].mxu1 %vm1031_vm2, %v1377_v55  ;;  %v1734_v58 = vpop.permute.xlu1 %1733 }
 0x303   : > { %7083 = vmatpush3.msk.msra.mxu1 %vm8183_vm4, %v7884_v22  ;;  %7084 = vmatprep.mubr.msk.f32.mxu1 %vm7881_vm0, %v7882_v11 }
 0x304   : > { %v1378_v61 = vmul.f32 %v8152_v33, %v1374_v59  ;;  %7092 = vmatprep.subr.mxu1 %v7882_v11 }
 0x305   : > { %v7724_v62 = vpop.eup %7723 }
 0x306   : > { %v1375_v0 = vmul.f32 %v7724_v62, %v7716_v15  ;;  %7080 = vmatmul.mubr.msk.f32.vlgmr.msra.gmra.mrb[16].mxu0 %vm1031_vm2, %v1378_v61 }
 0x307   : > { %7088 = vmatpush3.msra.mxu0 %v818_v20  ;;  %7089 = vmatprep.mubr.msk.f32.mxu0 %vm7881_vm0, %v7882_v11 }
 0x308   : > { %v1379_v1 = vmul.f32 %v8152_v33, %v1375_v0  ;;  %7097 = vmatprep.subr.mxu0 %v7882_v11 }
 0x30a   : > { %7085 = vmatmul.mubr.msk.f32.vlgmr.msra.gmra.mrb[12].mxu1 %vm1031_vm2, %v1379_v1 }
 0x30b   : > { %7093 = vmatpush3.msra.mxu1 %v888_v2  ;;  %7094 = vmatprep.mubr.msk.f32.mxu1 %vm7881_vm0, %v7882_v11 }
 0x30c   : > { %7102 = vmatprep.subr.mxu1 %v7882_v11 }
 0x3d1   : > { %v1449_v7 = vpop.f32.mrb[14].mxu0 }
 0x3d2   : > { %v1672_v8 = vmul.f32 %v1449_v7, %v8243_v6  ;;  %v7071_v9 = vpop.f32.mrb[15].mxu0  ;;  %v1738_v7 = vpop.permute.xlu1 %1737 }
 0x3d4   : > { %v1676_v24 = vmax.f32 %v1672_v8, 0.0 }
 0x3d5   : > { %v1522_v10 = vpop.f32.mrb[10].mxu1 }
 0x3d6   : > { %7725 = vrsqrt.f32 %v1676_v24  ;;  %v1673_v12 = vmul.f32 %v1522_v10, %v8243_v6  ;;  %v7076_v13 = vpop.f32.mrb[11].mxu1  ;;  %vm1682_vm5 = vcmp.eq.f32.partialorder %v1676_v24, inf  ;;  %v1685_v39 = vand.u32 2147483648, %v1676_v24 }
 0x3d7   : > { %vm1684_vm6 = vcmp.eq.f32.partialorder %v1676_v24, 0.0 }
 0x3d8   : > { %v1677_v14 = vmax.f32 %v1673_v12, 0.0 }
 0x3d9   : > { %v1595_v15 = vpop.f32.mrb[16].mxu0 }
 0x3da   : > { %7727 = vrsqrt.f32 %v1677_v14  ;;  %v1674_v16 = vmul.f32 %v1595_v15, %v8243_v6  ;;  %v7081_v23 = vpop.f32.mrb[17].mxu0  ;;  %vm1689_vm7 = vcmp.eq.f32.partialorder %v1677_v14, inf  ;;  %v1692_v48 = vand.u32 2147483648, %v1677_v14 }
 0x3db   : > { %vm1691_vm8 = vcmp.eq.f32.partialorder %v1677_v14, 0.0 }
 0x3dc   : > { %v1678_v25 = vmax.f32 %v1674_v16, 0.0 }
 0x3dd   : > { %v1668_v26 = vpop.f32.mrb[12].mxu1 }
 0x3de   : > { %7729 = vrsqrt.f32 %v1678_v25  ;;  %v1675_v27 = vmul.f32 %v1668_v26, %v8243_v6  ;;  %v7086_v29 = vpop.f32.mrb[13].mxu1  ;;  %vm1696_vm9 = vcmp.eq.f32.partialorder %v1678_v25, inf  ;;  %v1699_v59 = vand.u32 2147483648, %v1678_v25 }
 0x3df   : > { %vm1698_vm10 = vcmp.eq.f32.partialorder %v1678_v25, 0.0 }
 0x3e0   : > { %v7726_v31 = vpop.eup %7725  ;;  %v1679_v34 = vmax.f32 %v1675_v27, 0.0 }
 0x3e1   : > { %v1681_v36 = vmul.f32 %v7726_v31, %v1676_v24 }
 0x3e2   : > { %7731 = vrsqrt.f32 %v1679_v34  ;;  %vm1703_vm11 = vcmp.eq.f32.partialorder %v1679_v34, inf  ;;  %v1706_v2 = vand.u32 2147483648, %v1679_v34  ;;  %vm1705_vm12 = vcmp.eq.f32.partialorder %v1679_v34, 0.0 }
 0x3e3   : > { %v1683_v40 = vsel %vm1682_vm5, %v1676_v24, %v1681_v36 }
 0x3e4   : > { %v7728_v42 = vpop.eup %7727  ;;  %v1686_v44 = vsel %vm1684_vm6, %v1685_v39, %v1683_v40 }
 0x3e5   : > { %v1688_v45 = vmul.f32 %v7728_v42, %v1677_v14  ;;  %v1740_v47 = vmul.f32 %v1726_v38, %v1686_v44 }
 0x3e7   : > { %v1690_v49 = vsel %vm1689_vm7, %v1677_v14, %v1688_v45  ;;  %v1744_v51 = vmul.f32 1.442695, %v1740_v47 }
 0x3e8   : > { %v7730_v52 = vpop.eup %7729  ;;  %v1693_v53 = vsel %vm1691_vm8, %v1692_v48, %v1690_v49 }
 0x3e9   : > { %v1741_v55 = vmul.f32 %v1730_v43, %v1693_v53  ;;  %7733 = vpow2.f32 %v1744_v51  ;;  %v1695_v57 = vmul.f32 %v7730_v52, %v1678_v25 }
 0x3eb   : > { %v1746_v61 = vmul.f32 1.442695, %v1741_v55  ;;  %v1697_v62 = vsel %vm1696_vm9, %v1678_v25, %v1695_v57 }
 0x3ec   : > { %v7732_v20 = vpop.eup %7731  ;;  %v1700_v63 = vsel %vm1698_vm10, %v1699_v59, %v1697_v62  ;;  %vm307_vm10 = vcmp.lt.s32.totalorder %v8147_v32, %v8090_v54 }
 0x3ed   : > { %7735 = vpow2.f32 %v1746_v61  ;;  %v1742_v0 = vmul.f32 %v1734_v58, %v1700_v63  ;;  %v1702_v1 = vmul.f32 %v7732_v20, %v1679_v34 }
 0x3ef   : > { %v1748_v21 = vmul.f32 1.442695, %v1742_v0  ;;  %v1704_v4 = vsel %vm1703_vm11, %v1679_v34, %v1702_v1 }
 0x3f0   : > { %v1707_v5 = vsel %vm1705_vm12, %v1706_v2, %v1704_v4 }
 0x3f1   : > { %7737 = vpow2.f32 %v1748_v21  ;;  %v1743_v8 = vmul.f32 %v1738_v7, %v1707_v5  ;;  %v400_v21 = vcombine.high %v8218_v19, %v8218_v19 }
 0x3f3   : > { %v7734_v9 = vpop.eup %7733  ;;  %v1750_v24 = vmul.f32 1.442695, %v1743_v8  ;;  %v746_v8 = vrot.slane %v400_v21, %v8100_v60 }
 0x3f4   : > { %v1752_v10 = vmax.f32 %v7734_v9, 1e-05 }
 0x3f5   : > { %7739 = vpow2.f32 %v1750_v24  ;;  %v1028_v19 = vadd.f32 %v8145_v30, %v746_v8  ;;  %v2336_v8 = vld [vmem:[%s9182_s3 + $0x1b0] sm:$0xff] }
 0x3f6   : > { %v1756_v12 = vmin.f32 %v1752_v10, 100000.0 }
 0x3f7   : > { %v7736_v13 = vpop.eup %7735 }
 0x3f8   : > { %v1753_v14 = vmax.f32 %v7736_v13, 1e-05  ;;  %v1760_v15 = vmul.f32 %v1756_v12, %v8157_v37 }
 0x3fa   : > { %v1764_v16 = vsel %vm1031_vm2, %v1760_v15, -inf  ;;  %v1757_v23 = vmin.f32 %v1753_v14, 100000.0 }
 0x3fb   : > { %v7738_v25 = vpop.eup %7737  ;;  %1765 = vmax.xlane.f32.xlu1 %v1764_v16 }
 0x3fc   : > { %v1754_v26 = vmax.f32 %v7738_v25, 1e-05  ;;  %v1761_v27 = vmul.f32 %v1757_v23, %v8161_v41 }
 0x3fe   : > { %v1767_v29 = vsel %vm1031_vm2, %v1761_v27, -inf  ;;  %v1758_v31 = vmin.f32 %v1754_v26, 100000.0 }
 0x3ff   : > { %v7740_v34 = vpop.eup %7739  ;;  %1768 = vmax.xlane.f32.xlu0 %v1767_v29 }
 0x400   : > { %v1755_v36 = vmax.f32 %v7740_v34, 1e-05  ;;  %v1762_v38 = vmul.f32 %v1758_v31, %v8166_v46 }
 0x402   : > { %v1770_v39 = vsel %vm1031_vm2, %v1762_v38, -inf  ;;  %v1759_v40 = vmin.f32 %v1755_v36, 100000.0 }
 0x403   : > { %1771 = vmax.xlane.f32.xlu1 %v1770_v39  ;;  %v6637_v39 = vld [vmem:[%s9182_s3 + $0x118] ss:$0 sm:$0xff] }
 0x404   : > { %v1763_v37 = vmul.f32 %v1759_v40, %v8169_v50 }
 0x406   : > { %v1773_v42 = vsel %vm1031_vm2, %v1763_v37, -inf }
 0x407   : > { %1774 = vmax.xlane.f32.xlu1 %v1773_v42 }
 0x488   : > { %v1766_v43 = vpop.xlane.xlu1 %1765 }
 0x489   : > { %v1776_v44 = vsub.f32 %v1760_v15, %v1766_v43 }
 0x48b   : > { %v1780_v41 = vmul.f32 1.442695, %v1776_v44 }
 0x48c   : > { %v1769_v45 = vpop.xlane.xlu0 %1768 }
 0x48d   : > { %7741 = vpow2.f32 %v1780_v41  ;;  %v1777_v47 = vsub.f32 %v1761_v27, %v1769_v45 }
 0x48f   : > { %v1782_v48 = vmul.f32 1.442695, %v1777_v47 }
 0x490   : > { %v1772_v49 = vpop.xlane.xlu1 %1771 }
 0x491   : > { %7743 = vpow2.f32 %v1782_v48  ;;  %v1778_v51 = vsub.f32 %v1762_v38, %v1772_v49 }
 0x493   : > { %v1784_v46 = vmul.f32 1.442695, %v1778_v51  ;;  %v2140_v51 = vld [vmem:[%s9182_s3 + $0x130] sm:$0xff] }
 0x494   : > { %v1775_v52 = vpop.xlane.xlu1 %1774 }
 0x495   : > { %7745 = vpow2.f32 %v1784_v46  ;;  %v1779_v53 = vsub.f32 %v1763_v37, %v1775_v52  ;;  %v2141_v46 = vld [vmem:[%s9182_s3 + $0x138] sm:$0xff] }
 0x496   : > { %v7534_v52 = vpack.c.bf16 %v2141_v46, %v2140_v51  ;;  %v2391_v51 = vld [vmem:[%s9182_s3 + $0x2a0] sm:$0xff] }
 0x497   : > { %v7742_v55 = vpop.eup %7741  ;;  %v1786_v57 = vmul.f32 1.442695, %v1779_v53  ;;  %v2143_v53 = vld [vmem:[%s9182_s3 + $0x148] sm:$0xff] }
 0x498   : > { %v1788_v50 = vsel %vm1031_vm2, %v7742_v55, 0.0 }
 0x499   : > { %7747 = vpow2.f32 %v1786_v57  ;;  %1789 = vadd.xlane.f32.xlu1 %v1788_v50  ;;  %v2223_v57 = vld [vmem:[%s9182_s3 + $0x158] sm:$0xff]  ;;  %v2224_v50 = vld [vmem:[%s9182_s3 + $0x160] sm:$0xff] }
 0x49b   : > { %v7744_v58 = vpop.eup %7743 }
 0x49c   : > { %v1791_v59 = vsel %vm1031_vm2, %v7744_v58, 0.0 }
 0x49d   : > { %1792 = vadd.xlane.f32.xlu1 %v1791_v59  ;;  %v7540_v59 = vpack.c.bf16 %v2224_v50, %v2223_v57 }
 0x49f   : > { %v7746_v61 = vpop.eup %7745 }
 0x4a0   : > { %v1794_v62 = vsel %vm1031_vm2, %v7746_v61, 0.0 }
 0x4a1   : > { %1795 = vadd.xlane.f32.xlu0 %v1794_v62 }
 0x4a3   : > { %v7748_v20 = vpop.eup %7747 }
 0x4a4   : > { %v1797_v63 = vsel %vm1031_vm2, %v7748_v20, 0.0 }
 0x4a5   : > { %1798 = vadd.xlane.f32.xlu1 %v1797_v63  ;;  %v2228_v63 = vld [vmem:[%s9182_s3 + $0x180] sm:$0xff] }
 0x526   : > { %v1790_v0 = vpop.xlane.xlu1 %1789 }
 0x527   : > { %7749 = vrcp.f32 %v1790_v0 }
 0x52a   : > { %v1793_v1 = vpop.xlane.xlu1 %1792 }
 0x52b   : > { %7751 = vrcp.f32 %v1793_v1 }
 0x52e   : > { %v1796_v2 = vpop.xlane.xlu0 %1795 }
 0x52f   : > { %7753 = vrcp.f32 %v1796_v2 }
 0x531   : > { %v7750_v4 = vpop.eup %7749 }
 0x532   : > { %v1804_v5 = vmul.f32 %v7750_v4, %v7742_v55  ;;  %v1799_v7 = vpop.xlane.xlu1 %1798 }
 0x533   : > { %7755 = vrcp.f32 %v1799_v7 }
 0x534   : > { %7090 = vmatmul.mubr.msk.f32.vlgmr.msra.gmra.mrb[18].mxu0 %vm1031_vm2, %v1804_v5  ;;  %v6638_v5 = vld [vmem:[%s9182_s3 + $0x120] ss:$0 sm:$0xff] }
 0x535   : > { %v7752_v9 = vpop.eup %7751  ;;  %7098 = vmatpush3.msra.mxu0 %v8143_v28  ;;  %7099 = vmatprep.mubr.msk.f32.mxu0 %vm7881_vm0, %v7882_v11 }
 0x536   : > { %v1805_v24 = vmul.f32 %v7752_v9, %v7744_v58  ;;  %7533 = vmatprep.subr.bf16.mxu0 %v7880_v3  ;;  %v2225_v58 = vld [vmem:[%s9182_s3 + $0x168] sm:$0xff]  ;;  %v2337_v9 = vld [vmem:[%s9182_s3 + $0x1b8] sm:$0xff] }
 0x538   : > { %7095 = vmatmul.mubr.msk.f32.vlgmr.msra.gmra.mrb[14].mxu1 %vm1031_vm2, %v1805_v24  ;;  %v6639_v24 = vld [vmem:[%s9182_s3 + $0x128] ss:$0 sm:$0xff] }
 0x539   : > { %v7754_v10 = vpop.eup %7753  ;;  %7103 = vmatpush3.msra.mxu1 %v1028_v19  ;;  %7104 = vmatprep.mubr.msk.f32.mxu1 %vm7881_vm0, %v7882_v11 }
 0x53a   : > { %v1806_v12 = vmul.f32 %v7754_v10, %v7746_v61  ;;  %7539 = vmatprep.subr.bf16.mxu1 %v7880_v3  ;;  %v2226_v61 = vld [vmem:[%s9182_s3 + $0x170] sm:$0xff]  ;;  %v7552_v10 = vpack.c.bf16 %v2337_v9, %v2336_v8  ;;  %v2386_v8 = vld [vmem:[%s9182_s3 + $0x278] sm:$0xff]  ;;  %v2387_v9 = vld [vmem:[%s9182_s3 + $0x280] sm:$0xff] }
 0x53b   : > { %v7543_v62 = vpack.c.bf16 %v2226_v61, %v2225_v58  ;;  %v2346_v61 = vld [vmem:[%s9182_s3 + $0x200] sm:$0xff] }
 0x53c   : > { %7100 = vmatmul.mubr.msk.f32.vlgmr.msra.gmra.mrb[20].mxu0 %vm1031_vm2, %v1806_v12 }
 0x53d   : > { %v7756_v28 = vpop.eup %7755  ;;  %7115 = vmatprep.mubr.msk.f32.mxu0 %vm7881_vm0, %v7882_v11  ;;  %7535 = vmatpush3.bf16.msra.mxu0 %v7534_v52  ;;  %v6640_v52 = vld [vmem:[%s9182_s3 + $0x150] ss:$0 sm:$0xff] }
 0x53e   : > { %v1807_v13 = vmul.f32 %v7756_v28, %v7748_v20  ;;  %7536 = vmatprep.subr.bf16.mxu0 %v7880_v3  ;;  %v2227_v20 = vld [vmem:[%s9182_s3 + $0x178] sm:$0xff]  ;;  %v2338_v28 = vld [vmem:[%s9182_s3 + $0x1c0] sm:$0xff] }
 0x53f   : > { %v7546_v0 = vpack.c.bf16 %v2228_v63, %v2227_v20  ;;  %v2378_v63 = vld [vmem:[%s9182_s3 + $0x238] sm:$0xff] }
 0x540   : > { %7105 = vmatmul.mubr.msk.f32.vlgmr.msra.gmra.mrb[16].mxu1 %vm1031_vm2, %v1807_v13  ;;  %v2339_v13 = vld [vmem:[%s9182_s3 + $0x1c8] sm:$0xff] }
 0x541   : > { %7134 = vmatprep.mubr.msk.f32.mxu1 %vm7881_vm0, %v7882_v11  ;;  %7541 = vmatpush3.bf16.msra.mxu1 %v7540_v59 }
 0x542   : > { %7542 = vmatprep.subr.bf16.mxu1 %v7880_v3 }
 0x545   : > { %7544 = vmatpush3.bf16.msra.mxu1 %v7543_v62  ;;  %v2347_v62 = vld [vmem:[%s9182_s3 + $0x208] sm:$0xff] }
 0x546   : > { %7545 = vmatprep.subr.bf16.mxu1 %v7880_v3  ;;  %v7567_v20 = vpack.c.bf16 %v2347_v62, %v2346_v61 }
 0x549   : > { %7547 = vmatpush3.bf16.msra.mxu1 %v7546_v0  ;;  %v2379_v0 = vld [vmem:[%s9182_s3 + $0x240] sm:$0xff] }
 0x54a   : > { %7548 = vmatprep.subr.bf16.mxu1 %v7880_v3 }
 0x607   : > { %v1877_v30 = vpop.f32.mrb[18].mxu0 }
 0x608   : > { %v7091_v14 = vpop.f32.mrb[19].mxu0  ;;  %v2100_v16 = vsel %vm447_vm1, %v1877_v30, 0.0  ;;  %v7555_v30 = vpack.c.bf16 %v2339_v13, %v2338_v28  ;;  %v2388_v28 = vld [vmem:[%s9182_s3 + $0x288] sm:$0xff]  ;;  %v2389_v13 = vld [vmem:[%s9182_s3 + $0x290] sm:$0xff] }
 0x609   : > { %v2340_v14 = vld [vmem:[%s9182_s3 + $0x1d0] sm:$0xff] }
 0x60b   : > { %v1950_v15 = vpop.f32.mrb[14].mxu1 }
 0x60c   : > { %v2101_v23 = vsel %vm447_vm1, %v1950_v15, 0.0  ;;  %v7096_v25 = vpop.f32.mrb[15].mxu1  ;;  %v2341_v15 = vld [vmem:[%s9182_s3 + $0x1d8] sm:$0xff] }
 0x60d   : > { %v2102_v26 = vadd.f32 %v2101_v23, %v2100_v16  ;;  %v8363_v16 = vld [vmem:[%s8354_s27] sm:$0xff]  ;;  %v7558_v23 = vpack.c.bf16 %v2341_v15, %v2340_v14  ;;  %v7591_v14 = vpack.c.bf16 %v2389_v13, %v2388_v28 }
 0x60e   : > { %v2342_v25 = vld [vmem:[%s9182_s3 + $0x1e0] sm:$0xff] }
 0x60f   : > { %v2023_v27 = vpop.f32.mrb[20].mxu0 }
 0x610   : > { %v2103_v29 = vsel %vm447_vm1, %v2023_v27, 0.0  ;;  %v7101_v31 = vpop.f32.mrb[21].mxu0 }
 0x611   : > { %v2104_v34 = vadd.f32 %v2103_v29, %v2102_v26  ;;  %v2343_v26 = vld [vmem:[%s9182_s3 + $0x1e8] sm:$0xff]  ;;  %v2348_v29 = vld [vmem:[%s9182_s3 + $0x210] sm:$0xff]  ;;  %v2349_v31 = vld [vmem:[%s9182_s3 + $0x218] sm:$0xff] }
 0x612   : > { %v7561_v27 = vpack.c.bf16 %v2343_v26, %v2342_v25 }
 0x613   : > { %v2096_v36 = vpop.f32.mrb[16].mxu1 }
 0x614   : > { %v2105_v38 = vsel %vm447_vm1, %v2096_v36, 0.0  ;;  %v7106_v40 = vpop.f32.mrb[17].mxu1  ;;  %v2350_v36 = vld [vmem:[%s9182_s3 + $0x220] sm:$0xff] }
 0x615   : > { %v2106_v37 = vadd.f32 %v2105_v38, %v2104_v34  ;;  %v7570_v34 = vpack.c.bf16 %v2349_v31, %v2348_v29  ;;  %v2351_v38 = vld [vmem:[%s9182_s3 + $0x228] sm:$0xff] }
 0x616   : > { %v2229_v40 = vld [vmem:[%s9182_s3 + $0x188] sm:$0xff] }
 0x617   : > { %v2112_v42 = vadd.f32 %v6637_v39, %v2106_v37  ;;  %v7573_v39 = vpack.c.bf16 %v2351_v38, %v2350_v36  ;;  %v2230_v37 = vld [vmem:[%s9182_s3 + $0x190] sm:$0xff] }
 0x619   : > { %v2113_v43 = vadd.f32 %v2112_v42, %v7982_v18  ;;  %v2142_v18 = vld [vmem:[%s9182_s3 + $0x140] sm:$0xff]  ;;  %v7549_v42 = vpack.c.bf16 %v2230_v37, %v2229_v40  ;;  %v2392_v37 = vld [vmem:[%s9182_s3 + $0x2a8] sm:$0xff] }
 0x61a   : > { %v7537_v55 = vpack.c.bf16 %v2143_v53, %v2142_v18  ;;  %v2344_v18 = vld [vmem:[%s9182_s3 + $0x1f0] sm:$0xff]  ;;  %v2345_v53 = vld [vmem:[%s9182_s3 + $0x1f8] sm:$0xff] }
 0x61b   : > { %v2116_v44 = vsel %vm447_vm1, %v2113_v43, 0.0  ;;  %7550 = vmatpush3.bf16.msra.mxu1 %v7549_v42  ;;  %v7564_v58 = vpack.c.bf16 %v2345_v53, %v2344_v18  ;;  %v2393_v42 = vld [vmem:[%s9182_s3 + $0x2b0] sm:$0xff] }
 0x61c   : > { %2117 = vadd.xlane.f32.xlu0 %v2116_v44  ;;  %7538 = vmatpush3.bf16.msra.mxu0 %v7537_v55  ;;  %v2383_v44 = vld [vmem:[%s9182_s3 + $0x260] sm:$0xff] }
 0x61d   : > { %7551 = vmatprep.subr.bf16.mxu0 %v7880_v3  ;;  %7563 = vmatprep.subr.bf16.mxu1 %v7880_v3 }
 0x6a9   : > { %v2118_v41 = vpop.xlane.xlu0 %2117 }
 0x6aa   : > { %v2120_v45 = vmul.f32 0.03125, %v2118_v41  ;;  %v2384_v41 = vld [vmem:[%s9182_s3 + $0x268] sm:$0xff] }
 0x6ac   : > { %v2121_v47 = vsub.f32 %v2113_v43, %v2120_v45  ;;  %v2382_v43 = vld [vmem:[%s9182_s3 + $0x258] sm:$0xff] }
 0x6ad   : > { %v7582_v45 = vpack.c.bf16 %v2383_v44, %v2382_v43  ;;  %v7597_v43 = vpack.c.bf16 %v2393_v42, %v2392_v37 }
 0x6ae   : > { %v2122_v48 = vmul.f32 %v2121_v47, %v2121_v47 }
 0x6b0   : > { %v2123_v49 = vsel %vm447_vm1, %v2122_v48, 0.0 }
 0x6b1   : > { %2124 = vadd.xlane.f32.xlu1 %v2123_v49  ;;  %v2390_v49 = vld [vmem:[%s9182_s3 + $0x298] sm:$0xff] }
 0x6b2   : > { %v7594_v46 = vpack.c.bf16 %v2391_v51, %v2390_v49 }
 0x73e   : > { %v2125_v1 = vpop.xlane.xlu1 %2124 }
 0x73f   : > { %v2126_v2 = vmul.f32 0.03125, %v2125_v1 }
 0x741   : > { %v2127_v21 = vadd.f32 1e-05, %v2126_v2 }
 0x743   : > { %7757 = vrsqrt.f32 %v2127_v21  ;;  %v7576_v21 = vpack.c.bf16 %v2379_v0, %v2378_v63 }
 0x74d   : > { %v7758_v4 = vpop.eup %7757 }
 0x74e   : > { %v2129_v7 = vmul.f32 %v7758_v4, %v2121_v47  ;;  %v2385_v47 = vld [vmem:[%s9182_s3 + $0x270] sm:$0xff]  ;;  %v2380_v4 = vld [vmem:[%s9182_s3 + $0x248] sm:$0xff] }
 0x74f   : > { %v7585_v48 = vpack.c.bf16 %v2385_v47, %v2384_v41 }
 0x750   : > { %v2134_v19 = vmul.f32 %v6638_v5, %v2129_v7  ;;  %v2381_v5 = vld [vmem:[%s9182_s3 + $0x250] sm:$0xff] }
 0x751   : > { %v7579_v7 = vpack.c.bf16 %v2381_v5, %v2380_v4 }
 0x752   : > { %v8337_v12 = vadd.f32 %v6639_v24, %v2134_v19 }
 0x754   : > { %7116 = vmatmul.mubr.msk.f32.vlgmr.msra.gmra.mrb[22].mxu0 %vm447_vm1, %v8337_v12 }
 0x755   : > { %7553 = vmatpush3.bf16.msra.mxu0 %v7552_v10  ;;  %7145 = vmatprep.mubr.msk.f32.mxu0 %vm7881_vm0, %v7882_v11  ;;  %v7588_v10 = vpack.c.bf16 %v2387_v9, %v2386_v8 }
 0x756   : > { %7554 = vmatprep.subr.bf16.mxu0 %v7880_v3 }
 0x759   : > { %7556 = vmatpush3.bf16.msra.mxu0 %v7555_v30  ;;  %v6646_v30 = vld.sshfl [vmem:[%s9182_s3 + $0x230] sm:$0x33 pattern:$0x75316420] }
 0x75a   : > { %7557 = vmatprep.subr.bf16.mxu0 %v7880_v3  ;;  %v2368_v15 = vrot.slane %v6646_v30, %v8093_v56 }
 0x75c   : > { %7146 = vmatmul.mubr.msk.f32.vlgmr.msra.gmra.mrb[24].mxu0 %vm447_vm1, %v8363_v16 }
 0x75d   : > { %7559 = vmatpush3.bf16.msra.mxu0 %v7558_v23  ;;  %7156 = vmatprep.mubr.msk.f32.mxu0 %vm7881_vm0, %v7882_v11  ;;  %v2361_v23 = vcombine.high %v6646_v30, %v6646_v30 }
 0x75e   : > { %7560 = vmatprep.subr.bf16.mxu0 %v7880_v3 }
 0x75f   : > { %v2375_v29 = vrot.slane %v2361_v23, %v8093_v56 }
 0x761   : > { %7562 = vmatpush3.bf16.msra.mxu0 %v7561_v27  ;;  %v2449_v27 = vrot.slane %v2368_v15, %v8100_v60  ;;  %v2377_v36 = vcombine.high %v2375_v29, %v2375_v29 }
 0x762   : > { %7569 = vmatprep.subr.bf16.mxu0 %v7880_v3 }
 0x764   : > { %7157 = vmatmul.mubr.msk.f32.vlgmr.msra.gmra.mrb[26].mxu0 %vm447_vm1, %v8363_v16 }
 0x765   : > { %7571 = vmatpush3.bf16.msra.mxu0 %v7570_v34  ;;  %7178 = vmatprep.mubr.msk.f32.mxu0 %vm7881_vm0, %v7882_v11  ;;  %v2453_v34 = vrot.slane %v2375_v29, %v8100_v60 }
 0x766   : > { %7572 = vmatprep.subr.bf16.mxu0 %v7880_v3 }
 0x769   : > { %7574 = vmatpush3.bf16.msra.mxu0 %v7573_v39  ;;  %v2461_v39 = vrot.slane %v2377_v36, %v8100_v60 }
 0x76a   : > { %7581 = vmatprep.subr.bf16.mxu0 %v7880_v3 }
 0x76c   : > { %7179 = vmatmul.mubr.msk.f32.vlgmr.msra.gmra.mrb[28].mxu0 %vm447_vm1, %v8363_v16 }
 0x76d   : > { %7200 = vmatprep.mubr.msk.f32.mxu0 %vm7881_vm0, %v7882_v11  ;;  %7583 = vmatpush3.bf16.msra.mxu0 %v7582_v45  ;;  %v2376_v45 = vcombine.high %v2368_v15, %v2368_v15 }
 0x76e   : > { %7584 = vmatprep.subr.bf16.mxu0 %v7880_v3 }
 0x76f   : > { %v2457_v47 = vrot.slane %v2376_v45, %v8100_v60 }
 0x771   : > { %7586 = vmatpush3.bf16.msra.mxu0 %v7585_v48 }
 0x772   : > { %7593 = vmatprep.subr.bf16.mxu0 %v7880_v3 }
 0x774   : > { %7201 = vmatmul.mubr.msk.f32.vlgmr.msra.gmra.mrb[30].mxu0 %vm447_vm1, %v8363_v16 }
 0x775   : > { %7595 = vmatpush3.bf16.msra.mxu0 %v7594_v46  ;;  %7222 = vmatprep.mubr.msk.f32.mxu0 %vm7881_vm0, %v7882_v11  ;;  %v6647_v46 = vld.sshfl [vmem:[%s9182_s3 + $0x2b8] sm:$0x33 pattern:$0x75316420] }
 0x776   : > { %7596 = vmatprep.subr.bf16.mxu0 %v7880_v3 }
 0x779   : > { %7598 = vmatpush3.bf16.msra.mxu0 %v7597_v43  ;;  %v6648_v43 = vld.sshfl [vmem:[%s9182_s3 + $0x2c0] sm:$0x33 pattern:$0x75316420] }
 0x77a   : > { %7235 = vmatprep.subr.mxu0 %v7882_v11  ;;  %v2429_v45 = vcombine.high %v6648_v43, %v6648_v43 }
 0x77c   : > { %7223 = vmatmul.mubr.msk.f32.vlgmr.msra.gmra.mrb[32].mxu0 %vm447_vm1, %v8363_v16 }
 0x77d   : > { %7237 = vmatprep.mubr.msk.f32.mxu0 %vm7881_vm0, %v7882_v11 }
 0x827   : > { %v2218_v55 = vpop.f32.mrb[22].mxu0 }
 0x828   : > { %v2219_v57 = vadd.f32 %v6640_v52, %v2218_v55  ;;  %v7117_v50 = vpop.f32.mrb[23].mxu0  ;;  %v8540_v52 = vrot.slane %v6647_v46, %v8093_v56 }
 0x82a   : > { %v2222_v59 = vmax.f32 %v2219_v57, 0.0  ;;  %v2418_v55 = vcombine.high %v8540_v52, %v8540_v52 }
 0x82c   : > { %7135 = vmatmul.mubr.msk.f32.vlgmr.msra.gmra.mrb[18].mxu1 %vm2236_vm13, %v2222_v59  ;;  %v2760_v57 = vrot.slane %v2418_v55, %v8100_v60 }
 0x82d   : > { %7565 = vmatpush3.bf16.msra.mxu1 %v7564_v58  ;;  %7167 = vmatprep.mubr.msk.f32.mxu1 %vm7881_vm0, %v7882_v11 }
 0x82e   : > { %7566 = vmatprep.subr.bf16.mxu1 %v7880_v3 }
 0x82f   : > { %v2535_v1 = vpop.f32.mrb[24].mxu0 }
 0x830   : > { %v7147_v2 = vpop.f32.mrb[25].mxu0  ;;  %v2536_v31 = vadd.f32 %v2535_v1, %v2449_v27 }
 0x831   : > { %7568 = vmatpush3.bf16.msra.mxu1 %v7567_v20 }
 0x832   : > { %7575 = vmatprep.subr.bf16.mxu1 %v7880_v3 }
 0x834   : > { %7168 = vmatmul.mubr.msk.f32.vlgmr.msra.gmra.mrb[20].mxu1 %vm447_vm1, %v8363_v16 }
 0x835   : > { %7577 = vmatpush3.bf16.msra.mxu1 %v7576_v21  ;;  %7189 = vmatprep.mubr.msk.f32.mxu1 %vm7881_vm0, %v7882_v11 }
 0x836   : > { %7578 = vmatprep.subr.bf16.mxu1 %v7880_v3 }
 0x837   : > { %v2605_v24 = vpop.f32.mrb[26].mxu0 }
 0x838   : > { %v7158_v19 = vpop.f32.mrb[27].mxu0  ;;  %v2606_v38 = vadd.f32 %v2605_v24, %v2453_v34 }
 0x839   : > { %7580 = vmatpush3.bf16.msra.mxu1 %v7579_v7 }
 0x83a   : > { %7587 = vmatprep.subr.bf16.mxu1 %v7880_v3 }
 0x83c   : > { %7190 = vmatmul.mubr.msk.f32.vlgmr.msra.gmra.mrb[22].mxu1 %vm447_vm1, %v8363_v16 }
 0x83d   : > { %7589 = vmatpush3.bf16.msra.mxu1 %v7588_v10  ;;  %7211 = vmatprep.mubr.msk.f32.mxu1 %vm7881_vm0, %v7882_v11  ;;  %v2403_v10 = vcombine.high %v6647_v46, %v6647_v46 }
 0x83e   : > { %7590 = vmatprep.subr.bf16.mxu1 %v7880_v3 }
 0x83f   : > { %v2745_v25 = vpop.f32.mrb[28].mxu0  ;;  %v2417_v30 = vrot.slane %v2403_v10, %v8093_v56 }
 0x840   : > { %v7180_v26 = vpop.f32.mrb[29].mxu0  ;;  %v2746_v40 = vadd.f32 %v2745_v25, %v2461_v39 }
 0x841   : > { %7592 = vmatpush3.bf16.msra.mxu1 %v7591_v14  ;;  %v2419_v14 = vcombine.high %v2417_v30, %v2417_v30 }
 0x842   : > { %7225 = vmatprep.subr.mxu1 %v7882_v11 }
 0x843   : > { %v2764_v15 = vrot.slane %v2419_v14, %v8100_v60 }
 0x844   : > { %7212 = vmatmul.mubr.msk.f32.vlgmr.msra.gmra.mrb[24].mxu1 %vm447_vm1, %v8363_v16 }
 0x845   : > { %7227 = vmatprep.mubr.msk.f32.mxu1 %vm7881_vm0, %v7882_v11 }
 0x847   : > { %v2905_v28 = vpop.f32.mrb[30].mxu0 }
 0x848   : > { %v7202_v13 = vpop.f32.mrb[31].mxu0 }
 0x84a   : > { %7226 = vmatpush3.xpose.msk.msra.mxu1 %vm1031_vm2, %v2536_v31 }
 0x84b   : > { %7230 = vmatprep.subr.mxu1 %v7882_v11 }
 0x84d   : > { %7228 = vmatmul.mubr.msk.f32.vlgmr.msra.gmra.mrb[26].mxu1 %vm1031_vm2, %v2536_v31 }
 0x84e   : > { %7231 = vmatpush3.xpose.msk.msra.mxu1 %vm1031_vm2, %v2606_v38  ;;  %7232 = vmatprep.mubr.msk.f32.mxu1 %vm7881_vm0, %v7882_v11 }
 0x84f   : > { %7240 = vmatprep.subr.mxu1 %v7882_v11  ;;  %v3045_v23 = vpop.f32.mrb[32].mxu0 }
 0x850   : > { %v8572_v25 = vadd.f32 %v3045_v23, %v2764_v15  ;;  %v7224_v26 = vpop.f32.mrb[33].mxu0 }
 0x851   : > { %7233 = vmatmul.mubr.msk.f32.vlgmr.msra.gmra.mrb[28].mxu1 %vm1031_vm2, %v2606_v38 }
 0x852   : > { %7241 = vmatpush3.xpose.msk.msra.mxu1 %vm1031_vm2, %v2746_v40  ;;  %7242 = vmatprep.mubr.msk.f32.mxu1 %vm7881_vm0, %v7882_v11 }
 0x853   : > { %7250 = vmatprep.subr.mxu1 %v7882_v11 }
 0x855   : > { %7243 = vmatmul.mubr.msk.f32.vlgmr.msra.gmra.mrb[30].mxu1 %vm1031_vm2, %v2746_v40 }
 0x856   : > { %7251 = vmatpush3.msk.msra.mxu1 %vm8183_vm4, %v7884_v22  ;;  %7252 = vmatprep.mubr.msk.f32.mxu1 %vm7881_vm0, %v7882_v11 }
 0x857   : > { %7260 = vmatprep.subr.mxu1 %v7882_v11 }
 0x8ff   : > { %v8530_v44 = vpop.f32.mrb[18].mxu1 }
 0x900   : > { %v7136_v41 = vpop.f32.mrb[19].mxu1 }
 0x907   : > { %v2675_v48 = vpop.f32.mrb[20].mxu1 }
 0x908   : > { %v2676_v49 = vadd.f32 %v2675_v48, %v2457_v47  ;;  %v7169_v51 = vpop.f32.mrb[21].mxu1  ;;  %v2443_v48 = vrot.slane %v2429_v45, %v8093_v56 }
 0x90a   : > { %7236 = vmatpush3.xpose.msk.msra.mxu0 %vm1031_vm2, %v2676_v49  ;;  %v3732_v46 = vrot.slane %v2443_v48, %v8100_v60 }
 0x90b   : > { %7245 = vmatprep.subr.mxu0 %v7882_v11 }
 0x90d   : > { %7238 = vmatmul.mubr.msk.f32.vlgmr.msra.gmra.mrb[34].mxu0 %vm1031_vm2, %v2676_v49  ;;  %v2436_v49 = vrot.slane %v6648_v43, %v8093_v56 }
 0x90e   : > { %7246 = vmatpush3.msk.msra.mxu0 %vm8183_vm4, %v7884_v22  ;;  %7247 = vmatprep.mubr.msk.f32.mxu0 %vm7881_vm0, %v7882_v11 }
 0x90f   : > { %v8547_v18 = vpop.f32.mrb[22].mxu1  ;;  %7255 = vmatprep.subr.mxu0 %v7882_v11 }
 0x910   : > { %v7191_v53 = vpop.f32.mrb[23].mxu1 }
 0x911   : > { %v2444_v53 = vcombine.high %v2436_v49, %v2436_v49 }
 0x913   : > { %v3736_v55 = vrot.slane %v2444_v53, %v8100_v60 }
 0x917   : > { %v2975_v50 = vpop.f32.mrb[24].mxu1 }
 0x918   : > { %v8553_v58 = vadd.f32 %v2975_v50, %v2760_v57  ;;  %v7213_v59 = vpop.f32.mrb[25].mxu1 }
 0x920   : > { %v3118_v61 = vpop.f32.mrb[26].mxu1 }
 0x921   : > { %v8555_v62 = vmul.f32 0.35355338, %v3118_v61  ;;  %v7229_v20 = vpop.f32.mrb[27].mxu1 }
 0x923   : > { %v3345_v63 = vadd.f32 %v8555_v62, %v8155_v35 }
 0x924   : > { %v3191_v0 = vpop.f32.mrb[28].mxu1 }
 0x925   : > { %v8559_v1 = vmul.f32 0.35355338, %v3191_v0  ;;  %v7234_v2 = vpop.f32.mrb[29].mxu1  ;;  %v3349_v21 = vsel %vm1031_vm2, %v3345_v63, -inf }
 0x926   : > { %3350 = vmax.xlane.f32.xlu0 %v3349_v21 }
 0x927   : > { %v3346_v4 = vadd.f32 %v8559_v1, %v8155_v35 }
 0x928   : > { %v3337_v5 = vpop.f32.mrb[30].mxu1 }
 0x929   : > { %v8564_v7 = vmul.f32 0.35355338, %v3337_v5  ;;  %v3352_v8 = vsel %vm1031_vm2, %v3346_v4, -inf  ;;  %v7244_v9 = vpop.f32.mrb[31].mxu1 }
 0x92a   : > { %3353 = vmax.xlane.f32.xlu1 %v3352_v8 }
 0x92b   : > { %v3348_v24 = vadd.f32 %v8564_v7, %v8155_v35 }
 0x92d   : > { %v3358_v19 = vsel %vm1031_vm2, %v3348_v24, -inf }
 0x92e   : > { %3359 = vmax.xlane.f32.xlu1 %v3358_v19 }
 0x9b3   : > { %v3351_v41 = vpop.xlane.xlu0 %3350 }
 0x9b4   : > { %v3361_v47 = vsub.f32 %v3345_v63, %v3351_v41 }
 0x9b6   : > { %v3365_v51 = vmul.f32 1.442695, %v3361_v47 }
 0x9b7   : > { %v3354_v27 = vpop.xlane.xlu1 %3353 }
 0x9b8   : > { %v3362_v29 = vsub.f32 %v3346_v4, %v3354_v27 }
 0x9ba   : > { %v3367_v31 = vmul.f32 1.442695, %v3362_v29 }
 0x9bb   : > { %v3360_v34 = vpop.xlane.xlu1 %3359 }
 0x9bc   : > { %7759 = vpow2.f32 %v3367_v31  ;;  %v3364_v36 = vsub.f32 %v3348_v24, %v3360_v34  ;;  %v2756_v24 = vrot.slane %v2417_v30, %v8100_v60  ;;  %v3728_v31 = vrot.slane %v2436_v49, %v8100_v60 }
 0x9bd   : > { %v2445_v34 = vcombine.high %v2443_v48, %v2443_v48 }
 0x9be   : > { %v3371_v38 = vmul.f32 1.442695, %v3364_v36  ;;  %v2906_v10 = vadd.f32 %v2905_v28, %v2756_v24 }
 0x9bf   : > { %v3740_v36 = vrot.slane %v2445_v34, %v8100_v60 }
 0x9c0   : > { %7761 = vpow2.f32 %v3371_v38 }
 0x9c1   : > { %7763 = vpow2.f32 %v3365_v51 }
 0x9c6   : > { %v7760_v39 = vpop.eup %7759 }
 0x9c7   : > { %v3376_v40 = vsel %vm1031_vm2, %v7760_v39, 0.0 }
 0x9c8   : > { %3377 = vadd.xlane.f32.xlu1 %v3376_v40  ;;  %v2752_v40 = vrot.slane %v8540_v52, %v8100_v60 }
 0x9ca   : > { %v7762_v37 = vpop.eup %7761  ;;  %v2836_v43 = vadd.f32 %v8547_v18, %v2752_v40 }
 0x9cb   : > { %v3382_v42 = vsel %vm1031_vm2, %v7762_v37, 0.0  ;;  %v7764_v63 = vpop.eup %7763 }
 0x9cc   : > { %3383 = vadd.xlane.f32.xlu1 %v3382_v42  ;;  %v3373_v0 = vsel %vm1031_vm2, %v7764_v63, 0.0 }
 0x9dd   : > { %3746 = vperm.xlu1 %7708, %v3732_v46  }
 0x9e0   : > { %v3264_v57 = vpop.f32.mrb[34].mxu0 }
 0x9e1   : > { %v8583_v50 = vmul.f32 0.35355338, %v3264_v57  ;;  %3750 = vperm.xlu1 %7708, %v3736_v55   ;;  %v7239_v59 = vpop.f32.mrb[35].mxu0 }
 0x9e3   : > { %v3347_v61 = vadd.f32 %v8583_v50, %v8155_v35 }
 0x9e5   : > { %v3355_v20 = vsel %vm1031_vm2, %v3347_v61, -inf }
 0x9e6   : > { %3356 = vmax.xlane.f32.xlu0 %v3355_v20 }
 0x9ea   : > { %3374 = vadd.xlane.f32.xlu0 %v3373_v0 }
 0xa55   : > { %v3378_v2 = vpop.xlane.xlu1 %3377 }
 0xa56   : > { %7765 = vrcp.f32 %v3378_v2 }
 0xa59   : > { %v3384_v21 = vpop.xlane.xlu1 %3383 }
 0xa5a   : > { %7767 = vrcp.f32 %v3384_v21 }
 0xa5d   : > { %v3747_v55 = vpop.permute.xlu1 %3746 }
 0xa60   : > { %v7766_v4 = vpop.eup %7765 }
 0xa61   : > { %v3390_v5 = vmul.f32 %v7766_v4, %v7760_v39 }
 0xa63   : > { %v3394_v8 = vmul.f32 %v8152_v33, %v3390_v5 }
 0xa64   : > { %v7768_v9 = vpop.eup %7767 }
 0xa65   : > { %v3392_v19 = vmul.f32 %v7768_v9, %v7762_v37  ;;  %7253 = vmatmul.mubr.msk.f32.vlgmr.msra.gmra.mrb[32].mxu1 %vm1031_vm2, %v3394_v8 }
 0xa66   : > { %7261 = vmatpush3.msk.msra.mxu1 %vm8183_vm4, %v7884_v22  ;;  %7262 = vmatprep.mubr.msk.f32.mxu1 %vm7881_vm0, %v7882_v11 }
 0xa67   : > { %7270 = vmatprep.subr.mxu1 %v7882_v11  ;;  %v3396_v35 = vmul.f32 %v8152_v33, %v3392_v19 }
 0xa69   : > { %7263 = vmatmul.mubr.msk.f32.vlgmr.msra.gmra.mrb[34].mxu1 %vm1031_vm2, %v3396_v35 }
 0xa6a   : > { %7271 = vmatpush3.msra.mxu1 %v2906_v10  ;;  %7272 = vmatprep.mubr.msk.f32.mxu1 %vm7881_vm0, %v7882_v11 }
 0xa6b   : > { %7280 = vmatprep.subr.mxu1 %v7882_v11 }
 0xa73   : > { %v3357_v13 = vpop.xlane.xlu0 %3356 }
 0xa74   : > { %v3363_v30 = vsub.f32 %v3347_v61, %v3357_v13 }
 0xa76   : > { %v3369_v14 = vmul.f32 1.442695, %v3363_v30 }
 0xa77   : > { %v3375_v15 = vpop.xlane.xlu0 %3374 }
 0xa78   : > { %7769 = vpow2.f32 %v3369_v14 }
 0xa79   : > { %7771 = vrcp.f32 %v3375_v15 }
 0xa82   : > { %v7770_v23 = vpop.eup %7769 }
 0xa83   : > { %v7772_v26 = vpop.eup %7771  ;;  %v3379_v27 = vsel %vm1031_vm2, %v7770_v23, 0.0 }
 0xa84   : > { %v3389_v29 = vmul.f32 %v7772_v26, %v7764_v63  ;;  %3380 = vadd.xlane.f32.xlu0 %v3379_v27 }
 0xa86   : > { %v3393_v28 = vmul.f32 %v8152_v33, %v3389_v29 }
 0xa88   : > { %7248 = vmatmul.mubr.msk.f32.vlgmr.msra.gmra.mrb[36].mxu0 %vm1031_vm2, %v3393_v28 }
 0xa89   : > { %7256 = vmatpush3.msk.msra.mxu0 %vm8183_vm4, %v7884_v22  ;;  %7257 = vmatprep.mubr.msk.f32.mxu0 %vm7881_vm0, %v7882_v11 }
 0xa8a   : > { %7265 = vmatprep.subr.mxu0 %v7882_v11 }
 0xa9a   : > { %3742 = vperm.xlu0 %7707, %v3728_v31  }
 0xa9e   : > { %3754 = vperm.xlu0 %7707, %v3740_v36  }
 0xb11   : > { %v3381_v38 = vpop.xlane.xlu0 %3380 }
 0xb12   : > { %7773 = vrcp.f32 %v3381_v38 }
 0xb19   : > { %v3743_v35 = vpop.permute.xlu0 %3742 }
 0xb1c   : > { %v7774_v39 = vpop.eup %7773 }
 0xb1d   : > { %v3391_v37 = vmul.f32 %v7774_v39, %v7770_v23  ;;  %v3755_v15 = vpop.permute.xlu0 %3754 }
 0xb1f   : > { %v3395_v42 = vmul.f32 %v8152_v33, %v3391_v37 }
 0xb21   : > { %7258 = vmatmul.mubr.msk.f32.vlgmr.msra.gmra.mrb[38].mxu0 %vm1031_vm2, %v3395_v42 }
 0xb22   : > { %7266 = vmatpush3.msra.mxu0 %v2836_v43  ;;  %7267 = vmatprep.mubr.msk.f32.mxu0 %vm7881_vm0, %v7882_v11 }
 0xb23   : > { %7275 = vmatprep.subr.mxu0 %v7882_v11 }
 0xb38   : > { %v3539_v41 = vpop.f32.mrb[32].mxu1 }
 0xb39   : > { %v3690_v45 = vmul.f32 %v3539_v41, %v8243_v6  ;;  %v7254_v47 = vpop.f32.mrb[33].mxu1 }
 0xb3b   : > { %v3694_v48 = vmax.f32 %v3690_v45, 0.0 }
 0xb3c   : > { %v3685_v49 = vpop.f32.mrb[34].mxu1 }
 0xb3d   : > { %7775 = vrsqrt.f32 %v3694_v48  ;;  %v7264_v52 = vpop.f32.mrb[35].mxu1  ;;  %v3692_v33 = vmul.f32 %v3685_v49, %v8243_v6  ;;  %vm3706_vm14 = vcmp.eq.f32.partialorder %v3694_v48, inf  ;;  %v3709_v46 = vand.u32 2147483648, %v3694_v48 }
 0xb3e   : > { %vm3708_vm15 = vcmp.eq.f32.partialorder %v3694_v48, 0.0 }
 0xb3f   : > { %v3696_v57 = vmax.f32 %v3692_v33, 0.0 }
 0xb41   : > { %7777 = vrsqrt.f32 %v3696_v57  ;;  %vm3720_vm3 = vcmp.eq.f32.partialorder %v3696_v57, inf  ;;  %v3723_v30 = vand.u32 2147483648, %v3696_v57  ;;  %vm3722_vm5 = vcmp.eq.f32.partialorder %v3696_v57, 0.0 }
 0xb47   : > { %v7776_v51 = vpop.eup %7775 }
 0xb48   : > { %v3705_v18 = vmul.f32 %v7776_v51, %v3694_v48 }
 0xb4a   : > { %v3707_v53 = vsel %vm3706_vm14, %v3694_v48, %v3705_v18 }
 0xb4b   : > { %v3710_v59 = vsel %vm3708_vm15, %v3709_v46, %v3707_v53  ;;  %v7778_v63 = vpop.eup %7777 }
 0xb4c   : > { %v3758_v61 = vmul.f32 %v3747_v55, %v3710_v59  ;;  %v3719_v9 = vmul.f32 %v7778_v63, %v3696_v57 }
 0xb4e   : > { %v3763_v20 = vmul.f32 1.442695, %v3758_v61  ;;  %v3721_v13 = vsel %vm3720_vm3, %v3696_v57, %v3719_v9 }
 0xb4f   : > { %v3724_v14 = vsel %vm3722_vm5, %v3723_v30, %v3721_v13 }
 0xb50   : > { %7779 = vpow2.f32 %v3763_v20  ;;  %v3760_v23 = vmul.f32 %v3755_v15, %v3724_v14  ;;  %v3751_v20 = vpop.permute.xlu1 %3750 }
 0xb52   : > { %v3767_v29 = vmul.f32 1.442695, %v3760_v23 }
 0xb5a   : > { %v7780_v0 = vpop.eup %7779 }
 0xb5b   : > { %v3466_v2 = vpop.f32.mrb[36].mxu0  ;;  %v3770_v21 = vmax.f32 %v7780_v0, 1e-05 }
 0xb5c   : > { %v3689_v4 = vmul.f32 %v3466_v2, %v8243_v6  ;;  %v7249_v5 = vpop.f32.mrb[37].mxu0 }
 0xb5d   : > { %v3774_v8 = vmin.f32 %v3770_v21, 100000.0 }
 0xb5e   : > { %v3693_v24 = vmax.f32 %v3689_v4, 0.0 }
 0xb5f   : > { %v3778_v19 = vmul.f32 %v3774_v8, %v8559_v1 }
 0xb60   : > { %7781 = vrsqrt.f32 %v3693_v24  ;;  %vm3699_vm6 = vcmp.eq.f32.partialorder %v3693_v24, inf  ;;  %v3702_v28 = vand.u32 2147483648, %v3693_v24  ;;  %vm3701_vm7 = vcmp.eq.f32.partialorder %v3693_v24, 0.0 }
 0xb61   : > { %v3784_v10 = vsel %vm1031_vm2, %v3778_v19, -inf  ;;  %7783 = vpow2.f32 %v3767_v29 }
 0xb62   : > { %3785 = vmax.xlane.f32.xlu0 %v3784_v10 }
 0xb6a   : > { %v7782_v26 = vpop.eup %7781 }
 0xb6b   : > { %v3698_v27 = vmul.f32 %v7782_v26, %v3693_v24  ;;  %v7784_v38 = vpop.eup %7783 }
 0xb6c   : > { %v3772_v39 = vmax.f32 %v7784_v38, 1e-05 }
 0xb6d   : > { %v3700_v31 = vsel %vm3699_vm6, %v3693_v24, %v3698_v27 }
 0xb6e   : > { %v3703_v1 = vsel %vm3701_vm7, %v3702_v28, %v3700_v31  ;;  %v3776_v43 = vmin.f32 %v3772_v39, 100000.0  ;;  %vm314_vm7 = vcmp.gt.s32.totalorder %v8090_v54, 0 }
 0xb6f   : > { %v3757_v34 = vmul.f32 %v3743_v35, %v3703_v1 }
 0xb70   : > { %v3780_v47 = vmul.f32 %v3776_v43, %v8564_v7 }
 0xb71   : > { %v3761_v36 = vmul.f32 1.442695, %v3757_v34 }
 0xb72   : > { %v3790_v48 = vsel %vm1031_vm2, %v3780_v47, -inf }
 0xb73   : > { %7785 = vpow2.f32 %v3761_v36 }
 0xb7d   : > { %v7786_v40 = vpop.eup %7785 }
 0xb7e   : > { %v3769_v37 = vmax.f32 %v7786_v40, 1e-05 }
 0xb80   : > { %v3773_v42 = vmin.f32 %v3769_v37, 100000.0 }
 0xb82   : > { %v3777_v41 = vmul.f32 %v3773_v42, %v8555_v62 }
 0xb84   : > { %v3781_v45 = vsel %vm1031_vm2, %v3777_v41, -inf }
 0xb85   : > { %3782 = vmax.xlane.f32.xlu1 %v3781_v45 }
 0xb89   : > { %3791 = vmax.xlane.f32.xlu1 %v3790_v48 }
 0xbef   : > { %v3786_v49 = vpop.xlane.xlu0 %3785 }
 0xbf0   : > { %v3794_v52 = vsub.f32 %v3778_v19, %v3786_v49 }
 0xbf2   : > { %v3799_v51 = vmul.f32 1.442695, %v3794_v52 }
 0xbf4   : > { %7787 = vpow2.f32 %v3799_v51  ;;  %v3612_v33 = vpop.f32.mrb[38].mxu0 }
 0xbf5   : > { %v3691_v18 = vmul.f32 %v3612_v33, %v8243_v6  ;;  %v7259_v46 = vpop.f32.mrb[39].mxu0 }
 0xbf7   : > { %v3695_v53 = vmax.f32 %v3691_v18, 0.0 }
 0xbf9   : > { %7789 = vrsqrt.f32 %v3695_v53  ;;  %vm3713_vm8 = vcmp.eq.f32.partialorder %v3695_v53, inf  ;;  %v3716_v59 = vand.u32 2147483648, %v3695_v53  ;;  %vm3715_vm9 = vcmp.eq.f32.partialorder %v3695_v53, 0.0 }
 0xbfe   : > { %v7788_v55 = vpop.eup %7787 }
 0xbff   : > { %v3808_v62 = vsel %vm1031_vm2, %v7788_v55, 0.0 }
 0xc00   : > { %3809 = vadd.xlane.f32.xlu1 %v3808_v62 }
 0xc03   : > { %v7790_v57 = vpop.eup %7789 }
 0xc04   : > { %v3712_v7 = vmul.f32 %v7790_v57, %v3695_v53 }
 0xc06   : > { %v3714_v61 = vsel %vm3713_vm8, %v3695_v53, %v3712_v7  ;;  %v6642_v7 = vld [vmem:[%s9182_s3 + $0x198] ss:$0 sm:$0xff] }
 0xc07   : > { %v3717_v63 = vsel %vm3715_vm9, %v3716_v59, %v3714_v61  ;;  %v6677_v61 = vld [vmem:[%s9182_s3 + $0x2c8] ss:$0 sm:$0xff] }
 0xc08   : > { %v3759_v0 = vmul.f32 %v3751_v20, %v3717_v63  ;;  %v2307_v63 = vadd.f32 %v6642_v7, %v8530_v44 }
 0xc0a   : > { %v3765_v2 = vmul.f32 1.442695, %v3759_v0 }
 0xc0c   : > { %7791 = vpow2.f32 %v3765_v2 }
 0xc12   : > { %v3783_v21 = vpop.xlane.xlu1 %3782 }
 0xc13   : > { %v3793_v4 = vsub.f32 %v3777_v41, %v3783_v21 }
 0xc15   : > { %v3797_v5 = vmul.f32 1.442695, %v3793_v4  ;;  %v2310_v4 = vadd.f32 %v2307_v63, %v8337_v12  ;;  %v4203_v63 = vld [vmem:[%s9182_s3 + $0x410] sm:$0xff] }
 0xc16   : > { %v7792_v8 = vpop.eup %7791  ;;  %v3792_v9 = vpop.xlane.xlu1 %3791 }
 0xc17   : > { %7793 = vpow2.f32 %v3797_v5  ;;  %v3796_v24 = vsub.f32 %v3780_v47, %v3792_v9  ;;  %v3771_v19 = vmax.f32 %v7792_v8, 1e-05  ;;  %v2313_v5 = vsel %vm447_vm1, %v2310_v4, 0.0 }
 0xc19   : > { %v3803_v35 = vmul.f32 1.442695, %v3796_v24  ;;  %v3775_v10 = vmin.f32 %v3771_v19, 100000.0 }
 0xc1b   : > { %7795 = vpow2.f32 %v3803_v35  ;;  %v3779_v13 = vmul.f32 %v3775_v10, %v8583_v50 }
 0xc1d   : > { %v3787_v30 = vsel %vm1031_vm2, %v3779_v13, -inf }
 0xc1e   : > { %3788 = vmax.xlane.f32.xlu0 %v3787_v30  ;;  %v4156_v30 = vld [vmem:[%s9182_s3 + $0x360] sm:$0xff] }
 0xc21   : > { %v7794_v14 = vpop.eup %7793 }
 0xc22   : > { %v3805_v15 = vsel %vm1031_vm2, %v7794_v14, 0.0 }
 0xc23   : > { %3806 = vadd.xlane.f32.xlu0 %v3805_v15  ;;  %v4160_v15 = vld [vmem:[%s9182_s3 + $0x380] sm:$0xff] }
 0xc25   : > { %v7796_v23 = vpop.eup %7795 }
 0xc26   : > { %v3814_v26 = vsel %vm1031_vm2, %v7796_v23, 0.0 }
 0xc27   : > { %3815 = vadd.xlane.f32.xlu1 %v3814_v26  ;;  %v4161_v26 = vld [vmem:[%s9182_s3 + $0x388] sm:$0xff] }
 0xc8d   : > { %v3810_v27 = vpop.xlane.xlu1 %3809 }
 0xc8e   : > { %7797 = vrcp.f32 %v3810_v27  ;;  %v7606_v27 = vpack.c.bf16 %v4161_v26, %v4160_v15  ;;  %v4208_v26 = vld [vmem:[%s9182_s3 + $0x438] sm:$0xff] }
 0xc98   : > { %v7798_v29 = vpop.eup %7797 }
 0xc99   : > { %v3822_v28 = vmul.f32 %v7798_v29, %v7788_v55  ;;  %v4158_v29 = vld [vmem:[%s9182_s3 + $0x370] sm:$0xff] }
 0xc9b   : > { %7273 = vmatmul.mubr.msk.f32.vlgmr.msra.gmra.mrb[36].mxu1 %vm1031_vm2, %v3822_v28  ;;  %v4159_v28 = vld [vmem:[%s9182_s3 + $0x378] sm:$0xff] }
 0xc9c   : > { %7281 = vmatpush3.msra.mxu1 %v8572_v25  ;;  %7282 = vmatprep.mubr.msk.f32.mxu1 %vm7881_vm0, %v7882_v11 }
 0xc9d   : > { %7605 = vmatprep.subr.bf16.mxu1 %v7880_v3 }
 0xcab   : > { %v3789_v50 = vpop.xlane.xlu0 %3788 }
 0xcac   : > { %v3795_v31 = vsub.f32 %v3779_v13, %v3789_v50  ;;  %v4162_v50 = vld [vmem:[%s9182_s3 + $0x390] sm:$0xff] }
 0xcae   : > { %v3801_v1 = vmul.f32 1.442695, %v3795_v31  ;;  %v7603_v31 = vpack.c.bf16 %v4159_v28, %v4158_v29  ;;  %v4209_v29 = vld [vmem:[%s9182_s3 + $0x440] sm:$0xff]  ;;  %v4212_v28 = vld [vmem:[%s9182_s3 + $0x458] sm:$0xff] }
 0xcb0   : > { %7799 = vpow2.f32 %v3801_v1  ;;  %v3807_v34 = vpop.xlane.xlu0 %3806  ;;  %v4163_v1 = vld [vmem:[%s9182_s3 + $0x398] sm:$0xff] }
 0xcb1   : > { %7801 = vrcp.f32 %v3807_v34  ;;  %v7609_v34 = vpack.c.bf16 %v4163_v1, %v4162_v50  ;;  %v4213_v50 = vld [vmem:[%s9182_s3 + $0x460] sm:$0xff] }
 0xcb2   : > { %v7645_v1 = vpack.c.bf16 %v4213_v50, %v4212_v28 }
 0xcb4   : > { %v3816_v36 = vpop.xlane.xlu1 %3815 }
 0xcb5   : > { %7803 = vrcp.f32 %v3816_v36 }
 0xcba   : > { %v7800_v38 = vpop.eup %7799 }
 0xcbb   : > { %v7802_v39 = vpop.eup %7801  ;;  %v3811_v40 = vsel %vm1031_vm2, %v7800_v38, 0.0 }
 0xcbc   : > { %v3821_v37 = vmul.f32 %v7802_v39, %v7794_v14  ;;  %3812 = vadd.xlane.f32.xlu0 %v3811_v40  ;;  %v4157_v14 = vld [vmem:[%s9182_s3 + $0x368] sm:$0xff] }
 0xcbe   : > { %7268 = vmatmul.mubr.msk.f32.vlgmr.msra.gmra.mrb[40].mxu0 %vm1031_vm2, %v3821_v37 }
 0xcbf   : > { %v7804_v25 = vpop.eup %7803  ;;  %7276 = vmatpush3.msra.mxu0 %v8553_v58  ;;  %7277 = vmatprep.mubr.msk.f32.mxu0 %vm7881_vm0, %v7882_v11 }
 0xcc0   : > { %v3824_v42 = vmul.f32 %v7804_v25, %v7796_v23  ;;  %7599 = vmatprep.subr.bf16.mxu0 %v7880_v3  ;;  %v7600_v23 = vpack.c.bf16 %v4157_v14, %v4156_v30  ;;  %v4211_v30 = vld [vmem:[%s9182_s3 + $0x450] sm:$0xff]  ;;  %v6645_v14 = vld [vmem:[%s9182_s3 + $0x1a8] ss:$0 sm:$0xff] }
 0xcc2   : > { %7283 = vmatmul.mubr.msk.f32.vlgmr.msra.gmra.mrb[38].mxu1 %vm1031_vm2, %v3824_v42 }
 0xcc3   : > { %7304 = vmatprep.mubr.msk.f32.mxu1 %vm7881_vm0, %v7882_v11  ;;  %7607 = vmatpush3.bf16.msra.mxu1 %v7606_v27 }
 0xcc4   : > { %7608 = vmatprep.subr.bf16.mxu1 %v7880_v3 }
 0xcc7   : > { %7610 = vmatpush3.bf16.msra.mxu1 %v7609_v34  ;;  %v6680_v34 = vld.sshfl [vmem:[%s9182_s3 + $0x3e0] sm:$0x33 pattern:$0x75316420] }
 0xcc8   : > { %7617 = vmatprep.subr.bf16.mxu1 %v7880_v3 }
 0xd49   : > { %v3813_v43 = vpop.xlane.xlu0 %3812 }
 0xd4a   : > { %7805 = vrcp.f32 %v3813_v43  ;;  %v6678_v43 = vld [vmem:[%s9182_s3 + $0x2d0] ss:$0 sm:$0xff] }
 0xd54   : > { %v7806_v41 = vpop.eup %7805 }
 0xd55   : > { %v3823_v45 = vmul.f32 %v7806_v41, %v7800_v38  ;;  %v4164_v41 = vld [vmem:[%s9182_s3 + $0x3a0] sm:$0xff] }
 0xd57   : > { %7278 = vmatmul.mubr.msk.f32.vlgmr.msra.gmra.mrb[42].mxu0 %vm1031_vm2, %v3823_v45 }
 0xd58   : > { %7293 = vmatprep.mubr.msk.f32.mxu0 %vm7881_vm0, %v7882_v11  ;;  %7601 = vmatpush3.bf16.msra.mxu0 %v7600_v23 }
 0xd59   : > { %7602 = vmatprep.subr.bf16.mxu0 %v7880_v3 }
 0xd5c   : > { %7604 = vmatpush3.bf16.msra.mxu0 %v7603_v31  ;;  %v7639_v31 = vpack.c.bf16 %v4209_v29, %v4208_v26 }
 0xd5d   : > { %7611 = vmatprep.subr.bf16.mxu0 %v7880_v3 }
 0xd6e   : > { %v3967_v58 = vpop.f32.mrb[36].mxu1 }
 0xd6f   : > { %v7274_v47 = vpop.f32.mrb[37].mxu1  ;;  %v4118_v49 = vsel %vm447_vm1, %v3967_v58, 0.0  ;;  %v4165_v58 = vld [vmem:[%s9182_s3 + $0x3a8] sm:$0xff] }
 0xd70   : > { %v4168_v47 = vld [vmem:[%s9182_s3 + $0x3c0] sm:$0xff] }
 0xd91   : > { %v3894_v48 = vpop.f32.mrb[40].mxu0 }
 0xd92   : > { %v4117_v52 = vsel %vm447_vm1, %v3894_v48, 0.0  ;;  %v7269_v51 = vpop.f32.mrb[41].mxu0  ;;  %v4169_v48 = vld [vmem:[%s9182_s3 + $0x3c8] sm:$0xff] }
 0xd93   : > { %v4119_v33 = vadd.f32 %v4118_v49, %v4117_v52  ;;  %v6679_v49 = vld [vmem:[%s9182_s3 + $0x2d8] ss:$0 sm:$0xff]  ;;  %v7612_v51 = vpack.c.bf16 %v4165_v58, %v4164_v41 }
 0xd95   : > { %v4113_v18 = vpop.f32.mrb[38].mxu1 }
 0xd96   : > { %v7284_v46 = vpop.f32.mrb[39].mxu1  ;;  %v4122_v59 = vsel %vm447_vm1, %v4113_v18, 0.0  ;;  %v4166_v18 = vld [vmem:[%s9182_s3 + $0x3b0] sm:$0xff] }
 0xe2a   : > { %v4040_v53 = vpop.f32.mrb[42].mxu0 }
 0xe2b   : > { %v4120_v55 = vsel %vm447_vm1, %v4040_v53, 0.0  ;;  %v7279_v62 = vpop.f32.mrb[43].mxu0  ;;  %v4167_v53 = vld [vmem:[%s9182_s3 + $0x3b8] sm:$0xff] }
 0xe2c   : > { %v4121_v57 = vadd.f32 %v4120_v55, %v4119_v33  ;;  %v7618_v33 = vpack.c.bf16 %v4169_v48, %v4168_v47  ;;  %v4170_v55 = vld [vmem:[%s9182_s3 + $0x3d0] sm:$0xff]  ;;  %v4171_v62 = vld [vmem:[%s9182_s3 + $0x3d8] sm:$0xff] }
 0xe2d   : > { %v7621_v7 = vpack.c.bf16 %v4171_v62, %v4170_v55 }
 0xe2e   : > { %v4123_v20 = vadd.f32 %v4122_v59, %v4121_v57  ;;  %v7615_v57 = vpack.c.bf16 %v4167_v53, %v4166_v18  ;;  %v4198_v59 = vld [vmem:[%s9182_s3 + $0x3e8] sm:$0xff] }
 0xe2f   : > { %v6681_v18 = vld.sshfl [vmem:[%s9182_s3 + $0x468] sm:$0x33 pattern:$0x75316420] }
 0xe30   : > { %v4129_v0 = vadd.f32 %v6677_v61, %v4123_v20  ;;  %v4199_v61 = vld [vmem:[%s9182_s3 + $0x3f0] sm:$0xff]  ;;  %v4202_v20 = vld [vmem:[%s9182_s3 + $0x408] sm:$0xff] }
 0xe32   : > { %v4130_v2 = vadd.f32 %v4129_v0, %v8363_v16 }
 0xe34   : > { %v4133_v21 = vsel %vm447_vm1, %v4130_v2, 0.0 }
 0xe35   : > { %4134 = vadd.xlane.f32.xlu0 %v4133_v21  ;;  %v7630_v21 = vpack.c.bf16 %v4203_v63, %v4202_v20 }
 0xe39   : > { %2314 = vadd.xlane.f32.xlu0 %v2313_v5 }
 0xec2   : > { %v4135_v8 = vpop.xlane.xlu0 %4134 }
 0xec3   : > { %v4136_v9 = vmul.f32 0.03125, %v4135_v8  ;;  %v4201_v8 = vld [vmem:[%s9182_s3 + $0x400] sm:$0xff] }
 0xec5   : > { %v4137_v24 = vsub.f32 %v4130_v2, %v4136_v9  ;;  %v7624_v2 = vpack.c.bf16 %v4199_v61, %v4198_v59  ;;  %v4204_v9 = vld [vmem:[%s9182_s3 + $0x418] sm:$0xff]  ;;  %v8859_v59 = vrot.slane %v6681_v18, %v8093_v56 }
 0xec6   : > { %v2315_v19 = vpop.xlane.xlu0 %2314 }
 0xec7   : > { %v2316_v35 = vmul.f32 0.03125, %v2315_v19  ;;  %v4138_v10 = vmul.f32 %v4137_v24, %v4137_v24  ;;  %v6644_v19 = vld [vmem:[%s9182_s3 + $0x1a0] ss:$0 sm:$0xff] }
 0xec9   : > { %v8669_v13 = vsub.f32 %v2310_v4, %v2316_v35  ;;  %v4139_v44 = vsel %vm447_vm1, %v4138_v10, 0.0  ;;  %v4200_v4 = vld [vmem:[%s9182_s3 + $0x3f8] sm:$0xff] }
 0xeca   : > { %4140 = vadd.xlane.f32.xlu1 %v4139_v44  ;;  %v7627_v35 = vpack.c.bf16 %v4201_v8, %v4200_v4 }
 0xecb   : > { %v2318_v16 = vmul.f32 %v8669_v13, %v8669_v13 }
 0xecd   : > { %v2319_v12 = vsel %vm447_vm1, %v2318_v16, 0.0  ;;  %v4207_v16 = vld [vmem:[%s9182_s3 + $0x430] sm:$0xff] }
 0xece   : > { %2320 = vadd.xlane.f32.xlu1 %v2319_v12  ;;  %v4210_v12 = vld [vmem:[%s9182_s3 + $0x448] sm:$0xff] }
 0xecf   : > { %v7642_v23 = vpack.c.bf16 %v4211_v30, %v4210_v12 }
 0xf57   : > { %v4141_v36 = vpop.xlane.xlu1 %4140 }
 0xf58   : > { %v4142_v38 = vmul.f32 0.03125, %v4141_v36  ;;  %v4181_v36 = vcombine.high %v6680_v34, %v6680_v34 }
 0xf5a   : > { %v4143_v39 = vadd.f32 1e-05, %v4142_v38  ;;  %v4188_v38 = vrot.slane %v6680_v34, %v8093_v56 }
 0xf5b   : > { %v2321_v40 = vpop.xlane.xlu1 %2320 }
 0xf5c   : > { %7807 = vrsqrt.f32 %v4143_v39  ;;  %v2322_v37 = vmul.f32 0.03125, %v2321_v40  ;;  %v4195_v39 = vrot.slane %v4181_v36, %v8093_v56  ;;  %v4269_v40 = vrot.slane %v4188_v38, %v8100_v60 }
 0xf5d   : > { %v4196_v47 = vcombine.high %v4188_v38, %v4188_v38 }
 0xf5e   : > { %v2323_v25 = vadd.f32 1e-05, %v2322_v37  ;;  %v4273_v37 = vrot.slane %v4195_v39, %v8100_v60  ;;  %v4197_v48 = vcombine.high %v4195_v39, %v4195_v39 }
 0xf60   : > { %7809 = vrsqrt.f32 %v2323_v25 }
 0xf66   : > { %v7808_v42 = vpop.eup %7807 }
 0xf67   : > { %v4145_v45 = vmul.f32 %v7808_v42, %v4137_v24  ;;  %v4205_v24 = vld [vmem:[%s9182_s3 + $0x420] sm:$0xff] }
 0xf68   : > { %v7633_v10 = vpack.c.bf16 %v4205_v24, %v4204_v9 }
 0xf69   : > { %v4150_v52 = vmul.f32 %v6678_v43, %v4145_v45 }
 0xf6a   : > { %v7810_v0 = vpop.eup %7809 }
 0xf6b   : > { %v8724_v46 = vadd.f32 %v6679_v49, %v4150_v52  ;;  %v2325_v5 = vmul.f32 %v7810_v0, %v8669_v13  ;;  %v4206_v13 = vld [vmem:[%s9182_s3 + $0x428] sm:$0xff]  ;;  %v4277_v49 = vrot.slane %v4196_v47, %v8100_v60  ;;  %v4281_v52 = vrot.slane %v4197_v48, %v8100_v60 }
 0xf6c   : > { %v7636_v15 = vpack.c.bf16 %v4207_v16, %v4206_v13 }
 0xf6d   : > { %7294 = vmatmul.mubr.msk.f32.vlgmr.msra.gmra.mrb[44].mxu0 %vm447_vm1, %v8724_v46  ;;  %7305 = vmatmul.mubr.msk.f32.vlgmr.msra.gmra.mrb[40].mxu1 %vm447_vm1, %v8724_v46  ;;  %v2330_v44 = vmul.f32 %v6644_v19, %v2325_v5 }
 0xf6e   : > { %7613 = vmatpush3.bf16.msra.mxu0 %v7612_v51  ;;  %7619 = vmatpush3.bf16.msra.mxu1 %v7618_v33 }
 0xf6f   : > { %7614 = vmatprep.subr.bf16.mxu0 %v7880_v3  ;;  %7620 = vmatprep.subr.bf16.mxu1 %v7880_v3  ;;  %v2335_v27 = vadd.f32 %v6645_v14, %v2330_v44  ;;  %v8893_v44 = vsel %vm307_vm10, 1.0, %v7882_v11 }
 0xf70   : > { %7315 = vmatprep.mubr.msk.f32.mxu0 %vm7881_vm0, %v7882_v11  ;;  %7326 = vmatprep.mubr.msk.f32.mxu1 %vm7881_vm0, %v7882_v11  ;;  %v312_v16 = vsub.f32 1.0, %v8893_v44 }
 0xf72   : > { %7616 = vmatpush3.bf16.msra.mxu0 %v7615_v57  ;;  %7622 = vmatpush3.bf16.msra.mxu1 %v7621_v7  ;;  %v4223_v7 = vcombine.high %v6681_v18, %v6681_v18  ;;  %v313_v12 = vmul.f32 -1e+32, %v312_v16 }
 0xf73   : > { %7623 = vmatprep.subr.bf16.mxu0 %v7880_v3  ;;  %7629 = vmatprep.subr.bf16.mxu1 %v7880_v3 }
 0xf74   : > { %v8862_v61 = vrot.slane %v4223_v7, %v8093_v56 }
 0xf75   : > { %7316 = vmatmul.mubr.msk.f32.vlgmr.msra.gmra.mrb[46].mxu0 %vm447_vm1, %v8724_v46  ;;  %7327 = vmatmul.mubr.msk.f32.vlgmr.msra.gmra.mrb[42].mxu1 %vm447_vm1, %v8724_v46 }
 0xf76   : > { %7625 = vmatpush3.bf16.msra.mxu0 %v7624_v2  ;;  %7631 = vmatpush3.bf16.msra.mxu1 %v7630_v21  ;;  %v4238_v21 = vcombine.high %v8859_v59, %v8859_v59  ;;  %v4239_v4 = vcombine.high %v8862_v61, %v8862_v61 }
 0xf77   : > { %7626 = vmatprep.subr.bf16.mxu0 %v7880_v3  ;;  %7632 = vmatprep.subr.bf16.mxu1 %v7880_v3 }
 0xf78   : > { %7337 = vmatprep.mubr.msk.f32.mxu0 %vm7881_vm0, %v7882_v11  ;;  %7348 = vmatprep.mubr.msk.f32.mxu1 %vm7881_vm0, %v7882_v11  ;;  %v4580_v5 = vrot.slane %v4238_v21, %v8100_v60  ;;  %v4584_v8 = vrot.slane %v4239_v4, %v8100_v60 }
 0xf7a   : > { %7628 = vmatpush3.bf16.msra.mxu0 %v7627_v35  ;;  %7634 = vmatpush3.bf16.msra.mxu1 %v7633_v10 }
 0xf7b   : > { %7635 = vmatprep.subr.bf16.mxu0 %v7880_v3  ;;  %7641 = vmatprep.subr.bf16.mxu1 %v7880_v3 }
 0xf7d   : > { %7338 = vmatmul.mubr.msk.f32.vlgmr.msra.gmra.mrb[48].mxu0 %vm447_vm1, %v2335_v27  ;;  %7349 = vmatmul.mubr.msk.f32.vlgmr.msra.gmra.mrb[44].mxu1 %vm447_vm1, %v2335_v27 }
 0xf7e   : > { %7637 = vmatpush3.bf16.msra.mxu0 %v7636_v15  ;;  %7643 = vmatpush3.bf16.msra.mxu1 %v7642_v23 }
 0xf7f   : > { %7638 = vmatprep.subr.bf16.mxu0 %v7880_v3  ;;  %7644 = vmatprep.subr.bf16.mxu1 %v7880_v3 }
 0xf80   : > { %7359 = vmatprep.mubr.msk.f32.mxu0 %vm7881_vm0, %v7882_v11  ;;  %7370 = vmatprep.mubr.msk.f32.mxu1 %vm7881_vm0, %v7882_v11 }
 0xf82   : > { %7640 = vmatpush3.bf16.msra.mxu0 %v7639_v31  ;;  %7646 = vmatpush3.bf16.msra.mxu1 %v7645_v1 }
 0xf83   : > { %7373 = vmatprep.subr.mxu0 %v7882_v11  ;;  %7378 = vmatprep.subr.mxu1 %v7882_v11 }
 0xf85   : > { %7360 = vmatmul.mubr.msk.f32.vlgmr.msra.gmra.mrb[50].mxu0 %vm447_vm1, %v2335_v27  ;;  %7371 = vmatmul.mubr.msk.f32.vlgmr.msra.gmra.mrb[46].mxu1 %vm447_vm1, %v2335_v27 }
 0xf86   : > { %7375 = vmatprep.mubr.msk.f32.mxu0 %vm7881_vm0, %v7882_v11  ;;  %7380 = vmatprep.mubr.msk.f32.mxu1 %vm7881_vm0, %v7882_v11 }
0x1040   : > { %v4355_v25 = vpop.f32.mrb[44].mxu0  ;;  %v4425_v42 = vpop.f32.mrb[40].mxu1 }
0x1041   : > { %v4356_v43 = vadd.f32 %v4355_v25, %v4269_v40  ;;  %v4426_v41 = vadd.f32 %v4425_v42, %v4273_v37  ;;  %v7295_v45 = vpop.f32.mrb[45].mxu0  ;;  %v7306_v58 = vpop.f32.mrb[41].mxu1 }
0x1043   : > { %7374 = vmatpush3.xpose.msk.msra.mxu0 %vm1031_vm2, %v4356_v43  ;;  %7379 = vmatpush3.xpose.msk.msra.mxu1 %vm1031_vm2, %v4426_v41 }
0x1044   : > { %7383 = vmatprep.subr.mxu0 %v7882_v11  ;;  %7388 = vmatprep.subr.mxu1 %v7882_v11 }
0x1046   : > { %7376 = vmatmul.mubr.msk.f32.vlgmr.msra.gmra.mrb[52].mxu0 %vm1031_vm2, %v4356_v43  ;;  %7381 = vmatmul.mubr.msk.f32.vlgmr.msra.gmra.mrb[48].mxu1 %vm1031_vm2, %v4426_v41 }
0x1047   : > { %7385 = vmatprep.mubr.msk.f32.mxu0 %vm7881_vm0, %v7882_v11  ;;  %7390 = vmatprep.mubr.msk.f32.mxu1 %vm7881_vm0, %v7882_v11 }
0x1048   : > { %v4495_v51 = vpop.f32.mrb[46].mxu0  ;;  %v4565_v33 = vpop.f32.mrb[42].mxu1 }
0x1049   : > { %v4496_v53 = vadd.f32 %v4495_v51, %v4277_v49  ;;  %v4566_v55 = vadd.f32 %v4565_v33, %v4281_v52  ;;  %v7317_v62 = vpop.f32.mrb[47].mxu0  ;;  %v7328_v57 = vpop.f32.mrb[43].mxu1 }
0x104b   : > { %7384 = vmatpush3.xpose.msk.msra.mxu0 %vm1031_vm2, %v4496_v53  ;;  %7389 = vmatpush3.xpose.msk.msra.mxu1 %vm1031_vm2, %v4566_v55 }
0x104c   : > { %7393 = vmatprep.subr.mxu0 %v7882_v11  ;;  %7398 = vmatprep.subr.mxu1 %v7882_v11 }
0x104e   : > { %7386 = vmatmul.mubr.msk.f32.vlgmr.msra.gmra.mrb[54].mxu0 %vm1031_vm2, %v4496_v53  ;;  %7391 = vmatmul.mubr.msk.f32.vlgmr.msra.gmra.mrb[50].mxu1 %vm1031_vm2, %v4566_v55 }
0x104f   : > { %7399 = vmatpush3.msk.msra.mxu1 %vm8183_vm4, %v7884_v22  ;;  %7400 = vmatprep.mubr.msk.f32.mxu1 %vm7881_vm0, %v7882_v11 }
0x1050   : > { %v8869_v20 = vpop.f32.mrb[48].mxu0  ;;  %v8871_v63 = vpop.f32.mrb[44].mxu1  ;;  %7394 = vmatpush3.msk.msra.mxu0 %vm8183_vm4, %v7884_v22  ;;  %7395 = vmatprep.mubr.msk.f32.mxu0 %vm7881_vm0, %v7882_v11 }
0x1051   : > { %v7339_v0 = vpop.f32.mrb[49].mxu0  ;;  %v7350_v2 = vpop.f32.mrb[45].mxu1  ;;  %7403 = vmatprep.subr.mxu0 %v7882_v11  ;;  %7408 = vmatprep.subr.mxu1 %v7882_v11 }
0x1058   : > { %v4798_v9 = vpop.f32.mrb[50].mxu0  ;;  %v4868_v24 = vpop.f32.mrb[46].mxu1 }
0x1059   : > { %v8886_v19 = vadd.f32 %v4798_v9, %v4580_v5  ;;  %v8888_v35 = vadd.f32 %v4868_v24, %v4584_v8  ;;  %v7361_v10 = vpop.f32.mrb[51].mxu0  ;;  %v7372_v13 = vpop.f32.mrb[47].mxu1  ;;  %v6682_v5 = vld.sshfl [vmem:[%s9182_s3 + $0x470] sm:$0x33 pattern:$0x75316420] }
0x105a   : > { %v4249_v8 = vcombine.high %v6682_v5, %v6682_v5  ;;  %v4256_v24 = vrot.slane %v6682_v5, %v8093_v56 }
0x105c   : > { %v4263_v9 = vrot.slane %v4249_v8, %v8093_v56  ;;  %v4264_v13 = vcombine.high %v4256_v24, %v4256_v24 }
0x105e   : > { %v5555_v10 = vrot.slane %v4263_v9, %v8100_v60  ;;  %v5559_v16 = vrot.slane %v4264_v13, %v8100_v60 }
0x1119   : > { %v4941_v30 = vpop.f32.mrb[52].mxu0  ;;  %v5014_v14 = vpop.f32.mrb[48].mxu1 }
0x111a   : > { %v8896_v15 = vmul.f32 0.35355338, %v4941_v30  ;;  %v8898_v23 = vmul.f32 0.35355338, %v5014_v14  ;;  %v7377_v26 = vpop.f32.mrb[53].mxu0  ;;  %v7382_v27 = vpop.f32.mrb[49].mxu1  ;;  %v4265_v30 = vcombine.high %v4263_v9, %v4263_v9 }
0x111c   : > { %v5169_v29 = vadd.f32 %v8898_v23, %v313_v12  ;;  %v5168_v28 = vadd.f32 %v8896_v15, %v313_v12  ;;  %v5563_v14 = vrot.slane %v4265_v30, %v8100_v60 }
0x111e   : > { %v5175_v32 = vsel %vm1031_vm2, %v5169_v29, -inf  ;;  %v5172_v50 = vsel %vm1031_vm2, %v5168_v28, -inf }
0x111f   : > { %5176 = vmax.xlane.f32.xlu1 %v5175_v32  ;;  %5173 = vmax.xlane.f32.xlu0 %v5172_v50 }
0x1121   : > { %v5087_v31 = vpop.f32.mrb[54].mxu0  ;;  %v5160_v1 = vpop.f32.mrb[50].mxu1 }
0x1122   : > { %v8904_v34 = vmul.f32 0.35355338, %v5087_v31  ;;  %v8906_v36 = vmul.f32 0.35355338, %v5160_v1  ;;  %v7387_v38 = vpop.f32.mrb[55].mxu0  ;;  %v7392_v39 = vpop.f32.mrb[51].mxu1 }
0x1124   : > { %v5171_v40 = vadd.f32 %v8906_v36, %v313_v12  ;;  %v5170_v37 = vadd.f32 %v8904_v34, %v313_v12  ;;  %v5551_v12 = vrot.slane %v4256_v24, %v8100_v60 }
0x1126   : > { %v5181_v25 = vsel %vm1031_vm2, %v5171_v40, -inf  ;;  %v5178_v42 = vsel %vm1031_vm2, %v5170_v37, -inf }
0x1127   : > { %5182 = vmax.xlane.f32.xlu1 %v5181_v25  ;;  %5179 = vmax.xlane.f32.xlu0 %v5178_v42  ;;  %v4572_v25 = vrot.slane %v8859_v59, %v8100_v60 }
0x11ac   : > { %v5177_v43 = vpop.xlane.xlu1 %5176  ;;  %v5174_v41 = vpop.xlane.xlu0 %5173 }
0x11ad   : > { %v5185_v45 = vsub.f32 %v5169_v29, %v5177_v43  ;;  %v5184_v58 = vsub.f32 %v5168_v28, %v5174_v41 }
0x11af   : > { %v5190_v47 = vmul.f32 1.442695, %v5185_v45  ;;  %v5188_v48 = vmul.f32 1.442695, %v5184_v58 }
0x11b1   : > { %7811 = vpow2.f32 %v5190_v47 }
0x11b2   : > { %7813 = vpow2.f32 %v5188_v48 }
0x11b4   : > { %v5183_v49 = vpop.xlane.xlu1 %5182  ;;  %v5180_v52 = vpop.xlane.xlu0 %5179 }
0x11b5   : > { %v5187_v51 = vsub.f32 %v5171_v40, %v5183_v49  ;;  %v5186_v33 = vsub.f32 %v5170_v37, %v5180_v52  ;;  %v4576_v40 = vrot.slane %v8862_v61, %v8100_v60  ;;  %v4659_v61 = vadd.f32 %v8869_v20, %v4572_v25 }
0x11b7   : > { %v5194_v18 = vmul.f32 1.442695, %v5187_v51  ;;  %v5192_v53 = vmul.f32 1.442695, %v5186_v33  ;;  %v4729_v43 = vadd.f32 %v8871_v63, %v4576_v40 }
0x11b9   : > { %7815 = vpow2.f32 %v5194_v18 }
0x11ba   : > { %7817 = vpow2.f32 %v5192_v53 }
0x11bb   : > { %v7812_v55 = vpop.eup %7811 }
0x11bc   : > { %v7814_v62 = vpop.eup %7813  ;;  %v5199_v57 = vsel %vm1031_vm2, %v7812_v55, 0.0 }
0x11bd   : > { %5200 = vadd.xlane.f32.xlu1 %v5199_v57  ;;  %v5196_v7 = vsel %vm1031_vm2, %v7814_v62, 0.0 }
0x11be   : > { %5197 = vadd.xlane.f32.xlu0 %v5196_v7 }
0x11c3   : > { %v7816_v0 = vpop.eup %7815 }
0x11c4   : > { %v7818_v2 = vpop.eup %7817  ;;  %v5205_v21 = vsel %vm1031_vm2, %v7816_v0, 0.0 }
0x11c5   : > { %5206 = vadd.xlane.f32.xlu1 %v5205_v21  ;;  %v5202_v4 = vsel %vm1031_vm2, %v7818_v2, 0.0 }
0x11c6   : > { %5203 = vadd.xlane.f32.xlu0 %v5202_v4 }
0x11d6   : > { %5569 = vperm.xlu1 %7708, %v5555_v10  }
0x11da   : > { %5573 = vperm.xlu1 %7708, %v5559_v16  }
0x11dc   : > { %5565 = vperm.xlu0 %7707, %v5551_v12  }
0x11e0   : > { %5577 = vperm.xlu0 %7707, %v5563_v14  }
0x124a   : > { %v5201_v26 = vpop.xlane.xlu1 %5200 }
0x124b   : > { %7819 = vrcp.f32 %v5201_v26  ;;  %v5198_v27 = vpop.xlane.xlu0 %5197 }
0x124c   : > { %7821 = vrcp.f32 %v5198_v27 }
0x1252   : > { %v5207_v29 = vpop.xlane.xlu1 %5206 }
0x1253   : > { %7823 = vrcp.f32 %v5207_v29  ;;  %v5204_v56 = vpop.xlane.xlu0 %5203 }
0x1254   : > { %7825 = vrcp.f32 %v5204_v56 }
0x1255   : > { %v7820_v28 = vpop.eup %7819 }
0x1256   : > { %v7822_v32 = vpop.eup %7821  ;;  %v5213_v50 = vmul.f32 %v7820_v28, %v7812_v55  ;;  %v5570_v8 = vpop.permute.xlu1 %5569 }
0x1257   : > { %v5212_v31 = vmul.f32 %v7822_v32, %v7814_v62 }
0x1258   : > { %v5217_v1 = vmul.f32 %v8893_v44, %v5213_v50 }
0x1259   : > { %v5216_v38 = vmul.f32 %v8893_v44, %v5212_v31 }
0x125a   : > { %7401 = vmatmul.mubr.msk.f32.vlgmr.msra.gmra.mrb[52].mxu1 %vm1031_vm2, %v5217_v1 }
0x125b   : > { %7396 = vmatmul.mubr.msk.f32.vlgmr.msra.gmra.mrb[56].mxu0 %vm1031_vm2, %v5216_v38  ;;  %7409 = vmatpush3.msk.msra.mxu1 %vm8183_vm4, %v7884_v22  ;;  %v5574_v38 = vpop.permute.xlu1 %5573 }
0x125c   : > { %7404 = vmatpush3.msk.msra.mxu0 %vm8183_vm4, %v7884_v22  ;;  %7405 = vmatprep.mubr.msk.f32.mxu0 %vm7881_vm0, %v7882_v11 }
0x125d   : > { %v7824_v39 = vpop.eup %7823  ;;  %7410 = vmatprep.mubr.msk.f32.mxu1 %vm7881_vm0, %v7882_v11  ;;  %7413 = vmatprep.subr.mxu0 %v7882_v11 }
0x125e   : > { %v7826_v37 = vpop.eup %7825  ;;  %v5215_v42 = vmul.f32 %v7824_v39, %v7816_v0  ;;  %7418 = vmatprep.subr.mxu1 %v7882_v11 }
0x125f   : > { %v5214_v17 = vmul.f32 %v7826_v37, %v7818_v2 }
0x1260   : > { %v5219_v22 = vmul.f32 %v8893_v44, %v5215_v42 }
0x1261   : > { %v5218_v41 = vmul.f32 %v8893_v44, %v5214_v17 }
0x1262   : > { %7411 = vmatmul.mubr.msk.f32.vlgmr.msra.gmra.mrb[54].mxu1 %vm1031_vm2, %v5219_v22 }
0x1263   : > { %7406 = vmatmul.mubr.msk.f32.vlgmr.msra.gmra.mrb[58].mxu0 %vm1031_vm2, %v5218_v41  ;;  %7419 = vmatpush3.msra.mxu1 %v4729_v43 }
0x1264   : > { %7414 = vmatpush3.msra.mxu0 %v4659_v61  ;;  %7415 = vmatprep.mubr.msk.f32.mxu0 %vm7881_vm0, %v7882_v11 }
0x1265   : > { %7420 = vmatprep.mubr.msk.f32.mxu1 %vm7881_vm0, %v7882_v11  ;;  %7423 = vmatprep.subr.mxu0 %v7882_v11 }
0x1266   : > { %7428 = vmatprep.subr.mxu1 %v7882_v11 }
0x132d   : > { %v5362_v59 = vpop.f32.mrb[52].mxu1 }
0x132e   : > { %v5289_v63 = vpop.f32.mrb[56].mxu0  ;;  %v5513_v20 = vmul.f32 %v5362_v59, %v8243_v6  ;;  %v7402_v44 = vpop.f32.mrb[53].mxu1 }
0x132f   : > { %v5512_v45 = vmul.f32 %v5289_v63, %v8243_v6  ;;  %v7397_v58 = vpop.f32.mrb[57].mxu0 }
0x1330   : > { %v5517_v47 = vmax.f32 %v5513_v20, 0.0 }
0x1331   : > { %v5516_v48 = vmax.f32 %v5512_v45, 0.0 }
0x1332   : > { %7827 = vrsqrt.f32 %v5517_v47  ;;  %vm5529_vm4 = vcmp.eq.f32.partialorder %v5517_v47, inf  ;;  %v5532_v2 = vand.u32 2147483648, %v5517_v47  ;;  %vm5531_vm11 = vcmp.eq.f32.partialorder %v5517_v47, 0.0 }
0x1333   : > { %7829 = vrsqrt.f32 %v5516_v48  ;;  %vm5522_vm12 = vcmp.eq.f32.partialorder %v5516_v48, inf  ;;  %v5525_v5 = vand.u32 2147483648, %v5516_v48  ;;  %vm5524_vm14 = vcmp.eq.f32.partialorder %v5516_v48, 0.0 }
0x1335   : > { %v5508_v49 = vpop.f32.mrb[54].mxu1 }
0x1336   : > { %v5435_v52 = vpop.f32.mrb[58].mxu0  ;;  %v5515_v51 = vmul.f32 %v5508_v49, %v8243_v6  ;;  %v7412_v33 = vpop.f32.mrb[55].mxu1 }
0x1337   : > { %v5514_v18 = vmul.f32 %v5435_v52, %v8243_v6  ;;  %v7407_v53 = vpop.f32.mrb[59].mxu0  ;;  %v5566_v6 = vpop.permute.xlu0 %5565 }
0x1338   : > { %v5519_v55 = vmax.f32 %v5515_v51, 0.0 }
0x1339   : > { %v5518_v62 = vmax.f32 %v5514_v18, 0.0 }
0x133a   : > { %7831 = vrsqrt.f32 %v5519_v55  ;;  %vm5543_vm15 = vcmp.eq.f32.partialorder %v5519_v55, inf  ;;  %v5546_v29 = vand.u32 2147483648, %v5519_v55  ;;  %vm5545_vm3 = vcmp.eq.f32.partialorder %v5519_v55, 0.0 }
0x133b   : > { %7833 = vrsqrt.f32 %v5518_v62  ;;  %vm5536_vm5 = vcmp.eq.f32.partialorder %v5518_v62, inf  ;;  %v5539_v32 = vand.u32 2147483648, %v5518_v62  ;;  %v5578_v50 = vpop.permute.xlu0 %5577  ;;  %vm5538_vm6 = vcmp.eq.f32.partialorder %v5518_v62, 0.0 }
0x133c   : > { %v7828_v57 = vpop.eup %7827 }
0x133d   : > { %v7830_v7 = vpop.eup %7829  ;;  %v5528_v0 = vmul.f32 %v7828_v57, %v5517_v47 }
0x133e   : > { %v5521_v21 = vmul.f32 %v7830_v7, %v5516_v48 }
0x133f   : > { %v5530_v4 = vsel %vm5529_vm4, %v5517_v47, %v5528_v0 }
0x1340   : > { %v5533_v9 = vsel %vm5531_vm11, %v5532_v2, %v5530_v4  ;;  %v5523_v24 = vsel %vm5522_vm12, %v5516_v48, %v5521_v21 }
0x1341   : > { %v5581_v10 = vmul.f32 %v5570_v8, %v5533_v9  ;;  %v5526_v13 = vsel %vm5524_vm14, %v5525_v5, %v5523_v24 }
0x1342   : > { %v5580_v16 = vmul.f32 %v5566_v6, %v5526_v13 }
0x1343   : > { %v5586_v12 = vmul.f32 1.442695, %v5581_v10 }
0x1344   : > { %v7832_v30 = vpop.eup %7831  ;;  %v5584_v14 = vmul.f32 1.442695, %v5580_v16 }
0x1345   : > { %v7834_v26 = vpop.eup %7833  ;;  %7835 = vpow2.f32 %v5586_v12  ;;  %v5542_v27 = vmul.f32 %v7832_v30, %v5519_v55 }
0x1346   : > { %7837 = vpow2.f32 %v5584_v14  ;;  %v5535_v56 = vmul.f32 %v7834_v26, %v5518_v62 }
0x1347   : > { %v5544_v28 = vsel %vm5543_vm15, %v5519_v55, %v5542_v27 }
0x1348   : > { %v5547_v31 = vsel %vm5545_vm3, %v5546_v29, %v5544_v28  ;;  %v5537_v1 = vsel %vm5536_vm5, %v5518_v62, %v5535_v56  ;;  %v6605_v56 = vsel %vm314_vm7, 1.0, %v7882_v11 }
0x1349   : > { %v5583_v39 = vmul.f32 %v5578_v50, %v5547_v31  ;;  %v5540_v40 = vsel %vm5538_vm6, %v5539_v32, %v5537_v1 }
0x134a   : > { %v5582_v37 = vmul.f32 %v5574_v38, %v5540_v40 }
0x134b   : > { %v5590_v25 = vmul.f32 1.442695, %v5583_v39 }
0x134c   : > { %v5588_v42 = vmul.f32 1.442695, %v5582_v37 }
0x134d   : > { %7839 = vpow2.f32 %v5590_v25 }
0x134e   : > { %7841 = vpow2.f32 %v5588_v42 }
0x134f   : > { %v7836_v17 = vpop.eup %7835 }
0x1350   : > { %v7838_v22 = vpop.eup %7837  ;;  %v5593_v43 = vmax.f32 %v7836_v17, 1e-05 }
0x1351   : > { %v5592_v41 = vmax.f32 %v7838_v22, 1e-05 }
0x1352   : > { %v5597_v61 = vmin.f32 %v5593_v43, 100000.0 }
0x1353   : > { %v5596_v59 = vmin.f32 %v5592_v41, 100000.0 }
0x1354   : > { %v5601_v63 = vmul.f32 %v5597_v61, %v8898_v23 }
0x1355   : > { %v5600_v20 = vmul.f32 %v5596_v59, %v8896_v15 }
0x1356   : > { %v5607_v44 = vsel %vm1031_vm2, %v5601_v63, -inf }
0x1357   : > { %v7840_v45 = vpop.eup %7839  ;;  %5608 = vmax.xlane.f32.xlu0 %v5607_v44  ;;  %v5604_v58 = vsel %vm1031_vm2, %v5600_v20, -inf }
0x1358   : > { %v7842_v47 = vpop.eup %7841  ;;  %5605 = vmax.xlane.f32.xlu1 %v5604_v58  ;;  %v5595_v48 = vmax.f32 %v7840_v45, 1e-05 }
0x1359   : > { %v5594_v49 = vmax.f32 %v7842_v47, 1e-05 }
0x135a   : > { %v5599_v52 = vmin.f32 %v5595_v48, 100000.0  ;;  %v6711_v48 = vld [vmem:[%s9182_s3 + $0x478] ss:$0 sm:$0xff] }
0x135b   : > { %v5598_v51 = vmin.f32 %v5594_v49, 100000.0 }
0x135c   : > { %v5603_v33 = vmul.f32 %v5599_v52, %v8906_v36 }
0x135d   : > { %v5602_v18 = vmul.f32 %v5598_v51, %v8904_v34 }
0x135e   : > { %v5613_v23 = vsel %vm1031_vm2, %v5603_v33, -inf }
0x135f   : > { %5614 = vmax.xlane.f32.xlu1 %v5613_v23  ;;  %v5610_v15 = vsel %vm1031_vm2, %v5602_v18, -inf }
0x1360   : > { %5611 = vmax.xlane.f32.xlu0 %v5610_v15 }
0x13e4   : > { %v5609_v53 = vpop.xlane.xlu0 %5608 }
0x13e5   : > { %v5617_v55 = vsub.f32 %v5601_v63, %v5609_v53  ;;  %v5606_v62 = vpop.xlane.xlu1 %5605 }
0x13e6   : > { %v5616_v57 = vsub.f32 %v5600_v20, %v5606_v62  ;;  %v5983_v62 = vld [vmem:[%s9182_s3 + $0x490] sm:$0xff] }
0x13e7   : > { %v5622_v7 = vmul.f32 1.442695, %v5617_v55 }
0x13e8   : > { %v5620_v0 = vmul.f32 1.442695, %v5616_v57  ;;  %v5984_v57 = vld [vmem:[%s9182_s3 + $0x498] sm:$0xff] }
0x13e9   : > { %7843 = vpow2.f32 %v5622_v7  ;;  %v7648_v7 = vpack.c.bf16 %v5984_v57, %v5983_v62  ;;  %v6337_v57 = vld [vmem:[%s9183_s4 + $0xb8] sm:$0xff] }
0x13ea   : > { %7845 = vpow2.f32 %v5620_v0  ;;  %v5986_v0 = vld [vmem:[%s9182_s3 + $0x4a8] sm:$0xff] }
0x13ec   : > { %v5615_v2 = vpop.xlane.xlu1 %5614 }
0x13ed   : > { %v5619_v21 = vsub.f32 %v5603_v33, %v5615_v2  ;;  %v5612_v4 = vpop.xlane.xlu0 %5611 }
0x13ee   : > { %v5618_v36 = vsub.f32 %v5602_v18, %v5612_v4  ;;  %v6067_v4 = vld [vmem:[%s9182_s3 + $0x4c0] sm:$0xff] }
0x13ef   : > { %v5626_v5 = vmul.f32 1.442695, %v5619_v21  ;;  %v6066_v21 = vld [vmem:[%s9182_s3 + $0x4b8] sm:$0xff] }
0x13f0   : > { %v5624_v34 = vmul.f32 1.442695, %v5618_v36  ;;  %v6068_v36 = vld [vmem:[%s9182_s3 + $0x4c8] sm:$0xff] }
0x13f1   : > { %7847 = vpow2.f32 %v5626_v5  ;;  %v7654_v5 = vpack.c.bf16 %v6067_v4, %v6066_v21  ;;  %v6341_v21 = vld [vmem:[%s9183_s4 + $0xd8] sm:$0xff]  ;;  %v6343_v4 = vld [vmem:[%s9183_s4 + $0xe8] sm:$0xff] }
0x13f2   : > { %7849 = vpow2.f32 %v5624_v34  ;;  %v6069_v34 = vld [vmem:[%s9182_s3 + $0x4d0] sm:$0xff] }
0x13f3   : > { %v7844_v8 = vpop.eup %7843 }
0x13f4   : > { %v7846_v9 = vpop.eup %7845  ;;  %v5631_v24 = vsel %vm1031_vm2, %v7844_v8, 0.0 }
0x13f5   : > { %5632 = vadd.xlane.f32.xlu1 %v5631_v24  ;;  %v5628_v6 = vsel %vm1031_vm2, %v7846_v9, 0.0  ;;  %v6071_v24 = vld [vmem:[%s9182_s3 + $0x4e0] sm:$0xff] }
0x13f6   : > { %5629 = vadd.xlane.f32.xlu0 %v5628_v6 }
0x13fb   : > { %v7848_v10 = vpop.eup %7847 }
0x13fc   : > { %v7850_v13 = vpop.eup %7849  ;;  %v5637_v16 = vsel %vm1031_vm2, %v7848_v10, 0.0 }
0x13fd   : > { %5638 = vadd.xlane.f32.xlu1 %v5637_v16  ;;  %v5634_v12 = vsel %vm1031_vm2, %v7850_v13, 0.0 }
0x13fe   : > { %5635 = vadd.xlane.f32.xlu0 %v5634_v12 }
0x1482   : > { %v5633_v30 = vpop.xlane.xlu1 %5632 }
0x1483   : > { %7851 = vrcp.f32 %v5633_v30  ;;  %v5630_v14 = vpop.xlane.xlu0 %5629  ;;  %v6712_v30 = vld [vmem:[%s9182_s3 + $0x480] ss:$0 sm:$0xff] }
0x1484   : > { %7853 = vrcp.f32 %v5630_v14 }
0x148a   : > { %v5639_v26 = vpop.xlane.xlu1 %5638 }
0x148b   : > { %7855 = vrcp.f32 %v5639_v26  ;;  %v5636_v27 = vpop.xlane.xlu0 %5635  ;;  %v6713_v26 = vld [vmem:[%s9182_s3 + $0x488] ss:$0 sm:$0xff] }
0x148c   : > { %7857 = vrcp.f32 %v5636_v27 }
0x148d   : > { %v7852_v29 = vpop.eup %7851 }
0x148e   : > { %v7854_v28 = vpop.eup %7853  ;;  %v5645_v32 = vmul.f32 %v7852_v29, %v7844_v8  ;;  %v7657_v8 = vpack.c.bf16 %v6069_v34, %v6068_v36 }
0x148f   : > { %v5644_v50 = vmul.f32 %v7854_v28, %v7846_v9  ;;  %v6070_v9 = vld [vmem:[%s9182_s3 + $0x4d8] sm:$0xff]  ;;  %v6073_v28 = vld [vmem:[%s9182_s3 + $0x4f0] sm:$0xff] }
0x1490   : > { %v5649_v31 = vmul.f32 %v6605_v56, %v5645_v32  ;;  %v7660_v6 = vpack.c.bf16 %v6071_v24, %v6070_v9 }
0x1491   : > { %v5648_v1 = vmul.f32 %v6605_v56, %v5644_v50  ;;  %v6714_v50 = vld [vmem:[%s9182_s3 + $0x4b0] ss:$0 sm:$0xff] }
0x1492   : > { %7421 = vmatmul.mubr.msk.f32.vlgmr.msra.gmra.mrb[56].mxu1 %vm1031_vm2, %v5649_v31 }
0x1493   : > { %7416 = vmatmul.mubr.msk.f32.vlgmr.msra.gmra.mrb[60].mxu0 %vm1031_vm2, %v5648_v1  ;;  %7429 = vmatpush3.msra.mxu1 %v8888_v35 }
0x1494   : > { %7424 = vmatpush3.msra.mxu0 %v8886_v19  ;;  %7425 = vmatprep.mubr.msk.f32.mxu0 %vm7881_vm0, %v7882_v11 }
0x1495   : > { %v7856_v38 = vpop.eup %7855  ;;  %7430 = vmatprep.mubr.msk.f32.mxu1 %vm7881_vm0, %v7882_v11  ;;  %7647 = vmatprep.subr.bf16.mxu0 %v7880_v3 }
0x1496   : > { %v7858_v39 = vpop.eup %7857  ;;  %v5647_v40 = vmul.f32 %v7856_v38, %v7848_v10  ;;  %7653 = vmatprep.subr.bf16.mxu1 %v7880_v3 }
0x1497   : > { %v5646_v37 = vmul.f32 %v7858_v39, %v7850_v13 }
0x1498   : > { %v5651_v25 = vmul.f32 %v6605_v56, %v5647_v40  ;;  %v6716_v40 = vld [vmem:[%s9182_s3 + $0x4f8] ss:$0 sm:$0xff] }
0x1499   : > { %v5650_v42 = vmul.f32 %v6605_v56, %v5646_v37  ;;  %v6072_v56 = vld [vmem:[%s9182_s3 + $0x4e8] sm:$0xff] }
0x149a   : > { %7431 = vmatmul.mubr.msk.f32.vlgmr.msra.gmra.mrb[58].mxu1 %vm1031_vm2, %v5651_v25  ;;  %v7663_v32 = vpack.c.bf16 %v6073_v28, %v6072_v56  ;;  %v6345_v56 = vld [vmem:[%s9183_s4 + $0xf8] sm:$0xff]  ;;  %v6347_v28 = vld [vmem:[%s9183_s4 + $0x108] sm:$0xff] }
0x149b   : > { %7426 = vmatmul.mubr.msk.f32.vlgmr.msra.gmra.mrb[62].mxu0 %vm1031_vm2, %v5650_v42  ;;  %7460 = vmatprep.mubr.msk.f32.mxu1 %vm7881_vm0, %v7882_v11  ;;  %vm6488_vm2 = vcmask 0  }
0x149c   : > { %7441 = vmatprep.mubr.msk.f32.mxu0 %vm7881_vm0, %v7882_v11  ;;  %7649 = vmatpush3.bf16.msra.mxu0 %v7648_v7  ;;  %v6339_v7 = vld [vmem:[%s9183_s4 + $0xc8] sm:$0xff] }
0x149d   : > { %7650 = vmatprep.subr.bf16.mxu0 %v7880_v3  ;;  %7655 = vmatpush3.bf16.msra.mxu1 %v7654_v5  ;;  %v7685_v5 = vpack.c.bf16 %v6343_v4, %v6341_v21 }
0x149e   : > { %7656 = vmatprep.subr.bf16.mxu1 %v7880_v3 }
0x14a1   : > { %7658 = vmatpush3.bf16.msra.mxu1 %v7657_v8 }
0x14a2   : > { %7659 = vmatprep.subr.bf16.mxu1 %v7880_v3 }
0x14a5   : > { %7661 = vmatpush3.bf16.msra.mxu1 %v7660_v6  ;;  %v6718_v6 = vld [vmem:[%s9182_s3 + $0x500] ss:$0 sm:$0xff] }
0x14a6   : > { %7662 = vmatprep.subr.bf16.mxu1 %v7880_v3 }
0x14a9   : > { %7664 = vmatpush3.bf16.msra.mxu1 %v7663_v32  ;;  %v7689_v32 = vpack.c.bf16 %v6347_v28, %v6345_v56 }
0x1565   : > { %v5794_v19 = vpop.f32.mrb[56].mxu1 }
0x1566   : > { %v5721_v35 = vpop.f32.mrb[60].mxu0  ;;  %v5945_v17 = vsel %vm447_vm1, %v5794_v19, 0.0  ;;  %v7422_v22 = vpop.f32.mrb[57].mxu1 }
0x1567   : > { %v5944_v43 = vsel %vm447_vm1, %v5721_v35, 0.0  ;;  %v7417_v41 = vpop.f32.mrb[61].mxu0 }
0x1568   : > { %v5946_v61 = vadd.f32 %v5945_v17, %v5944_v43 }
0x156d   : > { %v5940_v59 = vpop.f32.mrb[58].mxu1 }
0x156e   : > { %v5867_v63 = vpop.f32.mrb[62].mxu0  ;;  %v7432_v20 = vpop.f32.mrb[59].mxu1  ;;  %v5949_v47 = vsel %vm447_vm1, %v5940_v59, 0.0  ;;  %v6182_v59 = vld [vmem:[%s9183_s4 + $0x40] sm:$0xff] }
0x156f   : > { %v5947_v44 = vsel %vm447_vm1, %v5867_v63, 0.0  ;;  %v7427_v45 = vpop.f32.mrb[63].mxu0  ;;  %v6183_v63 = vld [vmem:[%s9183_s4 + $0x50] sm:$0xff] }
0x1570   : > { %v5948_v58 = vadd.f32 %v5947_v44, %v5946_v61  ;;  %v7666_v20 = vpack.c.bf16 %v6183_v63, %v6182_v59  ;;  %v6184_v44 = vld [vmem:[%s9183_s4 + $0x60] sm:$0xff]  ;;  %v6185_v45 = vld [vmem:[%s9183_s4 + $0x70] sm:$0xff] }
0x1572   : > { %v5950_v49 = vadd.f32 %v5949_v47, %v5948_v58  ;;  %v7669_v58 = vpack.c.bf16 %v6185_v45, %v6184_v44  ;;  %v6178_v47 = vld [vmem:[%s9183_s4] sm:$0xff] }
0x1574   : > { %v5956_v52 = vadd.f32 %v6711_v48, %v5950_v49  ;;  %v6179_v48 = vld [vmem:[%s9183_s4 + $0x10] sm:$0xff] }
0x1575   : > { %v7672_v49 = vpack.c.bf16 %v6179_v48, %v6178_v47 }
0x1576   : > { %v5957_v51 = vadd.f32 %v5956_v52, %v8724_v46  ;;  %v5985_v46 = vld [vmem:[%s9182_s3 + $0x4a0] sm:$0xff] }
0x1577   : > { %v7651_v2 = vpack.c.bf16 %v5986_v0, %v5985_v46  ;;  %v7871_v52 = vld [vmem:[%s8354_s27] sm:$0xff]  ;;  %v6336_v46 = vld [vmem:[%s9183_s4 + $0xb0] sm:$0xff]  ;;  %v7681_v0 = vpack.c.bf16 %v6339_v7, %v6337_v57 }
0x1578   : > { %v5960_v33 = vsel %vm447_vm1, %v5957_v51, 0.0 }
0x1579   : > { %5961 = vadd.xlane.f32.xlu0 %v5960_v33  ;;  %7652 = vmatpush3.bf16.msra.mxu0 %v7651_v2  ;;  %v6181_v33 = vld [vmem:[%s9183_s4 + $0x30] sm:$0xff]  ;;  %v6338_v2 = vld [vmem:[%s9183_s4 + $0xc0] sm:$0xff] }
0x157a   : > { %7665 = vmatprep.subr.bf16.mxu0 %v7880_v3  ;;  %v7683_v36 = vpack.c.bf16 %v6338_v2, %v6336_v46 }
0x1606   : > { %v5962_v18 = vpop.xlane.xlu0 %5961 }
0x1607   : > { %v5963_v23 = vmul.f32 0.03125, %v5962_v18 }
0x1609   : > { %v5964_v15 = vsub.f32 %v5957_v51, %v5963_v23  ;;  %v6180_v51 = vld [vmem:[%s9183_s4 + $0x20] sm:$0xff]  ;;  %v6333_v23 = vld [vmem:[%s9183_s4 + $0x98] sm:$0xff] }
0x160a   : > { %v7675_v18 = vpack.c.bf16 %v6181_v33, %v6180_v51 }
0x160b   : > { %v5965_v53 = vmul.f32 %v5964_v15, %v5964_v15 }
0x160d   : > { %v5966_v55 = vsel %vm447_vm1, %v5965_v53, 0.0 }
0x160e   : > { %5967 = vadd.xlane.f32.xlu1 %v5966_v55  ;;  %v6334_v55 = vld [vmem:[%s9183_s4 + $0xa0] sm:$0xff] }
0x169b   : > { %v5968_v10 = vpop.xlane.xlu1 %5967 }
0x169c   : > { %v5969_v13 = vmul.f32 0.03125, %v5968_v10 }
0x169e   : > { %v5970_v16 = vadd.f32 1e-05, %v5969_v13  ;;  %v6719_v13 = vld [vmem:[%s9182_s3 + $0x508] ss:$0 sm:$0xff] }
0x16a0   : > { %7859 = vrsqrt.f32 %v5970_v16 }
0x16aa   : > { %v7860_v12 = vpop.eup %7859 }
0x16ab   : > { %v5972_v14 = vmul.f32 %v7860_v12, %v5964_v15  ;;  %v6335_v15 = vld [vmem:[%s9183_s4 + $0xa8] sm:$0xff] }
0x16ac   : > { %v7677_v53 = vpack.c.bf16 %v6335_v15, %v6333_v23 }
0x16ad   : > { %v5977_v27 = vmul.f32 %v6712_v30, %v5972_v14 }
0x16ae   : > { %7678 = vmatprep.subr.bf16.mxu1 %v7677_v53 }
0x16af   : > { %v5982_v29 = vadd.f32 %v6713_v26, %v5977_v27  ;;  %v6340_v26 = vld [vmem:[%s9183_s4 + $0xd0] sm:$0xff]  ;;  %v6342_v27 = vld [vmem:[%s9183_s4 + $0xe0] sm:$0xff] }
0x16b1   : > { %7442 = vmatmul.mubr.msk.f32.vlgmr.msra.gmra.mrb[64].mxu0 %vm447_vm1, %v5982_v29 }
0x16b2   : > { %7471 = vmatprep.mubr.msk.f32.mxu0 %vm7881_vm0, %v7882_v11  ;;  %7667 = vmatpush3.bf16.msra.mxu0 %v7666_v20 }
0x16b3   : > { %7668 = vmatprep.subr.bf16.mxu0 %v7880_v3 }
0x16b6   : > { %7670 = vmatpush3.bf16.msra.mxu0 %v7669_v58 }
0x16b7   : > { %7671 = vmatprep.subr.bf16.mxu0 %v7880_v3 }
0x16b9   : > { %7472 = vmatmul.mubr.msk.f32.vlgmr.msra.gmra.mrb[66].mxu0 %vm447_vm1, %v7871_v52 }
0x16ba   : > { %7673 = vmatpush3.bf16.msra.mxu0 %v7672_v49  ;;  %7482 = vmatprep.mubr.msk.f32.mxu0 %vm7881_vm0, %v7882_v11  ;;  %vm6463_vm0 = vcmask 7168  }
0x16bb   : > { %7674 = vmatprep.subr.bf16.mxu0 %v7880_v3  ;;  %v6332_v3 = vld [vmem:[%s9183_s4 + $0x90] sm:$0xff] }
0x16bc   : > { %v7679_v62 = vpack.c.bf16 %v6334_v55, %v6332_v3 }
0x16be   : > { %7676 = vmatpush3.bf16.msra.mxu0 %v7675_v18 }
0x1784   : > { %v6061_v31 = vpop.f32.mrb[64].mxu0 }
0x1785   : > { %v6062_v1 = vadd.f32 %v6714_v50, %v6061_v31  ;;  %v7443_v38 = vpop.f32.mrb[65].mxu0  ;;  %v6344_v50 = vld [vmem:[%s9183_s4 + $0xf0] sm:$0xff]  ;;  %v6346_v31 = vld [vmem:[%s9183_s4 + $0x100] sm:$0xff] }
0x1787   : > { %v6065_v39 = vmax.f32 %v6062_v1, 0.0  ;;  %v7691_v1 = vpack.c.bf16 %v6346_v31, %v6344_v50 }
0x1789   : > { %7461 = vmatmul.mubr.msk.f32.vlgmr.msra.gmra.mrb[60].mxu1 %vm2236_vm13, %v6065_v39  ;;  %v6329_v39 = vld [vmem:[%s9183_s4 + $0x80] ss:$0 sm:$0xff] }
0x178a   : > { %6428 = vmatprep.mubr.f32.mxu1 %v7882_v11  ;;  %7680 = vmatpush1.bf16.msra.mxu1 %v7679_v62  ;;  %v6465_v62 = vld [vmem:[%s282_s7] sm:$0xff] }
0x178b   : > { %7682 = vmatprep.subr.bf16.mxu1 %v7681_v0 }
0x178c   : > { %v6252_v30 = vpop.f32.mrb[66].mxu0 }
0x178d   : > { %v7473_v14 = vpop.f32.mrb[67].mxu0 }
0x178e   : > { %7684 = vmatpush1.bf16.msra.mxu1 %v7683_v36 }
0x178f   : > { %7686 = vmatprep.subr.bf16.mxu1 %v7685_v5 }
0x185c   : > { %v6148_v37 = vpop.f32.mrb[60].mxu1 }
0x185d   : > { %v6149_v25 = vadd.f32 %v6716_v40, %v6148_v37  ;;  %v7462_v42 = vpop.f32.mrb[61].mxu1 }
0x185f   : > { %v6152_v19 = vadd.f32 %v6149_v25, %v5982_v29  ;;  %v7687_v29 = vpack.c.bf16 %v6342_v27, %v6340_v26 }
0x1861   : > { %v6155_v35 = vsel %vm447_vm1, %v6152_v19, 0.0  ;;  %7688 = vmatpush1.bf16.msra.mxu1 %v7687_v29 }
0x1862   : > { %6156 = vadd.xlane.f32.xlu0 %v6155_v35  ;;  %7690 = vmatprep.subr.bf16.mxu1 %v7689_v32  ;;  %v6357_v35 = vsub.s32 1, %v8090_v54  ;;  %v6455_v54 = vld [vmem:[%s9183_s4 + $0x130] ss:$0 sm:$0xff] }
0x1865   : > { %7692 = vmatpush1.bf16.msra.mxu1 %v7691_v1 }
0x18ef   : > { %v6157_v17 = vpop.xlane.xlu0 %6156 }
0x18f0   : > { %v6158_v22 = vmul.f32 0.03125, %v6157_v17 }
0x18f2   : > { %v6159_v43 = vsub.f32 %v6152_v19, %v6158_v22  ;;  %v6722_v19 = vld [vmem:[%s9183_s4 + $0x110] ss:$8 sm:$0x3]  ;;  %v6724_v22 = vld [vmem:[%s9183_s4 + $0x120] ss:$8 sm:$0x3] }
0x18f3   : > { %v6354_v17 = vrot.slane %v6722_v19, %v8100_v60  ;;  %v6443_v59 = vrot.slane %v6724_v22, %v8100_v60  ;;  %v6447_v44 = vrot.slane %v6724_v22, %v6357_v35 }
0x18f4   : > { %v6160_v41 = vmul.f32 %v6159_v43, %v6159_v43 }
0x18f6   : > { %v6161_v61 = vsel %vm447_vm1, %v6160_v41, 0.0 }
0x18f7   : > { %6162 = vadd.xlane.f32.xlu1 %v6161_v61 }
0x1984   : > { %v6163_v34 = vpop.xlane.xlu1 %6162 }
0x1985   : > { %v6164_v8 = vmul.f32 0.03125, %v6163_v34 }
0x1987   : > { %v6165_v9 = vadd.f32 1e-05, %v6164_v8 }
0x1989   : > { %7861 = vrsqrt.f32 %v6165_v9 }
0x1993   : > { %v7862_v24 = vpop.eup %7861 }
0x1994   : > { %v6167_v10 = vmul.f32 %v7862_v24, %v6159_v43  ;;  %v6358_v43 = vrot.slane %v6722_v19, %v6357_v35 }
0x1996   : > { %v6172_v16 = vmul.f32 %v6718_v6, %v6167_v10 }
0x1998   : > { %v6177_v12 = vadd.f32 %v6719_v13, %v6172_v16 }
0x199a   : > { %7483 = vmatmul.mubr.msk.f32.vlgmr.msra.gmra.mrb[68].mxu0 %vm447_vm1, %v6177_v12  ;;  %vm6466_vm1 = vcmp.gt.f32.partialorder %v6465_v62, -0.9 }
0x199b   : > { %v6726_v4 = vsel %vm6466_vm1, 1.0, %v7882_v11 }
0x1a6d   : > { %v6325_v38 = vpop.f32.mrb[68].mxu0 }
0x1a6e   : > { %v6326_v40 = vadd.f32 %v6325_v38, %v6252_v30  ;;  %v7484_v37 = vpop.f32.mrb[69].mxu0 }
0x1a70   : > { %v6330_v25 = vadd.f32 %v6329_v39, %v6326_v40 }
0x1a72   : > { %v6331_v42 = vmax.f32 %v6330_v25, 0.0 }
0x1a74   : > { %6723 = vmatmul.mubr.msk.f32.vlgmr.msra.gmra.mrb[62].mxu1 %vm2236_vm13, %v6331_v42 }
0x1b47   : > { %v6430_v41 = vpop.f32.mrb[62].mxu1 }
0x1b48   : > { %v6431_v61 = vadd.f32 %v6430_v41, %v6354_v17  ;;  %v6432_v63 = vpop.f32.mrb[63].mxu1 }
0x1b49   : > { %v6433_v20 = vadd.f32 %v6432_v63, %v6358_v43 }
0x1b4a   : > { %v6435_v45 = vmax.f32 %v6431_v61, 0.0 }
0x1b4b   : > { %v6436_v58 = vmax.f32 %v6433_v20, 0.0 }
0x1b4c   : > { %v6450_v47 = vmul.f32 %v6443_v59, %v6435_v45 }
0x1b4d   : > { %v6451_v48 = vmul.f32 %v6447_v44, %v6436_v58 }
0x1b4f   : > { %v6452_v49 = vadd.f32 %v6451_v48, %v6450_v47 }
0x1b51   : > { %6453 = vadd.xlane.f32.xlu0 %v6452_v49 }
0x1bde   : > { %v6454_v52 = vpop.xlane.xlu0 %6453 }
0x1bdf   : > { %v6456_v51 = vadd.f32 %v6455_v54, %v6454_v52 }
0x1be1   : > { %v6725_v33 = vmul.f32 -1.442695, %v6456_v51  ;;  %v6472_v18 = vand.u32 2147483647, %v6456_v51  ;;  %v6469_v7 = vmax.f32 %v6456_v51, 0.0  ;;  %v6470_v46 = vmul.f32 %v6465_v62, %v6456_v51 }
0x1be3   : > { %7863 = vpow2.f32 %v6725_v33  ;;  %v6473_v60 = vsub.f32 0.0, %v6472_v18  ;;  %v6471_v2 = vsub.f32 %v6469_v7, %v6470_v46 }
0x1be5   : > { %v6474_v23 = vmul.f32 1.442695, %v6473_v60 }
0x1be7   : > { %7865 = vpow2.f32 %v6474_v23 }
0x1bed   : > { %v7864_v15 = vpop.eup %7863 }
0x1bee   : > { %v6460_v3 = vadd.f32 1.0, %v7864_v15 }
0x1bf0   : > { %7867 = vrcp.f32 %v6460_v3 }
0x1bf1   : > { %v7866_v53 = vpop.eup %7865 }
0x1bf2   : > { %v6476_v55 = vadd.f32 1.0, %v7866_v53 }
0x1bf4   : > { %7869 = vlog2.f32 %v6476_v55 }
0x1bfa   : > { %v7868_v57 = vpop.eup %7867 }
0x1bfb   : > { %6464 = vst.msk [vmem:[%s286_s10] sm:$0xff] %vm6463_vm0, %v7868_v57 }
0x1bfe   : > { %v7870_v0 = vpop.eup %7869 }
0x1bff   : > { %v6478_v21 = vmul.f32 0.6931472, %v7870_v0 }
0x1c01   : > { %v6479_v36 = vadd.f32 %v6478_v21, %v6471_v2 }
0x1c03   : > { %v6480_v5 = vmul.f32 %v6726_v4, %v6479_v36 }
0x1c05   : > { %v6481_v34 = vsel %vm6463_vm0, %v6480_v5, 0.0 }
0x1c06   : > { %v6482_v8 = vrot.slane %v6481_v34, 4 }
0x1c08   : > { %v6483_v9 = vadd.f32 %v6482_v8, %v6481_v34 }
0x1c0a   : > { %v6484_v24 = vrot.slane %v6483_v9, 2 }
0x1c0c   : > { %v6485_v6 = vadd.f32 %v6484_v24, %v6483_v9 }
0x1c0e   : > { %v6486_v10 = vrot.slane %v6485_v6, 1 }
0x1c10   : > { %v6487_v13 = vadd.f32 %v6486_v10, %v6485_v6 }
0x1c12   : > { %6489 = vst.msk [vmem:[%s289_s12] sm:$0x1] %vm6488_vm2, %v6487_v13 }
0x1c13 PF: > { %s17_s21 = sadd.s32 1, %s7878_s21  }
0x1c14   : > { %p14_p4 = scmp.ge.s32.totalorder %s17_s21, 4  }
0x1c16   :  { %16 = sbr.rel (!%p14_p4) target bundleno = 1 (0x1), region = 90 }

</bundles_post_ra>
